<compile_context>
chip_gen: v7x
topology: tpu7x:2x2x1
jax: 0.10.0
libtpu: 0.0.40
codegen_flags: <defaults>
</compile_context>

<pallas_src>
import functools

import jax
import jax.numpy as jnp
from jax import lax
from jax.experimental import pallas as pl
from jax.experimental.pallas import tpu as pltpu


def _resblock_kernel(x_ref, w1_ref, b1_ref, w2_ref, b2_ref, o_ref, *, width):
    """One batch element per grid step, flattened-spatial layout.

    x_ref  : (1, H*W, Cin)          input (also the residual)
    w*_ref : (3*Cin, 3*Cout)        conv weights with BN scale folded in;
                                    rows = ky*Cin + ci, cols = kx*Cout + co
    b*_ref : (1, Cout)              folded BatchNorm bias
    o_ref  : (1, H*W, Cout)         output
    """
    m = x_ref.shape[1]                     # H * W
    cout = o_ref.shape[2]

    # Edge masks (computed once, reused by both convs).
    m_idx = lax.broadcasted_iota(jnp.int32, (m, 1), 0)
    w_idx = m_idx % width
    has_up = m_idx >= width                # row h-1 exists
    has_down = m_idx < (m - width)         # row h+1 exists
    has_left = w_idx > 0                   # col w-1 exists
    has_right = w_idx < (width - 1)        # col w+1 exists

    def conv3x3(inp, w_ref, b_ref):
        # Vertical taps: shift by whole rows (W sublanes) via XLU roll + mask.
        up = jnp.where(has_up, pltpu.roll(inp, shift=width, axis=0), 0.0)
        down = jnp.where(has_down, pltpu.roll(inp, shift=m - width, axis=0), 0.0)
        patch = jnp.concatenate([up, inp, down], axis=-1)      # (m, 3*Cin)
        # Single fat matmul: K = 3*Cin, N = 3*Cout (all three kernel columns).
        big = jnp.dot(patch, w_ref[...],
                      preferred_element_type=jnp.float32)      # (m, 3*Cout)
        a_l = big[:, :cout]
        a_c = big[:, cout:2 * cout]
        a_r = big[:, 2 * cout:]
        # Horizontal taps: +/-1 shift along W folded into the flattened axis.
        out = a_c + b_ref[0]
        out = out + jnp.where(has_left, pltpu.roll(a_l, shift=1, axis=0), 0.0)
        out = out + jnp.where(has_right,
                              pltpu.roll(a_r, shift=m - 1, axis=0), 0.0)
        return out

    x2 = x_ref[0]                                              # (m, Cin) f32

    # conv1 (BN1 scale folded) -> +bias -> ReLU
    y = jnp.maximum(conv3x3(x2, w1_ref, b1_ref), 0.0)

    # conv2 (BN2 scale folded) -> +bias -> +residual -> ReLU
    y = conv3x3(y, w2_ref, b2_ref)
    o_ref[0] = jnp.maximum(y + x2, 0.0).astype(o_ref.dtype)


@jax.jit
def residual_block(x_nhwc, w1cat, b1, w2cat, b2):
    """x_nhwc: (N,H,W,Cin) f32; w*cat: (3*Cin, 3*Cout); b*: (1, Cout)."""
    n, h, w, cin = x_nhwc.shape
    cout = w1cat.shape[-1] // 3
    assert cin == cout, "identity residual requires Cin == Cout"
    m = h * w
    x_flat = x_nhwc.reshape(n, m, cin)          # metadata-only reshape in XLA

    kernel = functools.partial(_resblock_kernel, width=w)
    grid_spec = pltpu.PrefetchScalarGridSpec(
        num_scalar_prefetch=0,
        grid=(n,),
        in_specs=[
            pl.BlockSpec((1, m, cin), lambda i: (i, 0, 0)),
            pl.BlockSpec((3 * cin, 3 * cout), lambda i: (0, 0)),
            pl.BlockSpec((1, cout), lambda i: (0, 0)),
            pl.BlockSpec((3 * cout, 3 * cout), lambda i: (0, 0)),
            pl.BlockSpec((1, cout), lambda i: (0, 0)),
        ],
        out_specs=pl.BlockSpec((1, m, cout), lambda i: (i, 0, 0)),
    )
    out_flat = pl.pallas_call(
        kernel,
        out_shape=jax.ShapeDtypeStruct((n, m, cout), jnp.float32),
        grid_spec=grid_spec,
        compiler_params=pltpu.CompilerParams(
            dimension_semantics=("parallel",)),
    )(x_flat, w1cat, b1, w2cat, b2)
    return out_flat.reshape(n, h, w, cout)


def _fold_bn_into_conv(w_oihw, gamma, beta, mean, var, eps=1e-5):
    """Fold eval-mode BN into the conv weight; return kernel-layout weight.

    Returns:
      w_cat : (3*Cin, 3*Cout) with rows ky*Cin + ci, cols kx*Cout + co
      bias  : (1, Cout)
    """
    scale = gamma / jnp.sqrt(var + eps)                     # (Cout,)
    bias = beta - mean * scale                              # (Cout,)
    w = w_oihw * scale[:, None, None, None]                 # (Cout,Cin,ky,kx)
    cout, cin = w.shape[0], w.shape[1]
    w_cat = jnp.transpose(w, (2, 1, 3, 0)).reshape(3 * cin, 3 * cout)
    return w_cat, bias[None, :]


def _reference(x_nhwc, w1_hwio, g1, be1, m1, v1, w2_hwio, g2, be2, m2, v2):
    """Pure-JAX reference (eval-mode BN) for validation."""
    dn = ("NHWC", "HWIO", "NHWC")
    y = lax.conv_general_dilated(x_nhwc, w1_hwio, (1, 1), "SAME",
                                 dimension_numbers=dn)
    y = (y - m1) / jnp.sqrt(v1 + 1e-5) * g1 + be1
    y = jnp.maximum(y, 0.0)
    y = lax.conv_general_dilated(y, w2_hwio, (1, 1), "SAME",
                                 dimension_numbers=dn)
    y = (y - m2) / jnp.sqrt(v2 + 1e-5) * g2 + be2
    return jnp.maximum(y + x_nhwc, 0.0)


if __name__ == "__main__":
    N, C, H, W = 2, 4, 16, 16   # in_channels == out_channels, stride=1
    key = jax.random.PRNGKey(0)
    kx, kw1, kw2, kb1, kb2 = jax.random.split(key, 5)

    # Input constructed NCHW (PyTorch convention), transposed to NHWC.
    x_nchw = jax.random.normal(kx, (N, C, H, W), jnp.float32)
    x_nhwc = jnp.transpose(x_nchw, (0, 2, 3, 1))

    # Conv weights: PyTorch (Cout, Cin, 3, 3).
    w1_oihw = jax.random.normal(kw1, (C, C, 3, 3), jnp.float32) * 0.1
    w2_oihw = jax.random.normal(kw2, (C, C, 3, 3), jnp.float32) * 0.1
    # Reference layout (HWIO).
    w1_hwio = jnp.transpose(w1_oihw, (2, 3, 1, 0))
    w2_hwio = jnp.transpose(w2_oihw, (2, 3, 1, 0))

    # Deterministic BatchNorm parameters (eval mode).
    g1 = 1.0 + 0.1 * jnp.arange(C, dtype=jnp.float32)
    be1 = 0.05 * jax.random.normal(kb1, (C,), jnp.float32)
    m1 = 0.02 * jnp.arange(C, dtype=jnp.float32)
    v1 = 1.0 + 0.01 * jnp.arange(C, dtype=jnp.float32)
    g2 = 1.0 - 0.05 * jnp.arange(C, dtype=jnp.float32)
    be2 = 0.05 * jax.random.normal(kb2, (C,), jnp.float32)
    m2 = -0.01 * jnp.arange(C, dtype=jnp.float32)
    v2 = 1.0 + 0.02 * jnp.arange(C, dtype=jnp.float32)

    # Fold BN into conv weights (kernel layout).
    w1_cat, b1 = _fold_bn_into_conv(w1_oihw, g1, be1, m1, v1)
    w2_cat, b2 = _fold_bn_into_conv(w2_oihw, g2, be2, m2, v2)

    out = residual_block(x_nhwc, w1_cat, b1, w2_cat, b2)
    out = jax.block_until_ready(out)

    ref = _reference(x_nhwc, w1_hwio, g1, be1, m1, v1,
                     w2_hwio, g2, be2, m2, v2)
    assert out.shape == (N, H, W, C)
    assert jnp.allclose(out, ref, atol=1e-4, rtol=1e-4), (
        float(jnp.max(jnp.abs(out - ref))))
    print("KERNEL_OK")
</pallas_src>

<mosaic_0001>
module attributes {stable_mosaic.version = 11 : i64} {
  func.func @_resblock_kernel(%arg0: i32, %arg1: memref<1x256x4xf32, #tpu.memory_space<vmem>>, %arg2: memref<12x12xf32, #tpu.memory_space<vmem>>, %arg3: memref<1x4xf32, #tpu.memory_space<vmem>>, %arg4: memref<12x12xf32, #tpu.memory_space<vmem>>, %arg5: memref<1x4xf32, #tpu.memory_space<vmem>>, %arg6: memref<1x256x4xf32, #tpu.memory_space<vmem>>) attributes {dimension_semantics = [#tpu.dimension_semantics<parallel>], iteration_bounds = array<i64: 2>, scalar_prefetch = 0 : i64, scratch_operands = 0 : i64, tpu.core_type = #tpu.core_type<tc>, window_params = [{transform_indices = @transform_0, window_bounds = array<i64: 1, 256, 4>}, {pipeline_mode = #tpu.pipeline_mode<synchronous>, transform_indices = @transform_1, window_bounds = array<i64: 12, 12>}, {pipeline_mode = #tpu.pipeline_mode<synchronous>, transform_indices = @transform_2, window_bounds = array<i64: 1, 4>}, {pipeline_mode = #tpu.pipeline_mode<synchronous>, transform_indices = @transform_3, window_bounds = array<i64: 12, 12>}, {pipeline_mode = #tpu.pipeline_mode<synchronous>, transform_indices = @transform_4, window_bounds = array<i64: 1, 4>}, {transform_indices = @transform_5, window_bounds = array<i64: 1, 256, 4>}]} {
    %0 = tpu.iota {dimensions = array<i32: 0>} : vector<256x1xi32>
    %c16_i32 = arith.constant 16 : i32
    %c0_i32 = arith.constant 0 : i32
    %1 = arith.cmpi eq, %c16_i32, %c0_i32 : i32
    %c1_i32 = arith.constant 1 : i32
    %2 = arith.select %1, %c1_i32, %c16_i32 : i32
    %3 = vector.broadcast %2 : i32 to vector<256x1xi32>
    %4 = arith.remsi %0, %3 : vector<256x1xi32>
    %c0_i32_0 = arith.constant 0 : i32
    %5 = vector.broadcast %c0_i32_0 : i32 to vector<256x1xi32>
    %6 = arith.cmpi ne, %4, %5 : vector<256x1xi32>
    %c0_i32_1 = arith.constant 0 : i32
    %7 = vector.broadcast %c0_i32_1 : i32 to vector<256x1xi32>
    %8 = arith.cmpi slt, %4, %7 : vector<256x1xi32>
    %c0_i32_2 = arith.constant 0 : i32
    %9 = arith.cmpi slt, %2, %c0_i32_2 : i32
    %10 = vector.broadcast %9 : i1 to vector<256x1xi1>
    %11 = vector.broadcast %10 : vector<256x1xi1> to vector<256x1xi1>
    %12 = arith.xori %8, %11 : vector<256x1xi1>
    %13 = arith.andi %12, %6 : vector<256x1xi1>
    %14 = vector.broadcast %2 : i32 to vector<256x1xi32>
    %15 = arith.addi %4, %14 : vector<256x1xi32>
    %16 = arith.select %13, %15, %4 : vector<256x1xi1>, vector<256x1xi32>
    %c16_i32_3 = arith.constant 16 : i32
    %17 = vector.broadcast %c16_i32_3 : i32 to vector<256x1xi32>
    %18 = arith.cmpi sge, %0, %17 : vector<256x1xi32>
    %c240_i32 = arith.constant 240 : i32
    %19 = vector.broadcast %c240_i32 : i32 to vector<256x1xi32>
    %20 = arith.cmpi slt, %0, %19 : vector<256x1xi32>
    %c0_i32_4 = arith.constant 0 : i32
    %21 = vector.broadcast %c0_i32_4 : i32 to vector<256x1xi32>
    %22 = arith.cmpi sgt, %16, %21 : vector<256x1xi32>
    %c15_i32 = arith.constant 15 : i32
    %23 = vector.broadcast %c15_i32 : i32 to vector<256x1xi32>
    %24 = arith.cmpi slt, %16, %23 : vector<256x1xi32>
    %c0 = arith.constant 0 : index
    %c0_5 = arith.constant 0 : index
    %c0_6 = arith.constant 0 : index
    %25 = vector.load %arg1[%c0, %c0_5, %c0_6] : memref<1x256x4xf32, #tpu.memory_space<vmem>>, vector<1x256x4xf32>
    %26 = vector.shape_cast %25 : vector<1x256x4xf32> to vector<256x4xf32>
    %c16_i32_7 = arith.constant 16 : i32
    %27 = tpu.dynamic_rotate %26 by %c16_i32_7 dim 0 : vector<256x4xf32>, i32 -> vector<256x4xf32>
    %cst = arith.constant 0.000000e+00 : f32
    %28 = vector.shape_cast %18 : vector<256x1xi1> to vector<256x1xi1>
    %29 = vector.broadcast %28 : vector<256x1xi1> to vector<256x4xi1>
    %30 = vector.broadcast %cst : f32 to vector<256x4xf32>
    %31 = arith.select %29, %27, %30 : vector<256x4xi1>, vector<256x4xf32>
    %c240_i32_8 = arith.constant 240 : i32
    %32 = tpu.dynamic_rotate %26 by %c240_i32_8 dim 0 : vector<256x4xf32>, i32 -> vector<256x4xf32>
    %cst_9 = arith.constant 0.000000e+00 : f32
    %33 = vector.shape_cast %20 : vector<256x1xi1> to vector<256x1xi1>
    %34 = vector.broadcast %33 : vector<256x1xi1> to vector<256x4xi1>
    %35 = vector.broadcast %cst_9 : f32 to vector<256x4xf32>
    %36 = arith.select %34, %32, %35 : vector<256x4xi1>, vector<256x4xf32>
    %37 = tpu.concatenate %31, %26, %36 in 1 : vector<256x4xf32>, vector<256x4xf32>, vector<256x4xf32> -> vector<256x12xf32>
    %c0_10 = arith.constant 0 : index
    %c0_11 = arith.constant 0 : index
    %38 = vector.load %arg2[%c0_10, %c0_11] : memref<12x12xf32, #tpu.memory_space<vmem>>, vector<12x12xf32>
    %cst_12 = arith.constant dense<0.000000e+00> : vector<256x12xf32>
    %39 = tpu.matmul %37, %38, %cst_12 {dimension_numbers = #tpu.dot_dimension_numbers<[1], [0], [0], [1], [0, 0, 1, 1], [], []>} : vector<256x12xf32>, vector<12x12xf32>, vector<256x12xf32> -> vector<256x12xf32>
    %40 = vector.extract_strided_slice %39 {offsets = [0, 0], sizes = [256, 4], strides = [1, 1]} : vector<256x12xf32> to vector<256x4xf32>
    %41 = vector.extract_strided_slice %39 {offsets = [0, 4], sizes = [256, 4], strides = [1, 1]} : vector<256x12xf32> to vector<256x4xf32>
    %42 = vector.extract_strided_slice %39 {offsets = [0, 8], sizes = [256, 4], strides = [1, 1]} : vector<256x12xf32> to vector<256x4xf32>
    %c0_13 = arith.constant 0 : index
    %c0_14 = arith.constant 0 : index
    %43 = vector.load %arg3[%c0_13, %c0_14] : memref<1x4xf32, #tpu.memory_space<vmem>>, vector<1x4xf32>
    %44 = vector.shape_cast %43 : vector<1x4xf32> to vector<4xf32>
    %45 = vector.shape_cast %44 : vector<4xf32> to vector<1x4xf32>
    %46 = vector.broadcast %45 : vector<1x4xf32> to vector<256x4xf32>
    %47 = arith.addf %41, %46 : vector<256x4xf32>
    %c1_i32_15 = arith.constant 1 : i32
    %48 = tpu.dynamic_rotate %40 by %c1_i32_15 dim 0 : vector<256x4xf32>, i32 -> vector<256x4xf32>
    %cst_16 = arith.constant 0.000000e+00 : f32
    %49 = vector.shape_cast %22 : vector<256x1xi1> to vector<256x1xi1>
    %50 = vector.broadcast %49 : vector<256x1xi1> to vector<256x4xi1>
    %51 = vector.broadcast %cst_16 : f32 to vector<256x4xf32>
    %52 = arith.select %50, %48, %51 : vector<256x4xi1>, vector<256x4xf32>
    %53 = arith.addf %47, %52 : vector<256x4xf32>
    %c255_i32 = arith.constant 255 : i32
    %54 = tpu.dynamic_rotate %42 by %c255_i32 dim 0 : vector<256x4xf32>, i32 -> vector<256x4xf32>
    %cst_17 = arith.constant 0.000000e+00 : f32
    %55 = vector.shape_cast %24 : vector<256x1xi1> to vector<256x1xi1>
    %56 = vector.broadcast %55 : vector<256x1xi1> to vector<256x4xi1>
    %57 = vector.broadcast %cst_17 : f32 to vector<256x4xf32>
    %58 = arith.select %56, %54, %57 : vector<256x4xi1>, vector<256x4xf32>
    %59 = arith.addf %53, %58 : vector<256x4xf32>
    %cst_18 = arith.constant 0.000000e+00 : f32
    %60 = vector.broadcast %cst_18 : f32 to vector<256x4xf32>
    %61 = arith.maximumf %59, %60 : vector<256x4xf32>
    %c16_i32_19 = arith.constant 16 : i32
    %62 = tpu.dynamic_rotate %61 by %c16_i32_19 dim 0 : vector<256x4xf32>, i32 -> vector<256x4xf32>
    %cst_20 = arith.constant 0.000000e+00 : f32
    %63 = vector.shape_cast %18 : vector<256x1xi1> to vector<256x1xi1>
    %64 = vector.broadcast %63 : vector<256x1xi1> to vector<256x4xi1>
    %65 = vector.broadcast %cst_20 : f32 to vector<256x4xf32>
    %66 = arith.select %64, %62, %65 : vector<256x4xi1>, vector<256x4xf32>
    %c240_i32_21 = arith.constant 240 : i32
    %67 = tpu.dynamic_rotate %61 by %c240_i32_21 dim 0 : vector<256x4xf32>, i32 -> vector<256x4xf32>
    %cst_22 = arith.constant 0.000000e+00 : f32
    %68 = vector.shape_cast %20 : vector<256x1xi1> to vector<256x1xi1>
    %69 = vector.broadcast %68 : vector<256x1xi1> to vector<256x4xi1>
    %70 = vector.broadcast %cst_22 : f32 to vector<256x4xf32>
    %71 = arith.select %69, %67, %70 : vector<256x4xi1>, vector<256x4xf32>
    %72 = tpu.concatenate %66, %61, %71 in 1 : vector<256x4xf32>, vector<256x4xf32>, vector<256x4xf32> -> vector<256x12xf32>
    %c0_23 = arith.constant 0 : index
    %c0_24 = arith.constant 0 : index
    %73 = vector.load %arg4[%c0_23, %c0_24] : memref<12x12xf32, #tpu.memory_space<vmem>>, vector<12x12xf32>
    %cst_25 = arith.constant dense<0.000000e+00> : vector<256x12xf32>
    %74 = tpu.matmul %72, %73, %cst_25 {dimension_numbers = #tpu.dot_dimension_numbers<[1], [0], [0], [1], [0, 0, 1, 1], [], []>} : vector<256x12xf32>, vector<12x12xf32>, vector<256x12xf32> -> vector<256x12xf32>
    %75 = vector.extract_strided_slice %74 {offsets = [0, 0], sizes = [256, 4], strides = [1, 1]} : vector<256x12xf32> to vector<256x4xf32>
    %76 = vector.extract_strided_slice %74 {offsets = [0, 4], sizes = [256, 4], strides = [1, 1]} : vector<256x12xf32> to vector<256x4xf32>
    %77 = vector.extract_strided_slice %74 {offsets = [0, 8], sizes = [256, 4], strides = [1, 1]} : vector<256x12xf32> to vector<256x4xf32>
    %c0_26 = arith.constant 0 : index
    %c0_27 = arith.constant 0 : index
    %78 = vector.load %arg5[%c0_26, %c0_27] : memref<1x4xf32, #tpu.memory_space<vmem>>, vector<1x4xf32>
    %79 = vector.shape_cast %78 : vector<1x4xf32> to vector<4xf32>
    %80 = vector.shape_cast %79 : vector<4xf32> to vector<1x4xf32>
    %81 = vector.broadcast %80 : vector<1x4xf32> to vector<256x4xf32>
    %82 = arith.addf %76, %81 : vector<256x4xf32>
    %c1_i32_28 = arith.constant 1 : i32
    %83 = tpu.dynamic_rotate %75 by %c1_i32_28 dim 0 : vector<256x4xf32>, i32 -> vector<256x4xf32>
    %cst_29 = arith.constant 0.000000e+00 : f32
    %84 = vector.shape_cast %22 : vector<256x1xi1> to vector<256x1xi1>
    %85 = vector.broadcast %84 : vector<256x1xi1> to vector<256x4xi1>
    %86 = vector.broadcast %cst_29 : f32 to vector<256x4xf32>
    %87 = arith.select %85, %83, %86 : vector<256x4xi1>, vector<256x4xf32>
    %88 = arith.addf %82, %87 : vector<256x4xf32>
    %c255_i32_30 = arith.constant 255 : i32
    %89 = tpu.dynamic_rotate %77 by %c255_i32_30 dim 0 : vector<256x4xf32>, i32 -> vector<256x4xf32>
    %cst_31 = arith.constant 0.000000e+00 : f32
    %90 = vector.shape_cast %24 : vector<256x1xi1> to vector<256x1xi1>
    %91 = vector.broadcast %90 : vector<256x1xi1> to vector<256x4xi1>
    %92 = vector.broadcast %cst_31 : f32 to vector<256x4xf32>
    %93 = arith.select %91, %89, %92 : vector<256x4xi1>, vector<256x4xf32>
    %94 = arith.addf %88, %93 : vector<256x4xf32>
    %95 = arith.addf %94, %26 : vector<256x4xf32>
    %cst_32 = arith.constant 0.000000e+00 : f32
    %96 = vector.broadcast %cst_32 : f32 to vector<256x4xf32>
    %97 = arith.maximumf %95, %96 : vector<256x4xf32>
    %c0_33 = arith.constant 0 : index
    %c0_34 = arith.constant 0 : index
    %c0_35 = arith.constant 0 : index
    %98 = vector.load %arg6[%c0_33, %c0_34, %c0_35] : memref<1x256x4xf32, #tpu.memory_space<vmem>>, vector<1x256x4xf32>
    %99 = vector.shape_cast %98 : vector<1x256x4xf32> to vector<256x4xf32>
    %100 = vector.shape_cast %97 : vector<256x4xf32> to vector<1x256x4xf32>
    tpu.vector_store %arg6[%c0_33, %c0_34, %c0_35], %100 {strides = array<i32>} : memref<1x256x4xf32, #tpu.memory_space<vmem>>, vector<1x256x4xf32>,
    return
  }
  func.func @transform_0(%arg0: i32) -> (i32, i32, i32) {
    %c0_i32 = arith.constant 0 : i32
    %c0_i32_0 = arith.constant 0 : i32
    %c0_i32_1 = arith.constant 0 : i32
    return %arg0, %c0_i32, %c0_i32_0 : i32, i32, i32
  }
  func.func @transform_1(%arg0: i32) -> (i32, i32) {
    %c0_i32 = arith.constant 0 : i32
    %c0_i32_0 = arith.constant 0 : i32
    %c0_i32_1 = arith.constant 0 : i32
    return %c0_i32, %c0_i32_0 : i32, i32
  }
  func.func @transform_2(%arg0: i32) -> (i32, i32) {
    %c0_i32 = arith.constant 0 : i32
    %c0_i32_0 = arith.constant 0 : i32
    %c0_i32_1 = arith.constant 0 : i32
    return %c0_i32, %c0_i32_0 : i32, i32
  }
  func.func @transform_3(%arg0: i32) -> (i32, i32) {
    %c0_i32 = arith.constant 0 : i32
    %c0_i32_0 = arith.constant 0 : i32
    %c0_i32_1 = arith.constant 0 : i32
    return %c0_i32, %c0_i32_0 : i32, i32
  }
  func.func @transform_4(%arg0: i32) -> (i32, i32) {
    %c0_i32 = arith.constant 0 : i32
    %c0_i32_0 = arith.constant 0 : i32
    %c0_i32_1 = arith.constant 0 : i32
    return %c0_i32, %c0_i32_0 : i32, i32
  }
  func.func @transform_5(%arg0: i32) -> (i32, i32, i32) {
    %c0_i32 = arith.constant 0 : i32
    %c0_i32_0 = arith.constant 0 : i32
    %c0_i32_1 = arith.constant 0 : i32
    return %arg0, %c0_i32, %c0_i32_0 : i32, i32, i32
  }
}

</mosaic_0001>

<bundles_post_ra>
// kernel: residual_block.1
= control target key start
LH: loop header
LB: loop body
LE: loop exit
PB: predicated region body
PF: predicated region fallthrough
CT: control target
= control target key end

     0   :  { %s4490_s18 = smov 0   ;;  %s6952_s0 = inlined_call_operand.vmem [shape: f32[2,256,4], index: 0, kind: input, shape index: {}]   ;;  %s6953_s1 = inlined_call_operand.vmem [shape: f32[12,12], index: 1, kind: input, shape index: {}]   ;;  %s6954_s2 = inlined_call_operand.vmem [shape: f32[1,4], index: 2, kind: input, shape index: {}]   ;;  %s6955_s3 = inlined_call_operand.vmem [shape: f32[12,12], index: 3, kind: input, shape index: {}]   ;;  %s6956_s4 = inlined_call_operand.vmem [shape: f32[1,4], index: 4, kind: input, shape index: {}]   ;;  %s6957_s5 = inlined_call_operand.vmem [shape: f32[2,256,4], index: 5, kind: output, shape index: {}]  }
   0x1 LB: > { %s4157_s19 = sadd.s32 4294967295, %s4452_s18   ;;  %p4161_p0 = scmp.ge.s32.totalorder %s4452_s18, 1  ;;  %s4452_s18 = sphi %s4490_s18, %s15_s18  }
   0x2   : > { %p187_p1 = scmp.lt.s32.totalorder %s4452_s18, 3 }
   0x4   : > { %p188_p2 = pnand %p4161_p0, %p187_p1 }
   0x6   : > { %191 = sbr.rel (%p188_p2) target bundleno = 1543 (0x607), region = 40 }
   0xd   : > { %p215_p3 = scmp.lt.s32.totalorder %s4157_s19, 1  ;;  %v1316_v0 = vld [vmem:[%s6953_s1] sm:$0xff]  ;;  %v1317_v1 = vld [vmem:[%s6953_s1 + $0x8] sm:$0xf]  ;;  %vm1415_vm0 = vcmask 1043456   ;;  %vm4454_vm1 = vmmov 1  }
   0xe   : > { %v4410_v2 = vpack.c.bf16 %v1317_v1, %v1316_v0  ;;  %vm4506_vm2 = vmpackc.low %vm1415_vm0, %vm4454_vm1  ;;  %v7108_v3 = vmov 0  ;;  %s4455_s28 = smov 8   ;;  %s4456_s29 = smov 4   ;;  %vm6987_vm3 = vcmask 31744   ;;  %vm6983_vm4 = vcmask 64512  }
   0xf   : > { %s7584_s19 = smov (!%p215_p3, %s4157_s19), 1  ;;  %v7109_v3 = vsel %vm4506_vm2, 4294967295, %v7108_v3  ;;  %vm6979_vm5 = vcmask 97280   ;;  %v6958_v47 = vmov 0.0   ;;  %v4199_v48 = vld [vmem:[%s6954_s2] ss:$0 sm:$0xff] }
  0x10   : > { %7110 = vst [vmem:[#allocation2_spill] sm:$0xff] %v7109_v3  ;;  %4412 = vmatprep.subr.msk.bf16.mxu0 %vm4506_vm2, %v4410_v2  ;;  %s4236_s24 = sshll.u32 %s7584_s19, 8  ;;  %s4458_s7 = smov 120   ;;  %v7230_v3 = vmov 0 }
  0x11   : > { %4415 = vmatpush3.bf16.msk.msra.mxu0 %vm4506_vm2, %v4410_v2  ;;  %s4520_s27 = scalar_lea.vmem %s6952_s0, %s4236_s24  ;;  %s4459_s8 = smov 124  }
  0x12   : > { %v4523_v4 = vld [vmem:[%s4520_s27 + $0x10] sm:$0xff]  ;;  %v4526_v5 = vld [vmem:[%s4520_s27] sm:$0xff]  ;;  %v4533_v6 = vld [vmem:[%s4520_s27 + $0x18] sm:$0xff]  ;;  %s6880_s17 = scalar_lea.vmem %s6957_s5, %s4236_s24 }
  0x13   : > { %1154 = vrot.lane.b32.xlu1 %v4523_v4, %s4455_s28  ;;  %1026 = vrot.lane.b32.xlu0 %v4526_v5, %s4456_s29  ;;  %v4536_v7 = vld [vmem:[%s4520_s27 + $0x8] sm:$0xff]  ;;  %v4550_v9 = vld [vmem:[%s4520_s27 + $0x20] sm:$0xff] }
  0x14   : > { %v4547_v8 = vld [vmem:[%s4520_s27 + $0x28] sm:$0xff]  ;;  %v4561_v10 = vld [vmem:[%s4520_s27 + $0x38] sm:$0xff]  ;;  %v4564_v11 = vld [vmem:[%s4520_s27 + $0x30] sm:$0xff] }
  0x15   : > { %v4575_v12 = vld [vmem:[%s4520_s27 + $0x40] sm:$0xff]  ;;  %v4578_v13 = vld [vmem:[%s4520_s27 + $0x48] sm:$0xff]  ;;  %v4589_v14 = vld [vmem:[%s4520_s27 + $0x50] sm:$0xff] }
  0x16   : > { %v4592_v15 = vld [vmem:[%s4520_s27 + $0x58] sm:$0xff]  ;;  %v4603_v16 = vld [vmem:[%s4520_s27 + $0x60] sm:$0xff]  ;;  %v4606_v17 = vld [vmem:[%s4520_s27 + $0x68] sm:$0xff] }
  0x17   : > { %1156 = vrot.lane.b32.xlu1 %v4533_v6, %s4455_s28  ;;  %1028 = vrot.lane.b32.xlu0 %v4536_v7, %s4456_s29  ;;  %v4617_v18 = vld [vmem:[%s4520_s27 + $0x70] sm:$0xff]  ;;  %v4620_v19 = vld [vmem:[%s4520_s27 + $0x78] sm:$0xff] }
  0x18   : > { %v4631_v20 = vld [vmem:[%s4520_s27 + $0x80] sm:$0xff]  ;;  %v4634_v21 = vld [vmem:[%s4520_s27 + $0x88] sm:$0xff]  ;;  %v4645_v22 = vld [vmem:[%s4520_s27 + $0x90] sm:$0xff] }
  0x19   : > { %v4648_v23 = vld [vmem:[%s4520_s27 + $0x98] sm:$0xff]  ;;  %v4659_v24 = vld [vmem:[%s4520_s27 + $0xa0] sm:$0xff]  ;;  %v4662_v25 = vld [vmem:[%s4520_s27 + $0xa8] sm:$0xff] }
  0x1a   : > { %v4673_v26 = vld [vmem:[%s4520_s27 + $0xb0] sm:$0xff]  ;;  %v4676_v27 = vld [vmem:[%s4520_s27 + $0xb8] sm:$0xff]  ;;  %v4687_v28 = vld [vmem:[%s4520_s27 + $0xc0] sm:$0xff] }
  0x1b   : > { %1032 = vrot.lane.b32.xlu1 %v4533_v6, %s4456_s29  ;;  %1030 = vrot.lane.b32.xlu0 %v4523_v4, %s4456_s29  ;;  %v4690_v29 = vld [vmem:[%s4520_s27 + $0xc8] sm:$0xff]  ;;  %v4701_v30 = vld [vmem:[%s4520_s27 + $0xd0] sm:$0xff] }
  0x1c   : > { %v4704_v31 = vld [vmem:[%s4520_s27 + $0xd8] sm:$0xff]  ;;  %v4715_v32 = vld [vmem:[%s4520_s27 + $0xe0] sm:$0xff]  ;;  %v4718_v33 = vld [vmem:[%s4520_s27 + $0xe8] sm:$0xff] }
  0x1d   : > { %v800_v34 = vld [vmem:[%s4520_s27 + $0xf0] sm:$0xff]  ;;  %v801_v35 = vld [vmem:[%s4520_s27 + $0xf8] sm:$0xff] }
  0x1f   : > { %1160 = vrot.lane.b32.xlu1 %v4547_v8, %s4455_s28  ;;  %1158 = vrot.lane.b32.xlu0 %v4550_v9, %s4455_s28 }
  0x23   : > { %1036 = vrot.lane.b32.xlu1 %v4547_v8, %s4456_s29  ;;  %1034 = vrot.lane.b32.xlu0 %v4550_v9, %s4456_s29 }
  0x27   : > { %1164 = vrot.lane.b32.xlu1 %v4561_v10, %s4455_s28  ;;  %1162 = vrot.lane.b32.xlu0 %v4564_v11, %s4455_s28 }
  0x2b   : > { %1038 = vrot.lane.b32.xlu0 %v4564_v11, %s4456_s29  ;;  %1040 = vrot.lane.b32.xlu1 %v4561_v10, %s4456_s29 }
  0x2f   : > { %1166 = vrot.lane.b32.xlu0 %v4575_v12, %s4455_s28  ;;  %1168 = vrot.lane.b32.xlu1 %v4578_v13, %s4455_s28 }
  0x33   : > { %1042 = vrot.lane.b32.xlu0 %v4575_v12, %s4456_s29  ;;  %1044 = vrot.lane.b32.xlu1 %v4578_v13, %s4456_s29 }
  0x37   : > { %1170 = vrot.lane.b32.xlu0 %v4589_v14, %s4455_s28  ;;  %1172 = vrot.lane.b32.xlu1 %v4592_v15, %s4455_s28 }
  0x3b   : > { %1046 = vrot.lane.b32.xlu0 %v4589_v14, %s4456_s29  ;;  %1048 = vrot.lane.b32.xlu1 %v4592_v15, %s4456_s29 }
  0x3f   : > { %1174 = vrot.lane.b32.xlu0 %v4603_v16, %s4455_s28  ;;  %1176 = vrot.lane.b32.xlu1 %v4606_v17, %s4455_s28 }
  0x43   : > { %1050 = vrot.lane.b32.xlu0 %v4603_v16, %s4456_s29  ;;  %1052 = vrot.lane.b32.xlu1 %v4606_v17, %s4456_s29 }
  0x47   : > { %1178 = vrot.lane.b32.xlu0 %v4617_v18, %s4455_s28  ;;  %1180 = vrot.lane.b32.xlu1 %v4620_v19, %s4455_s28 }
  0x4b   : > { %1054 = vrot.lane.b32.xlu0 %v4617_v18, %s4456_s29  ;;  %1056 = vrot.lane.b32.xlu1 %v4620_v19, %s4456_s29 }
  0x4f   : > { %1182 = vrot.lane.b32.xlu0 %v4631_v20, %s4455_s28  ;;  %1184 = vrot.lane.b32.xlu1 %v4634_v21, %s4455_s28 }
  0x53   : > { %1058 = vrot.lane.b32.xlu0 %v4631_v20, %s4456_s29  ;;  %1060 = vrot.lane.b32.xlu1 %v4634_v21, %s4456_s29 }
  0x57   : > { %1186 = vrot.lane.b32.xlu0 %v4645_v22, %s4455_s28  ;;  %1188 = vrot.lane.b32.xlu1 %v4648_v23, %s4455_s28 }
  0x5b   : > { %1062 = vrot.lane.b32.xlu0 %v4645_v22, %s4456_s29  ;;  %1064 = vrot.lane.b32.xlu1 %v4648_v23, %s4456_s29 }
  0x5f   : > { %1190 = vrot.lane.b32.xlu0 %v4659_v24, %s4455_s28  ;;  %1192 = vrot.lane.b32.xlu1 %v4662_v25, %s4455_s28 }
  0x63   : > { %1066 = vrot.lane.b32.xlu0 %v4659_v24, %s4456_s29  ;;  %1068 = vrot.lane.b32.xlu1 %v4662_v25, %s4456_s29 }
  0x67   : > { %1194 = vrot.lane.b32.xlu0 %v4673_v26, %s4455_s28  ;;  %1196 = vrot.lane.b32.xlu1 %v4676_v27, %s4455_s28 }
  0x6b   : > { %1070 = vrot.lane.b32.xlu0 %v4673_v26, %s4456_s29  ;;  %1072 = vrot.lane.b32.xlu1 %v4676_v27, %s4456_s29 }
  0x6f   : > { %1198 = vrot.lane.b32.xlu0 %v4687_v28, %s4455_s28  ;;  %1200 = vrot.lane.b32.xlu1 %v4690_v29, %s4455_s28 }
  0x73   : > { %1074 = vrot.lane.b32.xlu0 %v4687_v28, %s4456_s29  ;;  %1076 = vrot.lane.b32.xlu1 %v4690_v29, %s4456_s29 }
  0x77   : > { %1202 = vrot.lane.b32.xlu0 %v4701_v30, %s4455_s28  ;;  %1204 = vrot.lane.b32.xlu1 %v4704_v31, %s4455_s28 }
  0x7b   : > { %1078 = vrot.lane.b32.xlu0 %v4701_v30, %s4456_s29  ;;  %1080 = vrot.lane.b32.xlu1 %v4704_v31, %s4456_s29 }
  0x7f   : > { %1206 = vrot.lane.b32.xlu0 %v4715_v32, %s4455_s28  ;;  %1208 = vrot.lane.b32.xlu1 %v4718_v33, %s4455_s28 }
  0x83   : > { %1082 = vrot.lane.b32.xlu0 %v4715_v32, %s4456_s29  ;;  %1084 = vrot.lane.b32.xlu1 %v4718_v33, %s4456_s29 }
  0x85   : > { %v1155_v36 = vpop.permute.xlu1 %1154  ;;  %v4730_v37 = vpop.permute.xlu0 %1026 }
  0x86   : > { %7111 = vst [vmem:[#allocation3_spill] sm:$0xff] %v4730_v37  ;;  %v1251_v38 = vsel %vm6987_vm3, 0.0, %v4730_v37 }
  0x87   : > { %1210 = vrot.lane.b32.xlu0 %v800_v34, %s4455_s28  ;;  %1212 = vrot.lane.b32.xlu1 %v801_v35, %s4455_s28  ;;  %v1284_v39 = vsel %vm6983_vm4, %v1251_v38, %v1155_v36 }
  0x88   : > { %4310 = vmatprep.mubr.msk.f32.mxu0 %vm6979_vm5, %v1284_v39 }
  0x89   : > { %v1157_v40 = vpop.permute.xlu1 %1156  ;;  %v4738_v41 = vpop.permute.xlu0 %1028 }
  0x8a   : > { %7112 = vst [vmem:[#allocation4_spill] sm:$0xff] %v4738_v41  ;;  %v1252_v42 = vsel %vm6987_vm3, 0.0, %v4738_v41 }
  0x8b   : > { %1086 = vrot.lane.b32.xlu0 %v800_v34, %s4456_s29  ;;  %v1285_v43 = vsel %vm6983_vm4, %v1252_v42, %v1157_v40  ;;  %1088 = vrot.lane.b32.xlu1 %v801_v35, %s4456_s29 }
  0x8c   : > { %4311 = vmatmul.mubr.msk.f32.vlgmr.msra.gmra.mrb[0].mxu0 %vm6979_vm5, %v1285_v43 }
  0x8d   : > { %v4746_v44 = vpop.permute.xlu1 %1032  ;;  %v4748_v45 = vpop.permute.xlu0 %1030 }
  0x8e   : > { %7113 = vst [vmem:[#allocation5_spill] sm:$0xff] %v4746_v44  ;;  %7114 = vst [vmem:[#allocation6_spill] sm:$0xff] %v4748_v45  ;;  %v1254_v46 = vsel %vm6987_vm3, %v4536_v7, %v4746_v44  ;;  %v1253_v49 = vsel %vm6987_vm3, %v4526_v5, %v4748_v45 }
  0x8f   : > { %4437 = vrot.lane.b32.xlu0 %v6958_v47, %s4455_s28 }
  0x91   : > { %v1161_v50 = vpop.permute.xlu1 %1160  ;;  %v1159_v51 = vpop.permute.xlu0 %1158 }
  0x92   : > { %v1287_v52 = vsel %vm6983_vm4, %v1254_v46, %v1161_v50  ;;  %v1286_v53 = vsel %vm6983_vm4, %v1253_v49, %v1159_v51 }
  0x93   : > { %4313 = vmatprep.mubr.msk.f32.mxu0 %vm6979_vm5, %v1286_v53  ;;  %1650 = vrot.lane.b32.xlu0 %v4199_v48, %s4456_s29 }
  0x94   : > { %4314 = vmatmul.mubr.msk.f32.gmra.mrb[2].mxu0 %vm6979_vm5, %v1287_v52 }
  0x95   : > { %v4766_v54 = vpop.permute.xlu1 %1036  ;;  %v4768_v55 = vpop.permute.xlu0 %1034 }
  0x96   : > { %7115 = vst [vmem:[#allocation7_spill] sm:$0xff] %v4766_v54  ;;  %7116 = vst [vmem:[#allocation8_spill] sm:$0xff] %v4768_v55  ;;  %v1256_v56 = vsel %vm6987_vm3, %v4533_v6, %v4766_v54  ;;  %v1255_v57 = vsel %vm6987_vm3, %v4523_v4, %v4768_v55  ;;  %v7196_v54 = vmov 0 }
  0x99   : > { %v1165_v58 = vpop.permute.xlu1 %1164  ;;  %v1163_v59 = vpop.permute.xlu0 %1162 }
  0x9a   : > { %v1289_v60 = vsel %vm6983_vm4, %v1256_v56, %v1165_v58  ;;  %v1288_v61 = vsel %vm6983_vm4, %v1255_v57, %v1163_v59 }
  0x9b   : > { %4316 = vmatprep.mubr.msk.f32.mxu0 %vm6979_vm5, %v1288_v61 }
  0x9c   : > { %4317 = vmatmul.mubr.msk.f32.gmra.mrb[4].mxu0 %vm6979_vm5, %v1289_v60 }
  0x9d   : > { %v4780_v62 = vpop.permute.xlu0 %1038  ;;  %v4782_v63 = vpop.permute.xlu1 %1040 }
  0x9e   : > { %7117 = vst [vmem:[#allocation9_spill] sm:$0xff] %v4780_v62  ;;  %7118 = vst [vmem:[#allocation10_spill] sm:$0xff] %v4782_v63  ;;  %v1258_v0 = vsel %vm6987_vm3, %v4547_v8, %v4782_v63  ;;  %v1257_v1 = vsel %vm6987_vm3, %v4550_v9, %v4780_v62 }
  0xa1   : > { %v1167_v2 = vpop.permute.xlu0 %1166  ;;  %v1169_v4 = vpop.permute.xlu1 %1168 }
  0xa2   : > { %v1290_v5 = vsel %vm6983_vm4, %v1257_v1, %v1167_v2  ;;  %v1291_v6 = vsel %vm6983_vm4, %v1258_v0, %v1169_v4 }
  0xa3   : > { %4319 = vmatprep.mubr.msk.f32.mxu0 %vm6979_vm5, %v1290_v5 }
  0xa4   : > { %4320 = vmatmul.mubr.msk.f32.gmra.mrb[6].mxu0 %vm6979_vm5, %v1291_v6 }
  0xa5   : > { %v4794_v7 = vpop.permute.xlu0 %1042  ;;  %v4796_v34 = vpop.permute.xlu1 %1044 }
  0xa6   : > { %7119 = vst [vmem:[#allocation11_spill] sm:$0xff] %v4794_v7  ;;  %7120 = vst [vmem:[#allocation12_spill] sm:$0xff] %v4796_v34  ;;  %v1260_v8 = vsel %vm6987_vm3, %v4561_v10, %v4796_v34  ;;  %v1259_v9 = vsel %vm6987_vm3, %v4564_v11, %v4794_v7 }
  0xa9   : > { %v1171_v35 = vpop.permute.xlu0 %1170  ;;  %v1173_v36 = vpop.permute.xlu1 %1172 }
  0xaa   : > { %v1292_v38 = vsel %vm6983_vm4, %v1259_v9, %v1171_v35  ;;  %v1293_v39 = vsel %vm6983_vm4, %v1260_v8, %v1173_v36 }
  0xab   : > { %4322 = vmatprep.mubr.msk.f32.mxu0 %vm6979_vm5, %v1292_v38 }
  0xac   : > { %4323 = vmatmul.mubr.msk.f32.gmra.mrb[8].mxu0 %vm6979_vm5, %v1293_v39 }
  0xad   : > { %v4808_v40 = vpop.permute.xlu0 %1046  ;;  %v4810_v42 = vpop.permute.xlu1 %1048 }
  0xae   : > { %7121 = vst [vmem:[#allocation13_spill] sm:$0xff] %v4808_v40  ;;  %7122 = vst [vmem:[#allocation14_spill] sm:$0xff] %v4810_v42  ;;  %v1262_v10 = vsel %vm6987_vm3, %v4578_v13, %v4810_v42  ;;  %v1261_v11 = vsel %vm6987_vm3, %v4575_v12, %v4808_v40  ;;  %v7187_v40 = vmov 0 }
  0xb1   : > { %v1175_v43 = vpop.permute.xlu0 %1174  ;;  %v1177_v46 = vpop.permute.xlu1 %1176 }
  0xb2   : > { %v1294_v48 = vsel %vm6983_vm4, %v1261_v11, %v1175_v43  ;;  %v1295_v49 = vsel %vm6983_vm4, %v1262_v10, %v1177_v46 }
  0xb3   : > { %4325 = vmatprep.mubr.msk.f32.mxu0 %vm6979_vm5, %v1294_v48 }
  0xb4   : > { %4326 = vmatmul.mubr.msk.f32.gmra.mrb[10].mxu0 %vm6979_vm5, %v1295_v49 }
  0xb5   : > { %v4822_v50 = vpop.permute.xlu0 %1050  ;;  %v4824_v51 = vpop.permute.xlu1 %1052 }
  0xb6   : > { %7123 = vst [vmem:[#allocation15_spill] sm:$0xff] %v4822_v50  ;;  %7124 = vst [vmem:[#allocation16_spill] sm:$0xff] %v4824_v51  ;;  %v1264_v13 = vsel %vm6987_vm3, %v4592_v15, %v4824_v51  ;;  %v1263_v12 = vsel %vm6987_vm3, %v4589_v14, %v4822_v50 }
  0xb9   : > { %v1179_v52 = vpop.permute.xlu0 %1178  ;;  %v1181_v53 = vpop.permute.xlu1 %1180 }
  0xba   : > { %v1296_v56 = vsel %vm6983_vm4, %v1263_v12, %v1179_v52  ;;  %v1297_v57 = vsel %vm6983_vm4, %v1264_v13, %v1181_v53 }
  0xbb   : > { %4328 = vmatprep.mubr.msk.f32.mxu0 %vm6979_vm5, %v1296_v56 }
  0xbc   : > { %4329 = vmatmul.mubr.msk.f32.gmra.mrb[12].mxu0 %vm6979_vm5, %v1297_v57 }
  0xbd   : > { %v4836_v58 = vpop.permute.xlu0 %1054  ;;  %v4838_v59 = vpop.permute.xlu1 %1056 }
  0xbe   : > { %7125 = vst [vmem:[#allocation17_spill] sm:$0xff] %v4836_v58  ;;  %7126 = vst [vmem:[#allocation18_spill] sm:$0xff] %v4838_v59  ;;  %v1266_v15 = vsel %vm6987_vm3, %v4606_v17, %v4838_v59  ;;  %v1265_v14 = vsel %vm6987_vm3, %v4603_v16, %v4836_v58 }
  0xc1   : > { %v1183_v60 = vpop.permute.xlu0 %1182  ;;  %v1185_v61 = vpop.permute.xlu1 %1184 }
  0xc2   : > { %v1298_v0 = vsel %vm6983_vm4, %v1265_v14, %v1183_v60  ;;  %v1299_v1 = vsel %vm6983_vm4, %v1266_v15, %v1185_v61 }
  0xc3   : > { %4331 = vmatprep.mubr.msk.f32.mxu0 %vm6979_vm5, %v1298_v0 }
  0xc4   : > { %4332 = vmatmul.mubr.msk.f32.gmra.mrb[14].mxu0 %vm6979_vm5, %v1299_v1 }
  0xc5   : > { %v4850_v2 = vpop.permute.xlu0 %1058  ;;  %v4852_v4 = vpop.permute.xlu1 %1060 }
  0xc6   : > { %7127 = vst [vmem:[#allocation19_spill] sm:$0xff] %v4850_v2  ;;  %7128 = vst [vmem:[#allocation20_spill] sm:$0xff] %v4852_v4  ;;  %v1268_v17 = vsel %vm6987_vm3, %v4620_v19, %v4852_v4  ;;  %v1267_v16 = vsel %vm6987_vm3, %v4617_v18, %v4850_v2 }
  0xc9   : > { %v1187_v5 = vpop.permute.xlu0 %1186  ;;  %v1189_v6 = vpop.permute.xlu1 %1188 }
  0xca   : > { %v1300_v8 = vsel %vm6983_vm4, %v1267_v16, %v1187_v5  ;;  %v1301_v9 = vsel %vm6983_vm4, %v1268_v17, %v1189_v6 }
  0xcb   : > { %4334 = vmatprep.mubr.msk.f32.mxu0 %vm6979_vm5, %v1300_v8 }
  0xcc   : > { %4335 = vmatmul.mubr.msk.f32.gmra.mrb[16].mxu0 %vm6979_vm5, %v1301_v9 }
  0xcd   : > { %v4864_v35 = vpop.permute.xlu0 %1062  ;;  %v4866_v36 = vpop.permute.xlu1 %1064 }
  0xce   : > { %7129 = vst [vmem:[#allocation21_spill] sm:$0xff] %v4864_v35  ;;  %7130 = vst [vmem:[#allocation22_spill] sm:$0xff] %v4866_v36  ;;  %v1270_v19 = vsel %vm6987_vm3, %v4634_v21, %v4866_v36  ;;  %v1269_v18 = vsel %vm6987_vm3, %v4631_v20, %v4864_v35 }
  0xd1   : > { %v1191_v38 = vpop.permute.xlu0 %1190  ;;  %v1193_v39 = vpop.permute.xlu1 %1192 }
  0xd2   : > { %v1302_v10 = vsel %vm6983_vm4, %v1269_v18, %v1191_v38  ;;  %v1303_v11 = vsel %vm6983_vm4, %v1270_v19, %v1193_v39 }
  0xd3   : > { %4337 = vmatprep.mubr.msk.f32.mxu0 %vm6979_vm5, %v1302_v10 }
  0xd4   : > { %4338 = vmatmul.mubr.msk.f32.gmra.mrb[18].mxu0 %vm6979_vm5, %v1303_v11 }
  0xd5   : > { %v4878_v43 = vpop.permute.xlu0 %1066  ;;  %v4880_v46 = vpop.permute.xlu1 %1068 }
  0xd6   : > { %7131 = vst [vmem:[#allocation23_spill] sm:$0xff] %v4878_v43  ;;  %7132 = vst [vmem:[#allocation24_spill] sm:$0xff] %v4880_v46  ;;  %v1272_v21 = vsel %vm6987_vm3, %v4648_v23, %v4880_v46  ;;  %v1271_v20 = vsel %vm6987_vm3, %v4645_v22, %v4878_v43 }
  0xd9   : > { %v1195_v48 = vpop.permute.xlu0 %1194  ;;  %v1197_v49 = vpop.permute.xlu1 %1196 }
  0xda   : > { %v1304_v13 = vsel %vm6983_vm4, %v1271_v20, %v1195_v48  ;;  %v1305_v12 = vsel %vm6983_vm4, %v1272_v21, %v1197_v49 }
  0xdb   : > { %4340 = vmatprep.mubr.msk.f32.mxu0 %vm6979_vm5, %v1304_v13 }
  0xdc   : > { %4341 = vmatmul.mubr.msk.f32.gmra.mrb[20].mxu0 %vm6979_vm5, %v1305_v12 }
  0xdd   : > { %v4892_v52 = vpop.permute.xlu0 %1070  ;;  %v4894_v53 = vpop.permute.xlu1 %1072 }
  0xde   : > { %7133 = vst [vmem:[#allocation25_spill] sm:$0xff] %v4892_v52  ;;  %7134 = vst [vmem:[#allocation26_spill] sm:$0xff] %v4894_v53  ;;  %v1274_v23 = vsel %vm6987_vm3, %v4662_v25, %v4894_v53  ;;  %v1273_v22 = vsel %vm6987_vm3, %v4659_v24, %v4892_v52 }
  0xe1   : > { %v1199_v56 = vpop.permute.xlu0 %1198  ;;  %v1201_v57 = vpop.permute.xlu1 %1200 }
  0xe2   : > { %v1306_v15 = vsel %vm6983_vm4, %v1273_v22, %v1199_v56  ;;  %v1307_v14 = vsel %vm6983_vm4, %v1274_v23, %v1201_v57  ;;  %v225_v57 = vlaneseq }
  0xe3   : > { %4343 = vmatprep.mubr.msk.f32.mxu0 %vm6979_vm5, %v1306_v15 }
  0xe4   : > { %4344 = vmatmul.mubr.msk.f32.gmra.mrb[22].mxu0 %vm6979_vm5, %v1307_v14  ;;  %v4962_v15 = vshrl.u32 %v225_v57, 7 }
  0xe5   : > { %v4906_v60 = vpop.permute.xlu0 %1074  ;;  %v4908_v61 = vpop.permute.xlu1 %1076 }
  0xe6   : > { %7135 = vst [vmem:[#allocation27_spill] sm:$0xff] %v4906_v60  ;;  %7136 = vst [vmem:[#allocation28_spill] sm:$0xff] %v4908_v61  ;;  %v1276_v25 = vsel %vm6987_vm3, %v4676_v27, %v4908_v61  ;;  %v1275_v24 = vsel %vm6987_vm3, %v4673_v26, %v4906_v60  ;;  %vm6990_vm6 = vcmp.lt.s32.totalorder %v4962_v15, 1  ;;  %v254_v50 = vadd.s32 224, %v4962_v15 }
  0xe7   : > { %7143 = vst [vmem:[#allocation35_spill] sm:$0xff] %v4962_v15 }
  0xe9   : > { %v1203_v0 = vpop.permute.xlu0 %1202  ;;  %v1205_v1 = vpop.permute.xlu1 %1204 }
  0xea   : > { %v1308_v17 = vsel %vm6983_vm4, %v1275_v24, %v1203_v0  ;;  %v1309_v16 = vsel %vm6983_vm4, %v1276_v25, %v1205_v1 }
  0xeb   : > { %4346 = vmatprep.mubr.msk.f32.mxu0 %vm6979_vm5, %v1308_v17 }
  0xec   : > { %4347 = vmatmul.mubr.msk.f32.gmra.mrb[24].mxu0 %vm6979_vm5, %v1309_v16 }
  0xed   : > { %v4920_v5 = vpop.permute.xlu0 %1078  ;;  %v4922_v6 = vpop.permute.xlu1 %1080 }
  0xee   : > { %7137 = vst [vmem:[#allocation29_spill] sm:$0xff] %v4920_v5  ;;  %7138 = vst [vmem:[#allocation30_spill] sm:$0xff] %v4922_v6  ;;  %v1278_v27 = vsel %vm6987_vm3, %v4690_v29, %v4922_v6  ;;  %v1277_v26 = vsel %vm6987_vm3, %v4687_v28, %v4920_v5 }
  0xf1   : > { %v1207_v8 = vpop.permute.xlu0 %1206  ;;  %v1209_v9 = vpop.permute.xlu1 %1208 }
  0xf2   : > { %v1310_v19 = vsel %vm6983_vm4, %v1277_v26, %v1207_v8  ;;  %v1311_v18 = vsel %vm6983_vm4, %v1278_v27, %v1209_v9  ;;  %v228_v27 = vadd.s32 16, %v4962_v15 }
  0xf3   : > { %4349 = vmatprep.mubr.msk.f32.mxu0 %vm6979_vm5, %v1310_v19 }
  0xf4   : > { %4350 = vmatmul.mubr.msk.f32.gmra.mrb[26].mxu0 %vm6979_vm5, %v1311_v18  ;;  %v276_v9 = vand.u32 15, %v228_v27 }
  0xf5   : > { %v4934_v38 = vpop.permute.xlu0 %1082  ;;  %v4936_v39 = vpop.permute.xlu1 %1084 }
  0xf6   : > { %7139 = vst [vmem:[#allocation31_spill] sm:$0xff] %v4934_v38  ;;  %7140 = vst [vmem:[#allocation32_spill] sm:$0xff] %v4936_v39  ;;  %v1280_v29 = vsel %vm6987_vm3, %v4704_v31, %v4936_v39  ;;  %v1279_v28 = vsel %vm6987_vm3, %v4701_v30, %v4934_v38  ;;  %vm5006_vm7 = vcmp.gt.s32.totalorder %v276_v9, 0  ;;  %v7151_v9 = vmov 0 }
  0xf9   : > { %v1211_v10 = vpop.permute.xlu0 %1210  ;;  %v1213_v11 = vpop.permute.xlu1 %1212 }
  0xfa   : > { %v1312_v21 = vsel %vm6983_vm4, %v1279_v28, %v1211_v10  ;;  %v1313_v20 = vsel %vm6983_vm4, %v1280_v29, %v1213_v11  ;;  %v230_v28 = vadd.s32 32, %v4962_v15  ;;  %v7145_v11 = vmov 0 }
  0xfb   : > { %4352 = vmatprep.mubr.msk.f32.mxu0 %vm6979_vm5, %v1312_v21  ;;  %v7146_v11 = vsel %vm5006_vm7, 4294967295, %v7145_v11 }
  0xfc   : > { %4353 = vmatmul.mubr.msk.f32.gmra.mrb[28].mxu0 %vm6979_vm5, %v1313_v20  ;;  %7147 = vst [vmem:[#allocation37_spill] sm:$0xff] %v7146_v11 }
  0xfd   : > { %v4948_v48 = vpop.permute.xlu0 %1086  ;;  %v4950_v49 = vpop.permute.xlu1 %1088 }
  0xfe   : > { %7141 = vst [vmem:[#allocation33_spill] sm:$0xff] %v4948_v48  ;;  %7142 = vst [vmem:[#allocation34_spill] sm:$0xff] %v4950_v49  ;;  %v1282_v31 = vsel %vm6987_vm3, %v4718_v33, %v4950_v49  ;;  %v1281_v23 = vsel %vm6987_vm3, %v4715_v32, %v4948_v48 }
 0x101   : > { %v4438_v13 = vpop.permute.xlu0 %4437 }
 0x102   : > { %v4440_v30 = vunpack.i.h.bf16 %v4438_v13  ;;  %v4439_v12 = vunpack.i.l.bf16 %v4438_v13 }
 0x104   : > { %v1314_v22 = vsel %vm6983_vm4, %v1281_v23, %v4439_v12  ;;  %v1315_v56 = vsel %vm6983_vm4, %v1282_v31, %v4440_v30  ;;  %v290_v31 = vand.u32 15, %v230_v28 }
 0x105   : > { %4355 = vmatprep.mubr.msk.f32.mxu0 %vm6979_vm5, %v1314_v22  ;;  %v7148_v22 = vmov 0 }
 0x106   : > { %4356 = vmatmul.mubr.msk.f32.gmra.mrb[30].mxu0 %vm6979_vm5, %v1315_v56  ;;  %vm5025_vm8 = vcmp.gt.s32.totalorder %v290_v31, 0  ;;  %v232_v56 = vadd.s32 48, %v4962_v15 }
 0x107   : > { %v7149_v22 = vsel %vm5025_vm8, 4294967295, %v7148_v22 }
 0x108   : > { %7150 = vst [vmem:[#allocation38_spill] sm:$0xff] %v7149_v22  ;;  %v7224_v22 = vmov 0 }
 0x15f   : > { %v4964_v14 = vpop.f32.mrb[0].mxu0 }
 0x160   : > { %7144 = vst [vmem:[#allocation36_spill] sm:$0xff] %v4964_v14  ;;  %v1686_v33 = vrot.slane %v4964_v14, 7  ;;  %2040 = vrot.lane.b32.xlu1 %v4964_v14, %s4458_s7  ;;  %v4969_v32 = vpop.f32.mrb[1].mxu0 }
 0x161   : > { %v6959_v25 = vrot.slane %v4969_v32, 7  ;;  %2038 = vrot.lane.b32.xlu0 %v4969_v32, %s4458_s7  ;;  %v7199_v45 = vrot.slane %v4969_v32, 7 }
 0x163   : > { %v1748_v24 = vsel %vm6990_vm6, %v6959_v25, %v1686_v33 }
 0x164   : > { %1880 = vrot.lane.b32.xlu1 %v1748_v24, %s4456_s29 }
 0x167   : > { %v4980_v0 = vpop.f32.mrb[2].mxu0 }
 0x168   : > { %v1688_v1 = vrot.slane %v4980_v0, 7  ;;  %2044 = vrot.lane.b32.xlu0 %v4980_v0, %s4458_s7  ;;  %v4985_v17 = vpop.f32.mrb[3].mxu0 }
 0x169   : > { %v1687_v16 = vrot.slane %v4985_v17, 7  ;;  %2042 = vrot.lane.b32.xlu1 %v4985_v17, %s4458_s7 }
 0x16b   : > { %v1746_v26 = vsel %vm6990_vm6, %v1687_v16, %v1688_v1  ;;  %v1747_v8 = vsel %vm6990_vm6, %v1686_v33, %v1687_v16  ;;  %v304_v16 = vand.u32 15, %v232_v56 }
 0x16c   : > { %v1816_v13 = vsel %vm5006_vm7, %v1747_v8, 0.0 }
 0x16d   : > { %vm5048_vm9 = vcmp.gt.s32.totalorder %v304_v16, 0 }
 0x16e   : > { %v7152_v9 = vsel %vm5048_vm9, 4294967295, %v7151_v9 }
 0x16f   : > { %v4995_v19 = vpop.f32.mrb[4].mxu0  ;;  %7153 = vst [vmem:[#allocation39_spill] sm:$0xff] %v7152_v9 }
 0x170   : > { %v1690_v18 = vrot.slane %v4995_v19, 7  ;;  %2048 = vrot.lane.b32.xlu0 %v4995_v19, %s4458_s7  ;;  %v5000_v29 = vpop.f32.mrb[5].mxu0 }
 0x171   : > { %v1689_v10 = vrot.slane %v5000_v29, 7  ;;  %2046 = vrot.lane.b32.xlu1 %v5000_v29, %s4458_s7 }
 0x173   : > { %v1744_v21 = vsel %vm6990_vm6, %v1689_v10, %v1690_v18  ;;  %v1745_v20 = vsel %vm6990_vm6, %v1688_v1, %v1689_v10 }
 0x174   : > { %1884 = vrot.lane.b32.xlu0 %v1746_v26, %s4456_s29  ;;  %v1818_v33 = vsel %vm5025_vm8, %v1745_v20, 0.0 }
 0x175   : > { %1882 = vrot.lane.b32.xlu1 %v1816_v13, %s4456_s29 }
 0x177   : > { %v5018_v30 = vpop.f32.mrb[6].mxu0 }
 0x178   : > { %v1692_v12 = vrot.slane %v5018_v30, 7  ;;  %2052 = vrot.lane.b32.xlu0 %v5018_v30, %s4458_s7  ;;  %v5023_v23 = vpop.f32.mrb[7].mxu0 }
 0x179   : > { %v1691_v57 = vrot.slane %v5023_v23, 7  ;;  %1888 = vrot.lane.b32.xlu1 %v1744_v21, %s4456_s29 }
 0x17b   : > { %v1742_v24 = vsel %vm6990_vm6, %v1691_v57, %v1692_v12  ;;  %v1743_v1 = vsel %vm6990_vm6, %v1690_v18, %v1691_v57  ;;  %v234_v18 = vadd.s32 64, %v4962_v15 }
 0x17c   : > { %1886 = vrot.lane.b32.xlu0 %v1818_v33, %s4456_s29  ;;  %v1820_v10 = vsel %vm5048_vm9, %v1743_v1, 0.0  ;;  %v7154_v33 = vmov 0 }
 0x17d   : > { %2050 = vrot.lane.b32.xlu1 %v5023_v23, %s4458_s7  ;;  %v318_v13 = vand.u32 15, %v234_v18 }
 0x17f   : > { %v5041_v27 = vpop.f32.mrb[8].mxu0  ;;  %vm5071_vm10 = vcmp.gt.s32.totalorder %v318_v13, 0 }
 0x180   : > { %v1694_v26 = vrot.slane %v5041_v27, 7  ;;  %2056 = vrot.lane.b32.xlu0 %v5041_v27, %s4458_s7  ;;  %v5046_v8 = vpop.f32.mrb[9].mxu0  ;;  %v7155_v33 = vsel %vm5071_vm10, 4294967295, %v7154_v33 }
 0x181   : > { %v1693_v28 = vrot.slane %v5046_v8, 7  ;;  %1892 = vrot.lane.b32.xlu1 %v1742_v24, %s4456_s29  ;;  %7156 = vst [vmem:[#allocation40_spill] sm:$0xff] %v7155_v33  ;;  %v7221_v33 = vmov 0 }
 0x183   : > { %v1740_v21 = vsel %vm6990_vm6, %v1693_v28, %v1694_v26  ;;  %v1741_v20 = vsel %vm6990_vm6, %v1692_v12, %v1693_v28  ;;  %v236_v12 = vadd.s32 80, %v4962_v15 }
 0x184   : > { %1890 = vrot.lane.b32.xlu0 %v1820_v10, %s4456_s29  ;;  %v1822_v1 = vsel %vm5071_vm10, %v1741_v20, 0.0  ;;  %v7157_v20 = vmov 0 }
 0x185   : > { %2054 = vrot.lane.b32.xlu1 %v5046_v8, %s4458_s7  ;;  %v332_v28 = vand.u32 15, %v236_v12 }
 0x187   : > { %v5064_v31 = vpop.f32.mrb[10].mxu0  ;;  %vm5094_vm11 = vcmp.gt.s32.totalorder %v332_v28, 0 }
 0x188   : > { %v1696_v56 = vrot.slane %v5064_v31, 7  ;;  %2060 = vrot.lane.b32.xlu0 %v5064_v31, %s4458_s7  ;;  %v5069_v57 = vpop.f32.mrb[11].mxu0  ;;  %v7158_v20 = vsel %vm5094_vm11, 4294967295, %v7157_v20 }
 0x189   : > { %v1695_v24 = vrot.slane %v5069_v57, 7  ;;  %1896 = vrot.lane.b32.xlu1 %v1740_v21, %s4456_s29  ;;  %7159 = vst [vmem:[#allocation41_spill] sm:$0xff] %v7158_v20 }
 0x18b   : > { %v1738_v16 = vsel %vm6990_vm6, %v1695_v24, %v1696_v56  ;;  %v1739_v18 = vsel %vm6990_vm6, %v1694_v26, %v1695_v24  ;;  %v238_v26 = vadd.s32 96, %v4962_v15 }
 0x18c   : > { %1894 = vrot.lane.b32.xlu0 %v1822_v1, %s4456_s29  ;;  %v1824_v24 = vsel %vm5094_vm11, %v1739_v18, 0.0  ;;  %v7160_v18 = vmov 0 }
 0x18d   : > { %2058 = vrot.lane.b32.xlu1 %v5069_v57, %s4458_s7  ;;  %v346_v28 = vand.u32 15, %v238_v26 }
 0x18f   : > { %v5087_v10 = vpop.f32.mrb[12].mxu0  ;;  %vm5117_vm12 = vcmp.gt.s32.totalorder %v346_v28, 0 }
 0x190   : > { %v1698_v13 = vrot.slane %v5087_v10, 7  ;;  %2064 = vrot.lane.b32.xlu0 %v5087_v10, %s4458_s7  ;;  %v5092_v21 = vpop.f32.mrb[13].mxu0  ;;  %v7161_v18 = vsel %vm5117_vm12, 4294967295, %v7160_v18 }
 0x191   : > { %v1697_v12 = vrot.slane %v5092_v21, 7  ;;  %1900 = vrot.lane.b32.xlu1 %v1738_v16, %s4456_s29  ;;  %7162 = vst [vmem:[#allocation42_spill] sm:$0xff] %v7161_v18  ;;  %v7218_v18 = vmov 0 }
 0x193   : > { %v1736_v1 = vsel %vm6990_vm6, %v1697_v12, %v1698_v13  ;;  %v1737_v47 = vsel %vm6990_vm6, %v1696_v56, %v1697_v12  ;;  %v240_v56 = vadd.s32 112, %v4962_v15 }
 0x194   : > { %1898 = vrot.lane.b32.xlu0 %v1824_v24, %s4456_s29  ;;  %v1826_v12 = vsel %vm5117_vm12, %v1737_v47, 0.0 }
 0x195   : > { %2062 = vrot.lane.b32.xlu1 %v5092_v21, %s4458_s7  ;;  %v360_v28 = vand.u32 15, %v240_v56 }
 0x197   : > { %v5110_v25 = vpop.f32.mrb[14].mxu0  ;;  %vm5140_vm13 = vcmp.gt.s32.totalorder %v360_v28, 0 }
 0x198   : > { %v1700_v49 = vrot.slane %v5110_v25, 7  ;;  %2068 = vrot.lane.b32.xlu0 %v5110_v25, %s4458_s7  ;;  %v5115_v16 = vpop.f32.mrb[15].mxu0 }
 0x199   : > { %v1699_v26 = vrot.slane %v5115_v16, 7  ;;  %1904 = vrot.lane.b32.xlu1 %v1736_v1, %s4456_s29  ;;  %v7163_v1 = vmov 0 }
 0x19a   : > { %v7164_v1 = vsel %vm5140_vm13, 4294967295, %v7163_v1 }
 0x19b   : > { %v1734_v24 = vsel %vm6990_vm6, %v1699_v26, %v1700_v49  ;;  %v1735_v39 = vsel %vm6990_vm6, %v1698_v13, %v1699_v26  ;;  %7165 = vst [vmem:[#allocation43_spill] sm:$0xff] %v7164_v1  ;;  %v242_v13 = vadd.s32 128, %v4962_v15 }
 0x19c   : > { %1902 = vrot.lane.b32.xlu0 %v1826_v12, %s4456_s29  ;;  %v1828_v26 = vsel %vm5140_vm13, %v1735_v39, 0.0 }
 0x19d   : > { %2066 = vrot.lane.b32.xlu1 %v5115_v16, %s4458_s7  ;;  %v374_v28 = vand.u32 15, %v242_v13 }
 0x19f   : > { %v5133_v48 = vpop.f32.mrb[16].mxu0  ;;  %vm5163_vm14 = vcmp.gt.s32.totalorder %v374_v28, 0 }
 0x1a0   : > { %v1702_v6 = vrot.slane %v5133_v48, 7  ;;  %2072 = vrot.lane.b32.xlu0 %v5133_v48, %s4458_s7  ;;  %v5138_v47 = vpop.f32.mrb[17].mxu0 }
 0x1a1   : > { %v1701_v56 = vrot.slane %v5138_v47, 7  ;;  %1908 = vrot.lane.b32.xlu1 %v1734_v24, %s4456_s29  ;;  %v7166_v24 = vmov 0 }
 0x1a2   : > { %v7167_v24 = vsel %vm5163_vm14, 4294967295, %v7166_v24 }
 0x1a3   : > { %v1732_v12 = vsel %vm6990_vm6, %v1701_v56, %v1702_v6  ;;  %v1733_v38 = vsel %vm6990_vm6, %v1700_v49, %v1701_v56  ;;  %7168 = vst [vmem:[#allocation44_spill] sm:$0xff] %v7167_v24  ;;  %v244_v49 = vadd.s32 144, %v4962_v15  ;;  %v7215_v24 = vmov 0 }
 0x1a4   : > { %1906 = vrot.lane.b32.xlu0 %v1828_v26, %s4456_s29  ;;  %v1830_v56 = vsel %vm5163_vm14, %v1733_v38, 0.0 }
 0x1a5   : > { %2070 = vrot.lane.b32.xlu1 %v5138_v47, %s4458_s7  ;;  %v388_v28 = vand.u32 15, %v244_v49 }
 0x1a7   : > { %v5156_v61 = vpop.f32.mrb[18].mxu0  ;;  %vm5186_vm15 = vcmp.gt.s32.totalorder %v388_v28, 0 }
 0x1a8   : > { %v1704_v5 = vrot.slane %v5156_v61, 7  ;;  %2076 = vrot.lane.b32.xlu0 %v5156_v61, %s4458_s7  ;;  %v5161_v39 = vpop.f32.mrb[19].mxu0 }
 0x1a9   : > { %v1703_v13 = vrot.slane %v5161_v39, 7  ;;  %1912 = vrot.lane.b32.xlu1 %v1732_v12, %s4456_s29  ;;  %v7169_v12 = vmov 0 }
 0x1aa   : > { %v7170_v12 = vsel %vm5186_vm15, 4294967295, %v7169_v12 }
 0x1ab   : > { %v1730_v26 = vsel %vm6990_vm6, %v1703_v13, %v1704_v5  ;;  %v1731_v53 = vsel %vm6990_vm6, %v1702_v6, %v1703_v13  ;;  %7171 = vst [vmem:[#allocation45_spill] sm:$0xff] %v7170_v12  ;;  %v246_v6 = vadd.s32 160, %v4962_v15 }
 0x1ac   : > { %1910 = vrot.lane.b32.xlu0 %v1830_v56, %s4456_s29  ;;  %v1832_v13 = vsel %vm5186_vm15, %v1731_v53, 0.0 }
 0x1ad   : > { %2074 = vrot.lane.b32.xlu1 %v5161_v39, %s4458_s7  ;;  %v402_v28 = vand.u32 15, %v246_v6 }
 0x1af   : > { %v5179_v60 = vpop.f32.mrb[20].mxu0  ;;  %vm5209_vm0 = vcmp.gt.s32.totalorder %v402_v28, 0 }
 0x1b0   : > { %v1706_v46 = vrot.slane %v5179_v60, 7  ;;  %2080 = vrot.lane.b32.xlu0 %v5179_v60, %s4458_s7  ;;  %v5184_v38 = vpop.f32.mrb[21].mxu0 }
 0x1b1   : > { %v1705_v49 = vrot.slane %v5184_v38, 7  ;;  %1916 = vrot.lane.b32.xlu1 %v1730_v26, %s4456_s29  ;;  %v7173_v26 = vmov 0 }
 0x1b2   : > { %v7174_v26 = vsel %vm5209_vm0, 4294967295, %v7173_v26 }
 0x1b3   : > { %v1728_v56 = vsel %vm6990_vm6, %v1705_v49, %v1706_v46  ;;  %v1729_v52 = vsel %vm6990_vm6, %v1704_v5, %v1705_v49  ;;  %7175 = vst [vmem:[#allocation47_spill] sm:$0xff] %v7174_v26  ;;  %v248_v5 = vadd.s32 176, %v4962_v15 }
 0x1b4   : > { %1914 = vrot.lane.b32.xlu0 %v1832_v13, %s4456_s29  ;;  %v1834_v49 = vsel %vm5209_vm0, %v1729_v52, 0.0 }
 0x1b5   : > { %2078 = vrot.lane.b32.xlu1 %v5184_v38, %s4458_s7  ;;  %v416_v28 = vand.u32 15, %v248_v5 }
 0x1b7   : > { %v5202_v36 = vpop.f32.mrb[22].mxu0  ;;  %vm5232_vm1 = vcmp.gt.s32.totalorder %v416_v28, 0 }
 0x1b8   : > { %7172 = vst [vmem:[#allocation46_spill] sm:$0xff] %v5202_v36  ;;  %v1708_v43 = vrot.slane %v5202_v36, 7  ;;  %2084 = vrot.lane.b32.xlu0 %v5202_v36, %s4458_s7  ;;  %v5207_v53 = vpop.f32.mrb[23].mxu0  ;;  %v7248_v36 = vmov 0 }
 0x1b9   : > { %v1707_v6 = vrot.slane %v5207_v53, 7  ;;  %1920 = vrot.lane.b32.xlu1 %v1728_v56, %s4456_s29  ;;  %v7177_v56 = vmov 0 }
 0x1ba   : > { %v7178_v56 = vsel %vm5232_vm1, 4294967295, %v7177_v56 }
 0x1bb   : > { %v1726_v13 = vsel %vm6990_vm6, %v1707_v6, %v1708_v43  ;;  %v1727_v4 = vsel %vm6990_vm6, %v1706_v46, %v1707_v6  ;;  %7179 = vst [vmem:[#allocation49_spill] sm:$0xff] %v7178_v56  ;;  %v250_v46 = vadd.s32 192, %v4962_v15  ;;  %v231_v56 = vadd.s32 40, %v4962_v15 }
 0x1bc   : > { %1918 = vrot.lane.b32.xlu0 %v1834_v49, %s4456_s29  ;;  %v1836_v6 = vsel %vm5232_vm1, %v1727_v4, 0.0 }
 0x1bd   : > { %2082 = vrot.lane.b32.xlu1 %v5207_v53, %s4458_s7  ;;  %v430_v28 = vand.u32 15, %v250_v46 }
 0x1bf   : > { %v5225_v35 = vpop.f32.mrb[24].mxu0  ;;  %vm5255_vm5 = vcmp.gt.s32.totalorder %v430_v28, 0 }
 0x1c0   : > { %7176 = vst [vmem:[#allocation48_spill] sm:$0xff] %v5225_v35  ;;  %v1710_v59 = vrot.slane %v5225_v35, 7  ;;  %2088 = vrot.lane.b32.xlu0 %v5225_v35, %s4458_s7  ;;  %v5230_v52 = vpop.f32.mrb[25].mxu0  ;;  %v7240_v35 = vmov 0 }
 0x1c1   : > { %v1709_v5 = vrot.slane %v5230_v52, 7  ;;  %1924 = vrot.lane.b32.xlu1 %v1726_v13, %s4456_s29  ;;  %v7182_v13 = vmov 0 }
 0x1c2   : > { %v7183_v13 = vsel %vm5255_vm5, 4294967295, %v7182_v13 }
 0x1c3   : > { %v1724_v49 = vsel %vm6990_vm6, %v1709_v5, %v1710_v59  ;;  %v1725_v2 = vsel %vm6990_vm6, %v1708_v43, %v1709_v5  ;;  %7184 = vst [vmem:[#allocation52_spill] sm:$0xff] %v7183_v13  ;;  %v252_v43 = vadd.s32 208, %v4962_v15 }
 0x1c4   : > { %1922 = vrot.lane.b32.xlu0 %v1836_v6, %s4456_s29  ;;  %v1838_v5 = vsel %vm5255_vm5, %v1725_v2, 0.0 }
 0x1c5   : > { %2086 = vrot.lane.b32.xlu1 %v5230_v52, %s4458_s7  ;;  %v444_v28 = vand.u32 15, %v252_v43 }
 0x1c7   : > { %v5248_v51 = vpop.f32.mrb[26].mxu0  ;;  %vm5279_vm4 = vcmp.gt.s32.totalorder %v444_v28, 0  ;;  %v7190_v28 = vmov 0 }
 0x1c8   : > { %7180 = vst [vmem:[#allocation50_spill] sm:$0xff] %v5248_v51  ;;  %v1712_v58 = vrot.slane %v5248_v51, 7  ;;  %2092 = vrot.lane.b32.xlu0 %v5248_v51, %s4458_s7  ;;  %v5253_v4 = vpop.f32.mrb[27].mxu0  ;;  %v7188_v40 = vsel %vm5279_vm4, 4294967295, %v7187_v40  ;;  %v7236_v51 = vmov 0 }
 0x1c9   : > { %7181 = vst [vmem:[#allocation51_spill] sm:$0xff] %v5253_v4  ;;  %v1711_v46 = vrot.slane %v5253_v4, 7  ;;  %1928 = vrot.lane.b32.xlu1 %v1724_v49, %s4456_s29  ;;  %7189 = vst [vmem:[#allocation55_spill] sm:$0xff] %v7188_v40 }
 0x1cb   : > { %v1722_v6 = vsel %vm6990_vm6, %v1711_v46, %v1712_v58  ;;  %v1723_v42 = vsel %vm6990_vm6, %v1710_v59, %v1711_v46  ;;  %v458_v59 = vand.u32 15, %v254_v50  ;;  %v5298_v50 = vpop.permute.xlu0 %1650 }
 0x1cc   : > { %1926 = vrot.lane.b32.xlu0 %v1838_v5, %s4456_s29  ;;  %v1840_v5 = vsel %vm5279_vm4, %v1723_v42, 0.0  ;;  %v256_v42 = vadd.s32 240, %v4962_v15 }
 0x1cd   : > { %2090 = vrot.lane.b32.xlu1 %v5253_v4, %s4458_s7  ;;  %vm5292_vm3 = vcmp.gt.s32.totalorder %v458_v59, 0 }
 0x1ce   : > { %v7191_v28 = vsel %vm5292_vm3, 4294967295, %v7190_v28 }
 0x1cf   : > { %v5272_v34 = vpop.f32.mrb[28].mxu0  ;;  %7192 = vst [vmem:[#allocation56_spill] sm:$0xff] %v7191_v28 }
 0x1d0   : > { %7185 = vst [vmem:[#allocation53_spill] sm:$0xff] %v5272_v34  ;;  %v1714_v49 = vrot.slane %v5272_v34, 7  ;;  %2096 = vrot.lane.b32.xlu0 %v5272_v34, %s4458_s7  ;;  %v5277_v2 = vpop.f32.mrb[29].mxu0 }
 0x1d1   : > { %7186 = vst [vmem:[#allocation54_spill] sm:$0xff] %v5277_v2  ;;  %v1713_v43 = vrot.slane %v5277_v2, 7  ;;  %1932 = vrot.lane.b32.xlu1 %v1722_v6, %s4456_s29  ;;  %v262_v6 = vand.u32 15, %v4962_v15 }
 0x1d2   : > { %v2041_v46 = vpop.permute.xlu1 %2040 }
 0x1d3   : > { %v1721_v7 = vsel %vm6990_vm6, %v1712_v58, %v1713_v43  ;;  %v1720_v63 = vsel %vm6990_vm6, %v1713_v43, %v1714_v49  ;;  %vm5316_vm6 = vcmp.gt.s32.totalorder %v262_v6, 0 }
 0x1d4   : > { %1930 = vrot.lane.b32.xlu0 %v1840_v5, %s4456_s29  ;;  %v1842_v58 = vsel %vm5292_vm3, %v1721_v7, 0.0  ;;  %v5309_v5 = vpop.permute.xlu0 %2038  ;;  %v7197_v54 = vsel %vm5316_vm6, 4294967295, %v7196_v54  ;;  %v472_v7 = vand.u32 15, %v256_v42  ;;  %vm7200_vm3 = vcmp.lt.s32.totalorder %v4962_v15, 1 }
 0x1d5   : > { %2094 = vrot.lane.b32.xlu1 %v5277_v2, %s4458_s7  ;;  %7198 = vst [vmem:[#allocation60_spill] sm:$0xff] %v7197_v54  ;;  %vm7201_vm4 = vmmov %vm7200_vm3  ;;  %v7203_v42 = vmov 0  ;;  %v2135_v54 = vrot.slane %v2041_v46, 1 }
 0x1d6   : > { %v5305_v43 = vpop.permute.xlu1 %1880  ;;  %vm7202_vm5 = vmmov %vm7200_vm3  ;;  %vm5333_vm1 = vcmp.gt.s32.totalorder %v472_v7, 0 }
 0x1d7   : > { %7193 = vst [vmem:[#allocation57_spill] sm:$0xff] %v5305_v43  ;;  %v7204_v42 = vsel %vm5333_vm1, 4294967295, %v7203_v42  ;;  %v7227_v43 = vmov 0 }
 0x1d8   : > { %1934 = vrot.lane.b32.xlu0 %v1842_v58, %s4456_s29  ;;  %7205 = vst [vmem:[#allocation61_spill] sm:$0xff] %v7204_v42 }
 0x1d9   : > { %v5307_v59 = vpop.f32.mrb[30].mxu0 }
 0x1da   : > { %7194 = vst [vmem:[#allocation58_spill] sm:$0xff] %v5307_v59  ;;  %v1716_v62 = vrot.slane %v5307_v59, 7  ;;  %2100 = vrot.lane.b32.xlu1 %v5307_v59, %s4458_s7  ;;  %v5314_v55 = vpop.f32.mrb[31].mxu0  ;;  %v2045_v28 = vpop.permute.xlu0 %2044 }
 0x1db   : > { %7195 = vst [vmem:[#allocation59_spill] sm:$0xff] %v5314_v55  ;;  %v1715_v58 = vrot.slane %v5314_v55, 7  ;;  %v2043_v40 = vpop.permute.xlu1 %2042 }
 0x1dc   : > { %v1749_v37 = vsel %vm7200_vm3, %v1716_v62, %v7199_v45  ;;  %v227_v45 = vadd.s32 8, %v4962_v15  ;;  %v2136_v13 = vrot.slane %v2043_v40, 1  ;;  %vm7096_vm3 = vcmp.lt.s32.totalorder %v4962_v15, 7 }
 0x1dd   : > { %v1814_v44 = vsel %vm5316_vm6, %v1749_v37, 0.0  ;;  %v1719_v41 = vsel %vm7201_vm4, %v1714_v49, %v1715_v58  ;;  %v1718_v6 = vsel %vm7202_vm5, %v1715_v58, %v1716_v62  ;;  %v7006_v37 = vrot.slane %v5309_v5, 1 }
 0x1de   : > { %1936 = vrot.lane.b32.xlu1 %v1720_v63, %s4456_s29  ;;  %1878 = vrot.lane.b32.xlu0 %v1814_v44, %s4456_s29  ;;  %v1844_v49 = vsel %vm5333_vm1, %v1719_v41, 0.0  ;;  %v269_v44 = vand.u32 15, %v227_v45  ;;  %v229_v63 = vadd.s32 24, %v4962_v15  ;;  %v2137_v58 = vrot.slane %v2045_v28, 1 }
 0x1df   : > { %v2197_v46 = vsel %vm7096_vm3, %v7006_v37, %v2135_v54  ;;  %v2196_v45 = vsel %vm7096_vm3, %v2135_v54, %v2136_v13 }
 0x1e0   : > { %vm5354_vm4 = vcmp.lt.s32.totalorder %v269_v44, 15  ;;  %v283_v28 = vand.u32 15, %v229_v63  ;;  %v7209_v44 = vmov 0 }
 0x1e2   : > { %v2049_v62 = vpop.permute.xlu0 %2048  ;;  %2098 = vrot.lane.b32.xlu1 %v5314_v55, %s4458_s7  ;;  %1938 = vrot.lane.b32.xlu0 %v1844_v49, %s4456_s29  ;;  %v7206_v49 = vmov 0  ;;  %vm5369_vm5 = vcmp.lt.s32.totalorder %v283_v28, 15  ;;  %v7233_v55 = vmov 0 }
 0x1e3   : > { %v2047_v7 = vpop.permute.xlu1 %2046  ;;  %v7207_v49 = vsel %vm5354_vm4, 4294967295, %v7206_v49  ;;  %v2139_v37 = vrot.slane %v2049_v62, 1  ;;  %v7210_v44 = vsel %vm5369_vm5, 4294967295, %v7209_v44  ;;  %v297_v62 = vand.u32 15, %v231_v56 }
 0x1e4   : > { %v2138_v41 = vrot.slane %v2047_v7, 1  ;;  %7208 = vst [vmem:[#allocation62_spill] sm:$0xff] %v7207_v49  ;;  %v2195_v7 = vsel %vm7096_vm3, %v2136_v13, %v2137_v58  ;;  %7211 = vst [vmem:[#allocation63_spill] sm:$0xff] %v7210_v44  ;;  %v233_v56 = vadd.s32 56, %v4962_v15 }
 0x1e5   : > { %vm5385_vm1 = vcmp.lt.s32.totalorder %v297_v62, 15 }
 0x1e6   : > { %v5350_v40 = vpop.permute.xlu0 %1884  ;;  %2327 = vrot.lane.b32.xlu0 %v2197_v46, %s4456_s29  ;;  %1940 = vrot.lane.b32.xlu1 %v1718_v6, %s4456_s29  ;;  %v2264_v46 = vsel %vm5354_vm4, %v2196_v45, 0.0  ;;  %v2194_v54 = vsel %vm7096_vm3, %v2137_v58, %v2138_v41  ;;  %v2193_v13 = vsel %vm7096_vm3, %v2138_v41, %v2139_v37  ;;  %v7212_v58 = vmov 0 }
 0x1e7   : > { %v5360_v42 = vpop.permute.xlu1 %1882  ;;  %v2266_v45 = vsel %vm5369_vm5, %v2194_v54, 0.0  ;;  %v7213_v58 = vsel %vm5385_vm1, 4294967295, %v7212_v58  ;;  %v311_v62 = vand.u32 15, %v233_v56 }
 0x1e8   : > { %7214 = vst [vmem:[#allocation64_spill] sm:$0xff] %v7213_v58 }
 0x1e9   : > { %vm5402_vm5 = vcmp.lt.s32.totalorder %v311_v62, 15 }
 0x1ea   : > { %v2053_v6 = vpop.permute.xlu0 %2052  ;;  %2331 = vrot.lane.b32.xlu0 %v2195_v7, %s4456_s29  ;;  %2329 = vrot.lane.b32.xlu1 %v2264_v46, %s4456_s29  ;;  %v7216_v24 = vsel %vm5402_vm5, 4294967295, %v7215_v24 }
 0x1eb   : > { %v5375_v63 = vpop.permute.xlu1 %1888  ;;  %v2141_v7 = vrot.slane %v2053_v6, 1  ;;  %7217 = vst [vmem:[#allocation65_spill] sm:$0xff] %v7216_v24 }
 0x1ee   : > { %v5381_v49 = vpop.permute.xlu0 %1886  ;;  %2335 = vrot.lane.b32.xlu0 %v2193_v13, %s4456_s29  ;;  %2333 = vrot.lane.b32.xlu1 %v2266_v45, %s4456_s29 }
 0x1ef   : > { %v2051_v28 = vpop.permute.xlu1 %2050 }
 0x1f0   : > { %v2140_v46 = vrot.slane %v2051_v28, 1 }
 0x1f2   : > { %v2057_v26 = vpop.permute.xlu0 %2056  ;;  %v2191_v41 = vsel %vm7096_vm3, %v2140_v46, %v2141_v7  ;;  %v2192_v54 = vsel %vm7096_vm3, %v2139_v37, %v2140_v46  ;;  %v235_v37 = vadd.s32 72, %v4962_v15 }
 0x1f3   : > { %v5394_v44 = vpop.permute.xlu1 %1892  ;;  %2339 = vrot.lane.b32.xlu0 %v2191_v41, %s4456_s29  ;;  %v2268_v6 = vsel %vm5385_vm1, %v2192_v54, 0.0  ;;  %v2143_v28 = vrot.slane %v2057_v26, 1 }
 0x1f4   : > { %2337 = vrot.lane.b32.xlu1 %v2268_v6, %s4456_s29  ;;  %v325_v56 = vand.u32 15, %v235_v37 }
 0x1f6   : > { %v5400_v13 = vpop.permute.xlu0 %1890  ;;  %vm5419_vm1 = vcmp.lt.s32.totalorder %v325_v56, 15 }
 0x1f7   : > { %v2055_v45 = vpop.permute.xlu1 %2054  ;;  %v7219_v18 = vsel %vm5419_vm1, 4294967295, %v7218_v18 }
 0x1f8   : > { %v2142_v12 = vrot.slane %v2055_v45, 1  ;;  %7220 = vst [vmem:[#allocation66_spill] sm:$0xff] %v7219_v18 }
 0x1fa   : > { %v2061_v46 = vpop.permute.xlu0 %2060  ;;  %v2189_v41 = vsel %vm7096_vm3, %v2142_v12, %v2143_v28  ;;  %v2190_v54 = vsel %vm7096_vm3, %v2141_v7, %v2142_v12  ;;  %v237_v12 = vadd.s32 88, %v4962_v15 }
 0x1fb   : > { %v5411_v6 = vpop.permute.xlu1 %1896  ;;  %2343 = vrot.lane.b32.xlu0 %v2189_v41, %s4456_s29  ;;  %v2270_v26 = vsel %vm5402_vm5, %v2190_v54, 0.0  ;;  %v2145_v58 = vrot.slane %v2061_v46, 1 }
 0x1fc   : > { %2341 = vrot.lane.b32.xlu1 %v2270_v26, %s4456_s29  ;;  %v339_v46 = vand.u32 15, %v237_v12 }
 0x1fe   : > { %v5417_v62 = vpop.permute.xlu0 %1894  ;;  %vm5436_vm5 = vcmp.lt.s32.totalorder %v339_v46, 15 }
 0x1ff   : > { %v2059_v45 = vpop.permute.xlu1 %2058  ;;  %v7222_v33 = vsel %vm5436_vm5, 4294967295, %v7221_v33 }
 0x200   : > { %v2144_v1 = vrot.slane %v2059_v45, 1  ;;  %7223 = vst [vmem:[#allocation67_spill] sm:$0xff] %v7222_v33 }
 0x202   : > { %v2065_v7 = vpop.permute.xlu0 %2064  ;;  %v2187_v41 = vsel %vm7096_vm3, %v2144_v1, %v2145_v58  ;;  %v2188_v54 = vsel %vm7096_vm3, %v2143_v28, %v2144_v1  ;;  %v239_v1 = vadd.s32 104, %v4962_v15 }
 0x203   : > { %v5428_v26 = vpop.permute.xlu1 %1900  ;;  %2347 = vrot.lane.b32.xlu0 %v2187_v41, %s4456_s29  ;;  %v2272_v37 = vsel %vm5419_vm1, %v2188_v54, 0.0  ;;  %v2147_v24 = vrot.slane %v2065_v7, 1 }
 0x204   : > { %2345 = vrot.lane.b32.xlu1 %v2272_v37, %s4456_s29  ;;  %v353_v7 = vand.u32 15, %v239_v1 }
 0x206   : > { %v5434_v56 = vpop.permute.xlu0 %1898  ;;  %vm5453_vm1 = vcmp.lt.s32.totalorder %v353_v7, 15 }
 0x207   : > { %v2063_v45 = vpop.permute.xlu1 %2062  ;;  %v7225_v22 = vsel %vm5453_vm1, 4294967295, %v7224_v22 }
 0x208   : > { %v2146_v20 = vrot.slane %v2063_v45, 1  ;;  %7226 = vst [vmem:[#allocation68_spill] sm:$0xff] %v7225_v22 }
 0x20a   : > { %v2069_v28 = vpop.permute.xlu0 %2068  ;;  %v2185_v41 = vsel %vm7096_vm3, %v2146_v20, %v2147_v24  ;;  %v2186_v54 = vsel %vm7096_vm3, %v2145_v58, %v2146_v20  ;;  %v241_v20 = vadd.s32 120, %v4962_v15 }
 0x20b   : > { %v5445_v37 = vpop.permute.xlu1 %1904  ;;  %2351 = vrot.lane.b32.xlu0 %v2185_v41, %s4456_s29  ;;  %v2274_v12 = vsel %vm5436_vm5, %v2186_v54, 0.0  ;;  %v2149_v18 = vrot.slane %v2069_v28, 1 }
 0x20c   : > { %2349 = vrot.lane.b32.xlu1 %v2274_v12, %s4456_s29  ;;  %v367_v28 = vand.u32 15, %v241_v20 }
 0x20e   : > { %v5451_v46 = vpop.permute.xlu0 %1902  ;;  %vm5470_vm5 = vcmp.lt.s32.totalorder %v367_v28, 15 }
 0x20f   : > { %v2067_v45 = vpop.permute.xlu1 %2066  ;;  %v7228_v43 = vsel %vm5470_vm5, 4294967295, %v7227_v43 }
 0x210   : > { %v2148_v9 = vrot.slane %v2067_v45, 1  ;;  %7229 = vst [vmem:[#allocation69_spill] sm:$0xff] %v7228_v43 }
 0x212   : > { %v2073_v58 = vpop.permute.xlu0 %2072  ;;  %v2183_v41 = vsel %vm7096_vm3, %v2148_v9, %v2149_v18  ;;  %v2184_v54 = vsel %vm7096_vm3, %v2147_v24, %v2148_v9  ;;  %v243_v9 = vadd.s32 136, %v4962_v15 }
 0x213   : > { %v5462_v12 = vpop.permute.xlu1 %1908  ;;  %2355 = vrot.lane.b32.xlu0 %v2183_v41, %s4456_s29  ;;  %v2276_v1 = vsel %vm5453_vm1, %v2184_v54, 0.0  ;;  %v2151_v33 = vrot.slane %v2073_v58, 1 }
 0x214   : > { %2353 = vrot.lane.b32.xlu1 %v2276_v1, %s4456_s29  ;;  %v381_v58 = vand.u32 15, %v243_v9 }
 0x216   : > { %v5468_v7 = vpop.permute.xlu0 %1906  ;;  %vm5487_vm1 = vcmp.lt.s32.totalorder %v381_v58, 15 }
 0x217   : > { %v2071_v45 = vpop.permute.xlu1 %2070  ;;  %v7231_v3 = vsel %vm5487_vm1, 4294967295, %v7230_v3 }
 0x218   : > { %v2150_v11 = vrot.slane %v2071_v45, 1  ;;  %7232 = vst [vmem:[#allocation70_spill] sm:$0xff] %v7231_v3 }
 0x21a   : > { %v2077_v24 = vpop.permute.xlu0 %2076  ;;  %v2181_v41 = vsel %vm7096_vm3, %v2150_v11, %v2151_v33  ;;  %v2182_v54 = vsel %vm7096_vm3, %v2149_v18, %v2150_v11  ;;  %v245_v11 = vadd.s32 152, %v4962_v15 }
 0x21b   : > { %v5479_v1 = vpop.permute.xlu1 %1912  ;;  %2359 = vrot.lane.b32.xlu0 %v2181_v41, %s4456_s29  ;;  %v2278_v20 = vsel %vm5470_vm5, %v2182_v54, 0.0  ;;  %v2153_v22 = vrot.slane %v2077_v24, 1 }
 0x21c   : > { %2357 = vrot.lane.b32.xlu1 %v2278_v20, %s4456_s29  ;;  %v395_v24 = vand.u32 15, %v245_v11 }
 0x21e   : > { %v5485_v28 = vpop.permute.xlu0 %1910  ;;  %vm5504_vm5 = vcmp.lt.s32.totalorder %v395_v24, 15 }
 0x21f   : > { %v2075_v45 = vpop.permute.xlu1 %2074  ;;  %v7234_v55 = vsel %vm5504_vm5, 4294967295, %v7233_v55 }
 0x220   : > { %v2152_v14 = vrot.slane %v2075_v45, 1  ;;  %7235 = vst [vmem:[#allocation71_spill] sm:$0xff] %v7234_v55 }
 0x222   : > { %v2081_v18 = vpop.permute.xlu0 %2080  ;;  %v2179_v41 = vsel %vm7096_vm3, %v2152_v14, %v2153_v22  ;;  %v2180_v54 = vsel %vm7096_vm3, %v2151_v33, %v2152_v14  ;;  %v247_v14 = vadd.s32 168, %v4962_v15 }
 0x223   : > { %v5496_v20 = vpop.permute.xlu1 %1916  ;;  %2363 = vrot.lane.b32.xlu0 %v2179_v41, %s4456_s29  ;;  %v2280_v9 = vsel %vm5487_vm1, %v2180_v54, 0.0  ;;  %v2155_v43 = vrot.slane %v2081_v18, 1 }
 0x224   : > { %2361 = vrot.lane.b32.xlu1 %v2280_v9, %s4456_s29  ;;  %v409_v18 = vand.u32 15, %v247_v14 }
 0x226   : > { %v5502_v58 = vpop.permute.xlu0 %1914  ;;  %vm5521_vm1 = vcmp.lt.s32.totalorder %v409_v18, 15 }
 0x227   : > { %v2079_v45 = vpop.permute.xlu1 %2078  ;;  %v7237_v51 = vsel %vm5521_vm1, 4294967295, %v7236_v51 }
 0x228   : > { %v2154_v34 = vrot.slane %v2079_v45, 1  ;;  %7238 = vst [vmem:[#allocation72_spill] sm:$0xff] %v7237_v51 }
 0x22a   : > { %v2085_v33 = vpop.permute.xlu0 %2084  ;;  %v2177_v41 = vsel %vm7096_vm3, %v2154_v34, %v2155_v43  ;;  %v2178_v54 = vsel %vm7096_vm3, %v2153_v22, %v2154_v34  ;;  %v249_v34 = vadd.s32 184, %v4962_v15 }
 0x22b   : > { %v5513_v9 = vpop.permute.xlu1 %1920  ;;  %2367 = vrot.lane.b32.xlu0 %v2177_v41, %s4456_s29  ;;  %v2282_v11 = vsel %vm5504_vm5, %v2178_v54, 0.0  ;;  %v2157_v3 = vrot.slane %v2085_v33, 1 }
 0x22c   : > { %2365 = vrot.lane.b32.xlu1 %v2282_v11, %s4456_s29  ;;  %v423_v33 = vand.u32 15, %v249_v34 }
 0x22e   : > { %v5519_v24 = vpop.permute.xlu0 %1918  ;;  %vm5538_vm5 = vcmp.lt.s32.totalorder %v423_v33, 15 }
 0x22f   : > { %v2083_v45 = vpop.permute.xlu1 %2082  ;;  %v7241_v35 = vsel %vm5538_vm5, 4294967295, %v7240_v35 }
 0x230   : > { %v2156_v59 = vrot.slane %v2083_v45, 1  ;;  %7242 = vst [vmem:[#allocation74_spill] sm:$0xff] %v7241_v35 }
 0x232   : > { %v2089_v22 = vpop.permute.xlu0 %2088  ;;  %v2175_v41 = vsel %vm7096_vm3, %v2156_v59, %v2157_v3  ;;  %v2176_v54 = vsel %vm7096_vm3, %v2155_v43, %v2156_v59  ;;  %v251_v43 = vadd.s32 200, %v4962_v15 }
 0x233   : > { %v5530_v11 = vpop.permute.xlu1 %1924  ;;  %2371 = vrot.lane.b32.xlu0 %v2175_v41, %s4456_s29  ;;  %v2284_v14 = vsel %vm5521_vm1, %v2176_v54, 0.0  ;;  %v2159_v55 = vrot.slane %v2089_v22, 1 }
 0x234   : > { %7239 = vst [vmem:[#allocation73_spill] sm:$0xff] %v5530_v11  ;;  %2369 = vrot.lane.b32.xlu1 %v2284_v14, %s4456_s29  ;;  %v437_v22 = vand.u32 15, %v251_v43  ;;  %v7245_v11 = vmov 0 }
 0x236   : > { %v5536_v18 = vpop.permute.xlu0 %1922  ;;  %vm5555_vm1 = vcmp.lt.s32.totalorder %v437_v22, 15  ;;  %v257_v22 = vadd.s32 248, %v4962_v15 }
 0x237   : > { %v2087_v45 = vpop.permute.xlu1 %2086  ;;  %v7246_v11 = vsel %vm5555_vm1, 4294967295, %v7245_v11 }
 0x238   : > { %v2158_v2 = vrot.slane %v2087_v45, 1  ;;  %7247 = vst [vmem:[#allocation77_spill] sm:$0xff] %v7246_v11 }
 0x23a   : > { %v2093_v59 = vpop.permute.xlu0 %2092  ;;  %v2173_v41 = vsel %vm7096_vm3, %v2158_v2, %v2159_v55  ;;  %v2174_v54 = vsel %vm7096_vm3, %v2157_v3, %v2158_v2  ;;  %v253_v3 = vadd.s32 216, %v4962_v15 }
 0x23b   : > { %v5547_v14 = vpop.permute.xlu1 %1928  ;;  %2375 = vrot.lane.b32.xlu0 %v2173_v41, %s4456_s29  ;;  %v2286_v34 = vsel %vm5538_vm5, %v2174_v54, 0.0  ;;  %v2161_v51 = vrot.slane %v2093_v59, 1 }
 0x23c   : > { %7243 = vst [vmem:[#allocation75_spill] sm:$0xff] %v5547_v14  ;;  %2373 = vrot.lane.b32.xlu1 %v2286_v34, %s4456_s29  ;;  %v451_v59 = vand.u32 15, %v253_v3 }
 0x23e   : > { %v5553_v33 = vpop.permute.xlu0 %1926  ;;  %vm5573_vm5 = vcmp.lt.s32.totalorder %v451_v59, 15  ;;  %v255_v59 = vadd.s32 232, %v4962_v15 }
 0x23f   : > { %7244 = vst [vmem:[#allocation76_spill] sm:$0xff] %v5553_v33  ;;  %v2091_v45 = vpop.permute.xlu1 %2090  ;;  %v7249_v36 = vsel %vm5573_vm5, 4294967295, %v7248_v36 }
 0x240   : > { %v2160_v4 = vrot.slane %v2091_v45, 1  ;;  %7250 = vst [vmem:[#allocation78_spill] sm:$0xff] %v7249_v36  ;;  %v1653_v36 = vadd.f32 %v5298_v50, %v4969_v32 }
 0x242   : > { %v2097_v2 = vpop.permute.xlu0 %2096  ;;  %v2171_v41 = vsel %vm7096_vm3, %v2160_v4, %v2161_v51  ;;  %v2172_v54 = vsel %vm7096_vm3, %v2159_v55, %v2160_v4  ;;  %v479_v55 = vand.u32 15, %v257_v22  ;;  %v7254_v22 = vrot.slane %v5309_v5, 1 }
 0x243   : > { %v5564_v34 = vpop.permute.xlu1 %1932  ;;  %2379 = vrot.lane.b32.xlu0 %v2171_v41, %s4456_s29  ;;  %v2288_v43 = vsel %vm5555_vm1, %v2172_v54, 0.0  ;;  %v2163_v14 = vrot.slane %v2097_v2, 1  ;;  %v7256_v5 = vmov 0 }
 0x244   : > { %2377 = vrot.lane.b32.xlu1 %v2288_v43, %s4456_s29  ;;  %vm5587_vm1 = vcmp.lt.s32.totalorder %v479_v55, 15  ;;  %v7251_v43 = vmov 0 }
 0x245   : > { %v7252_v43 = vsel %vm5587_vm1, 4294967295, %v7251_v43 }
 0x246   : > { %v5571_v45 = vpop.permute.xlu0 %1930  ;;  %7253 = vst [vmem:[#allocation79_spill] sm:$0xff] %v7252_v43 }
 0x247   : > { %v2095_v35 = vpop.permute.xlu1 %2094 }
 0x248   : > { %v2162_v33 = vrot.slane %v2095_v35, 1 }
 0x24a   : > { %v2169_v4 = vsel %vm7096_vm3, %v2162_v33, %v2163_v14  ;;  %v2170_v41 = vsel %vm7096_vm3, %v2161_v51, %v2162_v33  ;;  %v5584_v54 = vpop.permute.xlu0 %1934 }
 0x24b   : > { %2383 = vrot.lane.b32.xlu0 %v2169_v4, %s4456_s29  ;;  %v2290_v3 = vsel %vm5573_vm5, %v2170_v41, 0.0 }
 0x24c   : > { %v2101_v2 = vpop.permute.xlu1 %2100  ;;  %2381 = vrot.lane.b32.xlu1 %v2290_v3, %s4456_s29  ;;  %v465_v3 = vand.u32 15, %v255_v59 }
 0x24d   : > { %v2165_v35 = vrot.slane %v2101_v2, 1 }
 0x24e   : > { %vm5605_vm5 = vcmp.lt.s32.totalorder %v465_v3, 15  ;;  %v1655_v3 = vadd.f32 %v5298_v50, %v4985_v17 }
 0x24f   : > { %v2198_v51 = vsel %vm7096_vm3, %v2165_v35, %v7254_v22  ;;  %v7257_v5 = vsel %vm5605_vm5, 4294967295, %v7256_v5 }
 0x250   : > { %v5596_v33 = vpop.permute.xlu1 %1936  ;;  %v1879_v4 = vpop.permute.xlu0 %1878  ;;  %v2294_v41 = vsel %vm5587_vm1, %v2198_v51, 0.0  ;;  %7258 = vst [vmem:[#allocation81_spill] sm:$0xff] %v7257_v5 }
 0x251   : > { %7255 = vst [vmem:[#allocation80_spill] sm:$0xff] %v5596_v33  ;;  %2389 = vrot.lane.b32.xlu1 %v2294_v41, %s4456_s29  ;;  %v1974_v22 = vadd.f32 %v1879_v4, %v1653_v36  ;;  %v1976_v36 = vadd.f32 %v5360_v42, %v1655_v3  ;;  %v1657_v4 = vadd.f32 %v5298_v50, %v5000_v29 }
 0x252   : > { %v1659_v29 = vadd.f32 %v5298_v50, %v5023_v23 }
 0x253   : > { %v1978_v42 = vadd.f32 %v5381_v49, %v1657_v4 }
 0x254   : > { %v2099_v55 = vpop.permute.xlu1 %2098  ;;  %v5601_v2 = vpop.permute.xlu0 %1938 }
 0x255   : > { %v2164_v11 = vrot.slane %v2099_v55, 1 }
 0x257   : > { %v2167_v33 = vsel %vm7096_vm3, %v2164_v11, %v2165_v35  ;;  %v2168_v51 = vsel %vm7096_vm3, %v2163_v14, %v2164_v11  ;;  %vm7285_vm3 = vcmask 64512  }
 0x258   : > { %2387 = vrot.lane.b32.xlu0 %v2167_v33, %s4456_s29  ;;  %v2328_v59 = vpop.permute.xlu0 %2327  ;;  %v5614_v41 = vpop.permute.xlu1 %1940  ;;  %v2292_v32 = vsel %vm5605_vm5, %v2168_v51, 0.0  ;;  %v1656_v33 = vadd.f32 %v4980_v0, %v5298_v50  ;;  %vm7286_vm5 = vcmask 97280  }
 0x259   : > { %v5620_v55 = vadd.f32 %v2328_v59, %v1974_v22  ;;  %2385 = vrot.lane.b32.xlu1 %v2292_v32, %s4456_s29  ;;  %vm7293_vm6 = vmmov %vm7286_vm5 }
 0x25a   : > { %v1977_v17 = vadd.f32 %v5350_v40, %v1656_v33  ;;  %v1658_v40 = vadd.f32 %v4995_v19, %v5298_v50  ;;  %vm7298_vm0 = vmmov %vm7286_vm5 }
 0x25b   : > { %v7087_v35 = vmax.f32 %v5620_v55, 0.0 }
 0x25c   : > { %v2332_v11 = vpop.permute.xlu0 %2331  ;;  %v5625_v14 = vpop.permute.xlu1 %2329  ;;  %v1979_v33 = vadd.f32 %v5375_v63, %v1658_v40  ;;  %v1661_v63 = vadd.f32 %v5298_v50, %v5046_v8 }
 0x25d   : > { %v5631_v51 = vadd.f32 %v2332_v11, %v1976_v36  ;;  %2519 = vrot.lane.b32.xlu0 %v7087_v35, %s4459_s8  ;;  %v1980_v11 = vadd.f32 %v5400_v13, %v1659_v29 }
 0x25f   : > { %v7086_v22 = vmax.f32 %v5631_v51, 0.0 }
 0x260   : > { %v2336_v59 = vpop.permute.xlu0 %2335  ;;  %v2334_v32 = vpop.permute.xlu1 %2333 }
 0x261   : > { %v5639_v3 = vadd.f32 %v2336_v59, %v1978_v42  ;;  %v5641_v0 = vadd.f32 %v2334_v32, %v1977_v17  ;;  %2523 = vrot.lane.b32.xlu0 %v7086_v22, %s4459_s8  ;;  %v1660_v59 = vadd.f32 %v5018_v30, %v5298_v50  ;;  %v1982_v32 = vadd.f32 %v5417_v62, %v1661_v63 }
 0x262   : > { %v1663_v30 = vadd.f32 %v5298_v50, %v5069_v57 }
 0x263   : > { %v7083_v49 = vmax.f32 %v5639_v3, 0.0  ;;  %v7084_v36 = vmax.f32 %v5641_v0, 0.0  ;;  %v1981_v29 = vadd.f32 %v5394_v44, %v1660_v59  ;;  %v1662_v44 = vadd.f32 %v5041_v27, %v5298_v50 }
 0x264   : > { %v1984_v62 = vadd.f32 %v5434_v56, %v1663_v30  ;;  %v1665_v27 = vadd.f32 %v5298_v50, %v5092_v21 }
 0x265   : > { %2527 = vrot.lane.b32.xlu0 %v7083_v49, %s4459_s8  ;;  %v2340_v4 = vpop.permute.xlu0 %2339  ;;  %2525 = vrot.lane.b32.xlu1 %v7084_v36, %s4459_s8  ;;  %v1983_v63 = vadd.f32 %v5411_v6, %v1662_v44  ;;  %v1664_v6 = vadd.f32 %v5064_v31, %v5298_v50  ;;  %v1667_v31 = vadd.f32 %v5298_v50, %v5115_v16 }
 0x266   : > { %v5660_v23 = vadd.f32 %v2340_v4, %v1980_v11  ;;  %v2338_v19 = vpop.permute.xlu1 %2337  ;;  %v1986_v56 = vadd.f32 %v5451_v46, %v1665_v27 }
 0x267   : > { %v5662_v17 = vadd.f32 %v2338_v19, %v1979_v33  ;;  %v1985_v30 = vadd.f32 %v5428_v26, %v1664_v6  ;;  %v1666_v26 = vadd.f32 %v5087_v10, %v5298_v50  ;;  %v1988_v46 = vadd.f32 %v5468_v7, %v1667_v31 }
 0x268   : > { %v7081_v42 = vmax.f32 %v5660_v23, 0.0  ;;  %v1669_v10 = vadd.f32 %v5298_v50, %v5138_v47 }
 0x269   : > { %v7082_v13 = vmax.f32 %v5662_v17, 0.0  ;;  %v1987_v27 = vadd.f32 %v5445_v37, %v1666_v26  ;;  %v1668_v37 = vadd.f32 %v5110_v25, %v5298_v50  ;;  %v1671_v25 = vadd.f32 %v5298_v50, %v5161_v39 }
 0x26a   : > { %2531 = vrot.lane.b32.xlu0 %v7081_v42, %s4459_s8  ;;  %v1990_v7 = vadd.f32 %v5485_v28, %v1669_v10 }
 0x26b   : > { %2529 = vrot.lane.b32.xlu1 %v7082_v13, %s4459_s8  ;;  %v1989_v31 = vadd.f32 %v5462_v12, %v1668_v37  ;;  %v1670_v12 = vadd.f32 %v5133_v48, %v5298_v50  ;;  %v1992_v28 = vadd.f32 %v5502_v58, %v1671_v25  ;;  %v1673_v48 = vadd.f32 %v5298_v50, %v5184_v38 }
 0x26d   : > { %v2344_v40 = vpop.permute.xlu0 %2343  ;;  %v1991_v10 = vadd.f32 %v5479_v1, %v1670_v12  ;;  %v1672_v1 = vadd.f32 %v5156_v61, %v5298_v50  ;;  %v1994_v58 = vadd.f32 %v5519_v24, %v1673_v48  ;;  %v1675_v61 = vadd.f32 %v5298_v50, %v5207_v53 }
 0x26e   : > { %v5678_v11 = vadd.f32 %v2344_v40, %v1982_v32  ;;  %v2342_v33 = vpop.permute.xlu1 %2341 }
 0x26f   : > { %v5680_v8 = vadd.f32 %v2342_v33, %v1981_v29  ;;  %v1993_v25 = vadd.f32 %v5496_v20, %v1672_v1  ;;  %v1674_v20 = vadd.f32 %v5179_v60, %v5298_v50  ;;  %v1996_v24 = vadd.f32 %v5536_v18, %v1675_v61  ;;  %v7259_v18 = vld [vmem:[#allocation46_spill] sm:$0xff]  ;;  %v7260_v61 = vld [vmem:[#allocation76_spill] sm:$0xff] }
 0x270   : > { %v7079_v4 = vmax.f32 %v5678_v11, 0.0  ;;  %v1677_v60 = vadd.f32 %v5298_v50, %v5230_v52 }
 0x271   : > { %v7080_v19 = vmax.f32 %v5680_v8, 0.0  ;;  %v1995_v48 = vadd.f32 %v5513_v9, %v1674_v20  ;;  %v1676_v9 = vadd.f32 %v7259_v18, %v5298_v50 }
 0x272   : > { %2535 = vrot.lane.b32.xlu0 %v7079_v4, %s4459_s8  ;;  %v1998_v20 = vadd.f32 %v7260_v61, %v1677_v60  ;;  %v7263_v60 = vld [vmem:[#allocation48_spill] sm:$0xff]  ;;  %v7264_v61 = vld [vmem:[#allocation75_spill] sm:$0xff] }
 0x273   : > { %2533 = vrot.lane.b32.xlu1 %v7080_v19, %s4459_s8 }
 0x275   : > { %v2348_v59 = vpop.permute.xlu0 %2347 }
 0x276   : > { %v5696_v32 = vadd.f32 %v2348_v59, %v1984_v62  ;;  %v2346_v29 = vpop.permute.xlu1 %2345 }
 0x277   : > { %v5698_v57 = vadd.f32 %v2346_v29, %v1983_v63 }
 0x278   : > { %v7077_v40 = vmax.f32 %v5696_v32, 0.0 }
 0x279   : > { %v7078_v33 = vmax.f32 %v5698_v57, 0.0 }
 0x27a   : > { %2539 = vrot.lane.b32.xlu0 %v7077_v40, %s4459_s8 }
 0x27b   : > { %2537 = vrot.lane.b32.xlu1 %v7078_v33, %s4459_s8 }
 0x27d   : > { %v2352_v44 = vpop.permute.xlu0 %2351 }
 0x27e   : > { %v5714_v62 = vadd.f32 %v2352_v44, %v1986_v56  ;;  %v2350_v63 = vpop.permute.xlu1 %2349 }
 0x27f   : > { %v5716_v21 = vadd.f32 %v2350_v63, %v1985_v30 }
 0x280   : > { %v7075_v59 = vmax.f32 %v5714_v62, 0.0 }
 0x281   : > { %v7076_v29 = vmax.f32 %v5716_v21, 0.0 }
 0x282   : > { %2543 = vrot.lane.b32.xlu0 %v7075_v59, %s4459_s8 }
 0x283   : > { %2541 = vrot.lane.b32.xlu1 %v7076_v29, %s4459_s8 }
 0x285   : > { %v2356_v6 = vpop.permute.xlu0 %2355 }
 0x286   : > { %v5732_v56 = vadd.f32 %v2356_v6, %v1988_v46  ;;  %v2354_v30 = vpop.permute.xlu1 %2353 }
 0x287   : > { %v5734_v16 = vadd.f32 %v2354_v30, %v1987_v27 }
 0x288   : > { %v7071_v44 = vmax.f32 %v5732_v56, 0.0 }
 0x289   : > { %v7074_v63 = vmax.f32 %v5734_v16, 0.0 }
 0x28a   : > { %2547 = vrot.lane.b32.xlu0 %v7071_v44, %s4459_s8 }
 0x28b   : > { %2545 = vrot.lane.b32.xlu1 %v7074_v63, %s4459_s8 }
 0x28d   : > { %v2360_v26 = vpop.permute.xlu0 %2359 }
 0x28e   : > { %v5750_v46 = vadd.f32 %v2360_v26, %v1990_v7  ;;  %v2358_v27 = vpop.permute.xlu1 %2357 }
 0x28f   : > { %v5752_v47 = vadd.f32 %v2358_v27, %v1989_v31 }
 0x290   : > { %v7065_v6 = vmax.f32 %v5750_v46, 0.0 }
 0x291   : > { %v7069_v30 = vmax.f32 %v5752_v47, 0.0 }
 0x292   : > { %2551 = vrot.lane.b32.xlu0 %v7065_v6, %s4459_s8 }
 0x293   : > { %2549 = vrot.lane.b32.xlu1 %v7069_v30, %s4459_s8 }
 0x295   : > { %v2364_v37 = vpop.permute.xlu0 %2363 }
 0x296   : > { %v5768_v7 = vadd.f32 %v2364_v37, %v1992_v28  ;;  %v2362_v31 = vpop.permute.xlu1 %2361 }
 0x297   : > { %v5770_v39 = vadd.f32 %v2362_v31, %v1991_v10 }
 0x298   : > { %v7059_v26 = vmax.f32 %v5768_v7, 0.0 }
 0x299   : > { %v7062_v27 = vmax.f32 %v5770_v39, 0.0 }
 0x29a   : > { %2555 = vrot.lane.b32.xlu0 %v7059_v26, %s4459_s8  ;;  %v7262_v26 = vld [vmem:[#allocation51_spill] sm:$0xff] }
 0x29b   : > { %2553 = vrot.lane.b32.xlu1 %v7062_v27, %s4459_s8  ;;  %v1679_v18 = vadd.f32 %v5298_v50, %v7262_v26  ;;  %v7265_v27 = vld [vmem:[#allocation54_spill] sm:$0xff] }
 0x29d   : > { %v2368_v12 = vpop.permute.xlu0 %2367 }
 0x29e   : > { %v5786_v28 = vadd.f32 %v2368_v12, %v1994_v58  ;;  %v2366_v10 = vpop.permute.xlu1 %2365 }
 0x29f   : > { %v5788_v38 = vadd.f32 %v2366_v10, %v1993_v25 }
 0x2a0   : > { %v7056_v37 = vmax.f32 %v5786_v28, 0.0 }
 0x2a1   : > { %v7057_v31 = vmax.f32 %v5788_v38, 0.0 }
 0x2a2   : > { %2559 = vrot.lane.b32.xlu0 %v7056_v37, %s4459_s8 }
 0x2a3   : > { %2557 = vrot.lane.b32.xlu1 %v7057_v31, %s4459_s8 }
 0x2a5   : > { %v2372_v1 = vpop.permute.xlu0 %2371 }
 0x2a6   : > { %v5804_v58 = vadd.f32 %v2372_v1, %v1996_v24  ;;  %v2370_v25 = vpop.permute.xlu1 %2369  ;;  %v7261_v24 = vld [vmem:[#allocation73_spill] sm:$0xff] }
 0x2a7   : > { %v5806_v53 = vadd.f32 %v2370_v25, %v1995_v48  ;;  %v1997_v48 = vadd.f32 %v7261_v24, %v1676_v9  ;;  %v1678_v9 = vadd.f32 %v7263_v60, %v5298_v50  ;;  %v1681_v60 = vadd.f32 %v5298_v50, %v7265_v27 }
 0x2a8   : > { %v7058_v12 = vmax.f32 %v5804_v58, 0.0 }
 0x2a9   : > { %v7060_v10 = vmax.f32 %v5806_v53, 0.0 }
 0x2aa   : > { %2563 = vrot.lane.b32.xlu0 %v7058_v12, %s4459_s8 }
 0x2ab   : > { %2561 = vrot.lane.b32.xlu1 %v7060_v10, %s4459_s8 }
 0x2ad   : > { %v2376_v1 = vpop.permute.xlu0 %2375 }
 0x2ae   : > { %v5822_v25 = vadd.f32 %v2376_v1, %v1998_v20  ;;  %v2374_v37 = vpop.permute.xlu1 %2373  ;;  %v1999_v20 = vadd.f32 %v7264_v61, %v1678_v9  ;;  %v2002_v9 = vadd.f32 %v5584_v54, %v1681_v60  ;;  %v2871_v60 = vld [vmem:[%s6955_s3] sm:$0xff] }
 0x2af   : > { %v5824_v52 = vadd.f32 %v2374_v37, %v1997_v48  ;;  %v2000_v37 = vadd.f32 %v5571_v45, %v1679_v18  ;;  %v7266_v45 = vld [vmem:[#allocation50_spill] sm:$0xff] }
 0x2b0   : > { %v7061_v31 = vmax.f32 %v5822_v25, 0.0  ;;  %v1680_v18 = vadd.f32 %v7266_v45, %v5298_v50 }
 0x2b1   : > { %v7064_v12 = vmax.f32 %v5824_v52, 0.0 }
 0x2b2   : > { %2567 = vrot.lane.b32.xlu0 %v7061_v31, %s4459_s8 }
 0x2b3   : > { %2565 = vrot.lane.b32.xlu1 %v7064_v12, %s4459_s8 }
 0x2b5   : > { %v2380_v24 = vpop.permute.xlu0 %2379 }
 0x2b6   : > { %v5840_v48 = vadd.f32 %v2380_v24, %v2000_v37  ;;  %v2378_v1 = vpop.permute.xlu1 %2377  ;;  %v2001_v37 = vadd.f32 %v5564_v34, %v1680_v18  ;;  %v2872_v18 = vld [vmem:[%s6955_s3 + $0x8] sm:$0xf] }
 0x2b7   : > { %v5842_v26 = vadd.f32 %v2378_v1, %v1999_v20  ;;  %v7268_v1 = vld [vmem:[#allocation58_spill] sm:$0xff] }
 0x2b8   : > { %v7063_v10 = vmax.f32 %v5840_v48, 0.0 }
 0x2b9   : > { %v7068_v31 = vmax.f32 %v5842_v26, 0.0 }
 0x2ba   : > { %2571 = vrot.lane.b32.xlu0 %v7063_v10, %s4459_s8  ;;  %v1684_v10 = vadd.f32 %v7268_v1, %v5298_v50 }
 0x2bb   : > { %2569 = vrot.lane.b32.xlu1 %v7068_v31, %s4459_s8  ;;  %v7276_v31 = vld [vmem:[#allocation57_spill] sm:$0xff] }
 0x2bc   : > { %v2005_v6 = vadd.f32 %v5614_v41, %v1684_v10  ;;  %v4416_v10 = vpack.c.bf16 %v2872_v18, %v2871_v60  ;;  %v7274_v18 = vld [vmem:[#allocation80_spill] sm:$0xff] }
 0x2bd   : > { %v2384_v61 = vpop.permute.xlu0 %2383 }
 0x2be   : > { %v5858_v20 = vadd.f32 %v2384_v61, %v2002_v9  ;;  %v2382_v24 = vpop.permute.xlu1 %2381  ;;  %v7270_v9 = vld [vmem:[#allocation59_spill] sm:$0xff]  ;;  %v7271_v61 = vld [vmem:[#allocation53_spill] sm:$0xff]  ;;  %4418 = vmatprep.subr.msk.bf16.mxu1 %vm4506_vm2, %v4416_v10 }
 0x2bf   : > { %v5860_v27 = vadd.f32 %v2382_v24, %v2001_v37  ;;  %v1683_v37 = vadd.f32 %v5298_v50, %v7270_v9  ;;  %v1682_v24 = vadd.f32 %v7271_v61, %v5298_v50  ;;  %4421 = vmatpush3.bf16.msk.msra.mxu1 %vm4506_vm2, %v4416_v10  ;;  %vm7284_vm2 = vcmask 31744  }
 0x2c0   : > { %7267 = vst [vmem:[#allocation46_spill] sm:$0xff] %v5858_v20  ;;  %v7066_v12 = vmax.f32 %v5858_v20, 0.0  ;;  %vm7288_vm1 = vmmov %vm7284_vm2 }
 0x2c1   : > { %v7067_v45 = vmax.f32 %v5860_v27, 0.0  ;;  %v2004_v1 = vadd.f32 %v5601_v2, %v1683_v37  ;;  %v2003_v9 = vadd.f32 %v7274_v18, %v1682_v24  ;;  %vm7290_vm4 = vmmov %vm7288_vm1 }
 0x2c2   : > { %2575 = vrot.lane.b32.xlu0 %v7066_v12, %s4459_s8 }
 0x2c3   : > { %2573 = vrot.lane.b32.xlu1 %v7067_v45, %s4459_s8  ;;  %v2390_v34 = vpop.permute.xlu1 %2389 }
 0x2c4   : > { %v5873_v54 = vadd.f32 %v2390_v34, %v2005_v6  ;;  %v7273_v34 = vld [vmem:[#allocation36_spill] sm:$0xff] }
 0x2c5   : > { %v1654_v60 = vadd.f32 %v7273_v34, %v5298_v50 }
 0x2c6   : > { %7269 = vst [vmem:[#allocation76_spill] sm:$0xff] %v5873_v54  ;;  %v7070_v41 = vmax.f32 %v5873_v54, 0.0  ;;  %v7282_v54 = vmov 0.0  }
 0x2c7   : > { %v1975_v30 = vadd.f32 %v7276_v31, %v1654_v60 }
 0x2c8   : > { %2581 = vrot.lane.b32.xlu1 %v7070_v41, %s4459_s8 }
 0x2c9   : > { %v5904_v2 = vadd.f32 %v5625_v14, %v1975_v30 }
 0x2ca   : > { %v2388_v12 = vpop.permute.xlu0 %2387 }
 0x2cb   : > { %v5897_v45 = vadd.f32 %v2388_v12, %v2004_v1  ;;  %v2386_v61 = vpop.permute.xlu1 %2385  ;;  %v7085_v50 = vmax.f32 %v5904_v2, 0.0 }
 0x2cc   : > { %v5900_v41 = vadd.f32 %v2386_v61, %v2003_v9 }
 0x2cd   : > { %7275 = vst [vmem:[#allocation73_spill] sm:$0xff] %v5897_v45  ;;  %v7072_v44 = vmax.f32 %v5897_v45, 0.0 }
 0x2ce   : > { %7277 = vst [vmem:[#allocation51_spill] sm:$0xff] %v5900_v41  ;;  %v7073_v10 = vmax.f32 %v5900_v41, 0.0  ;;  %v7283_v41 = vmax.f32 %v5620_v55, 0.0 }
 0x2cf   : > { %v5907_v37 = vpop.permute.xlu0 %2519  ;;  %2579 = vrot.lane.b32.xlu0 %v7072_v44, %s4459_s8 }
 0x2d0   : > { %2577 = vrot.lane.b32.xlu1 %v7073_v10, %s4459_s8 }
 0x2d3   : > { %v5916_v31 = vpop.permute.xlu0 %2523 }
 0x2d4   : > { %2521 = vrot.lane.b32.xlu1 %v7085_v50, %s4459_s8  ;;  %2711 = vrot.lane.b32.xlu0 %v5916_v31, %s4455_s28 }
 0x2d7   : > { %v5923_v14 = vpop.permute.xlu0 %2527  ;;  %v5925_v30 = vpop.permute.xlu1 %2525 }
 0x2d8   : > { %2713 = vrot.lane.b32.xlu1 %v5925_v30, %s4455_s28  ;;  %2715 = vrot.lane.b32.xlu0 %v5923_v14, %s4455_s28 }
 0x2dc   : > { %v5931_v12 = vpop.permute.xlu0 %2531 }
 0x2dd   : > { %v5933_v24 = vpop.permute.xlu1 %2529  ;;  %2719 = vrot.lane.b32.xlu0 %v5931_v12, %s4455_s28 }
 0x2de   : > { %2717 = vrot.lane.b32.xlu1 %v5933_v24, %s4455_s28 }
 0x2e4   : > { %v5939_v6 = vpop.permute.xlu0 %2535 }
 0x2e5   : > { %v5941_v1 = vpop.permute.xlu1 %2533  ;;  %2723 = vrot.lane.b32.xlu0 %v5939_v6, %s4455_s28 }
 0x2e6   : > { %2721 = vrot.lane.b32.xlu1 %v5941_v1, %s4455_s28 }
 0x2ec   : > { %v5947_v34 = vpop.permute.xlu0 %2539 }
 0x2ed   : > { %v5949_v60 = vpop.permute.xlu1 %2537  ;;  %2727 = vrot.lane.b32.xlu0 %v5947_v34, %s4455_s28 }
 0x2ee   : > { %2725 = vrot.lane.b32.xlu1 %v5949_v60, %s4455_s28 }
 0x2f4   : > { %v5955_v18 = vpop.permute.xlu0 %2543 }
 0x2f5   : > { %v5957_v9 = vpop.permute.xlu1 %2541  ;;  %2731 = vrot.lane.b32.xlu0 %v5955_v18, %s4455_s28 }
 0x2f6   : > { %2729 = vrot.lane.b32.xlu1 %v5957_v9, %s4455_s28 }
 0x2fc   : > { %v5963_v61 = vpop.permute.xlu0 %2547 }
 0x2fd   : > { %v5965_v44 = vpop.permute.xlu1 %2545  ;;  %2735 = vrot.lane.b32.xlu0 %v5963_v61, %s4455_s28 }
 0x2fe   : > { %2733 = vrot.lane.b32.xlu1 %v5965_v44, %s4455_s28 }
 0x304   : > { %v5971_v10 = vpop.permute.xlu0 %2551 }
 0x305   : > { %v5973_v63 = vpop.permute.xlu1 %2549  ;;  %2739 = vrot.lane.b32.xlu0 %v5971_v10, %s4455_s28 }
 0x306   : > { %2737 = vrot.lane.b32.xlu1 %v5973_v63, %s4455_s28 }
 0x30c   : > { %v5979_v59 = vpop.permute.xlu0 %2555 }
 0x30d   : > { %v5981_v29 = vpop.permute.xlu1 %2553  ;;  %2743 = vrot.lane.b32.xlu0 %v5979_v59, %s4455_s28 }
 0x30e   : > { %2741 = vrot.lane.b32.xlu1 %v5981_v29, %s4455_s28 }
 0x314   : > { %v5987_v40 = vpop.permute.xlu0 %2559 }
 0x315   : > { %v5989_v33 = vpop.permute.xlu1 %2557  ;;  %2747 = vrot.lane.b32.xlu0 %v5987_v40, %s4455_s28 }
 0x316   : > { %2745 = vrot.lane.b32.xlu1 %v5989_v33, %s4455_s28 }
 0x31c   : > { %v5995_v4 = vpop.permute.xlu0 %2563 }
 0x31d   : > { %v5997_v19 = vpop.permute.xlu1 %2561  ;;  %2751 = vrot.lane.b32.xlu0 %v5995_v4, %s4455_s28 }
 0x31e   : > { %2749 = vrot.lane.b32.xlu1 %v5997_v19, %s4455_s28 }
 0x324   : > { %v6003_v42 = vpop.permute.xlu0 %2567 }
 0x325   : > { %v6005_v13 = vpop.permute.xlu1 %2565  ;;  %2755 = vrot.lane.b32.xlu0 %v6003_v42, %s4455_s28 }
 0x326   : > { %2753 = vrot.lane.b32.xlu1 %v6005_v13, %s4455_s28 }
 0x32c   : > { %v6011_v49 = vpop.permute.xlu0 %2571 }
 0x32d   : > { %7278 = vst [vmem:[#allocation48_spill] sm:$0xff] %v6011_v49  ;;  %v6013_v36 = vpop.permute.xlu1 %2569  ;;  %2759 = vrot.lane.b32.xlu0 %v6011_v49, %s4455_s28  ;;  %v7289_v49 = vmax.f32 %v5904_v2, 0.0 }
 0x32e   : > { %2757 = vrot.lane.b32.xlu1 %v6013_v36, %s4455_s28 }
 0x32f   : > { %v2808_v55 = vsel %vm7290_vm4, 0.0, %v7289_v49  ;;  %v7295_v49 = vmax.f32 %v5639_v3, 0.0  ;;  %vm7296_vm4 = vmmov %vm7288_vm1  ;;  %v7302_v3 = vmax.f32 %v5660_v23, 0.0  ;;  %v7307_v23 = vmax.f32 %v5678_v11, 0.0 }
 0x330   : > { %v7315_v11 = vmax.f32 %v5696_v32, 0.0  ;;  %v7321_v32 = vmax.f32 %v5714_v62, 0.0  ;;  %v7328_v62 = vmax.f32 %v5732_v56, 0.0  ;;  %v7335_v56 = vmax.f32 %v5750_v46, 0.0 }
 0x331   : > { %v7341_v46 = vmax.f32 %v5768_v7, 0.0  ;;  %v7349_v7 = vmax.f32 %v5786_v28, 0.0  ;;  %v7354_v28 = vmax.f32 %v5804_v58, 0.0  ;;  %v7362_v58 = vmax.f32 %v5822_v25, 0.0 }
 0x332   : > { %v7368_v25 = vmax.f32 %v5840_v48, 0.0 }
 0x334   : > { %v6019_v50 = vpop.permute.xlu0 %2575 }
 0x335   : > { %7279 = vst [vmem:[#allocation75_spill] sm:$0xff] %v6019_v50  ;;  %v6021_v22 = vpop.permute.xlu1 %2573  ;;  %2763 = vrot.lane.b32.xlu0 %v6019_v50, %s4455_s28  ;;  %v2807_v50 = vsel %vm7284_vm2, 0.0, %v7283_v41  ;;  %vm7291_vm2 = vmmov %vm7285_vm3 }
 0x336   : > { %7280 = vst [vmem:[#allocation54_spill] sm:$0xff] %v6021_v22  ;;  %2761 = vrot.lane.b32.xlu1 %v6021_v22, %s4455_s28 }
 0x33a   : > { %v2582_v35 = vpop.permute.xlu1 %2581 }
 0x341   : > { %v2580_v5 = vpop.permute.xlu0 %2579 }
 0x342   : > { %v6027_v43 = vpop.permute.xlu1 %2577  ;;  %2767 = vrot.lane.b32.xlu0 %v2580_v5, %s4455_s28  ;;  %v4233_v5 = vld [vmem:[%s6956_s4] ss:$0 sm:$0xff] }
 0x343   : > { %7281 = vst [vmem:[#allocation50_spill] sm:$0xff] %v6027_v43  ;;  %2765 = vrot.lane.b32.xlu1 %v6027_v43, %s4455_s28  ;;  %v7287_v43 = vmax.f32 %v5631_v51, 0.0 }
 0x346   : > { %v2522_v15 = vpop.permute.xlu1 %2521  ;;  %4442 = vrot.lane.b32.xlu0 %v7282_v54, %s4455_s28  ;;  %v2712_v45 = vpop.permute.xlu0 %2711  ;;  %v2809_v54 = vsel %vm7288_vm1, %v5907_v37, %v7287_v43  ;;  %v2811_v37 = vsel %vm7296_vm4, %v5916_v31, %v7295_v49  ;;  %v2813_v31 = vsel %vm7288_vm1, %v5923_v14, %v7302_v3  ;;  %vm7303_vm4 = vmmov %vm7291_vm2 }
 0x347   : > { %2769 = vrot.lane.b32.xlu1 %v2582_v35, %s4455_s28  ;;  %v2839_v22 = vsel %vm7285_vm3, %v2807_v50, %v2712_v45  ;;  %vm7292_vm3 = vmmov %vm7291_vm2 }
 0x348   : > { %4362 = vmatprep.mubr.msk.f32.mxu1 %vm7286_vm5, %v2839_v22  ;;  %v7294_v22 = vmax.f32 %v5641_v0, 0.0 }
 0x34a   : > { %v2714_v41 = vpop.permute.xlu1 %2713  ;;  %v2716_v20 = vpop.permute.xlu0 %2715  ;;  %v2810_v43 = vsel %vm7288_vm1, %v2522_v15, %v7294_v22 }
 0x34b   : > { %v2840_v35 = vsel %vm7291_vm2, %v2808_v55, %v2714_v41  ;;  %v2841_v45 = vsel %vm7292_vm3, %v2809_v54, %v2716_v20  ;;  %3203 = vrot.lane.b32.xlu1 %v4233_v5, %s4456_s29  ;;  %vm7297_vm3 = vmmov %vm7291_vm2  ;;  %v7300_v54 = vmax.f32 %v5662_v17, 0.0  ;;  %v7305_v17 = vmax.f32 %v5680_v8, 0.0 }
 0x34c   : > { %4363 = vmatmul.mubr.msk.f32.vlgmr.msra.gmra.mrb[0].mxu1 %vm7286_vm5, %v2840_v35  ;;  %vm7299_vm5 = vmmov %vm7298_vm0  ;;  %v7313_v8 = vmax.f32 %v5698_v57, 0.0  ;;  %v7319_v57 = vmax.f32 %v5716_v21, 0.0  ;;  %v7326_v21 = vmax.f32 %v5734_v16, 0.0  ;;  %v7333_v16 = vmax.f32 %v5752_v47, 0.0 }
 0x34d   : > { %4365 = vmatprep.mubr.msk.f32.mxu1 %vm7293_vm6, %v2841_v45  ;;  %vm7301_vm6 = vmmov %vm7288_vm1  ;;  %v7339_v47 = vmax.f32 %v5770_v39, 0.0  ;;  %v7347_v39 = vmax.f32 %v5788_v38, 0.0  ;;  %v7352_v38 = vmax.f32 %v5806_v53, 0.0  ;;  %v7360_v53 = vmax.f32 %v5824_v52, 0.0 }
 0x34e   : > { %v2812_v15 = vsel %vm7301_vm6, %v5925_v30, %v7300_v54  ;;  %vm7308_vm6 = vmmov %vm7288_vm1  ;;  %v7366_v52 = vmax.f32 %v5842_v26, 0.0  ;;  %v7373_v26 = vmax.f32 %v5860_v27, 0.0 }
 0x34f   : > { %v2720_v51 = vpop.permute.xlu0 %2719  ;;  %v2815_v14 = vsel %vm7308_vm6, %v5931_v12, %v7307_v23 }
 0x350   : > { %v2718_v2 = vpop.permute.xlu1 %2717  ;;  %v2843_v20 = vsel %vm7297_vm3, %v2811_v37, %v2720_v51  ;;  %vm7304_vm3 = vmmov %vm7298_vm0 }
 0x351   : > { %v2842_v50 = vsel %vm7291_vm2, %v2810_v43, %v2718_v2 }
 0x352   : > { %4366 = vmatmul.mubr.msk.f32.gmra.mrb[2].mxu1 %vm7298_vm0, %v2842_v50 }
 0x353   : > { %4368 = vmatprep.mubr.msk.f32.mxu1 %vm7299_vm5, %v2843_v20  ;;  %vm7306_vm5 = vmmov %vm7288_vm1 }
 0x354   : > { %v2814_v30 = vsel %vm7306_vm5, %v5933_v24, %v7305_v17  ;;  %vm7309_vm1 = vmmov %vm7291_vm2 }
 0x355   : > { %vm7317_vm6 = vmmov %vm7309_vm1 }
 0x357   : > { %v2724_v5 = vpop.permute.xlu0 %2723 }
 0x358   : > { %v2722_v0 = vpop.permute.xlu1 %2721  ;;  %v2845_v41 = vsel %vm7291_vm2, %v2813_v31, %v2724_v5  ;;  %vm7311_vm2 = vmmov %vm7298_vm0 }
 0x359   : > { %v2844_v55 = vsel %vm7303_vm4, %v2812_v15, %v2722_v0  ;;  %vm7310_vm4 = vmmov %vm7309_vm1 }
 0x35a   : > { %4369 = vmatmul.mubr.msk.f32.gmra.mrb[4].mxu1 %vm7304_vm3, %v2844_v55  ;;  %vm7312_vm3 = vmmov %vm7298_vm0 }
 0x35b   : > { %4371 = vmatprep.mubr.msk.f32.mxu1 %vm7298_vm0, %v2845_v41  ;;  %vm7314_vm0 = vmmov %vm7306_vm5 }
 0x35c   : > { %v2816_v24 = vsel %vm7314_vm0, %v5941_v1, %v7313_v8  ;;  %vm7316_vm5 = vmmov %vm7314_vm0 }
 0x35d   : > { %v2817_v12 = vsel %vm7316_vm5, %v5939_v6, %v7315_v11  ;;  %v2819_v6 = vsel %vm7314_vm0, %v5947_v34, %v7321_v32  ;;  %vm7322_vm5 = vmmov %vm7309_vm1 }
 0x35f   : > { %v2728_v35 = vpop.permute.xlu0 %2727 }
 0x360   : > { %v2726_v45 = vpop.permute.xlu1 %2725  ;;  %v2847_v22 = vsel %vm7310_vm4, %v2815_v14, %v2728_v35  ;;  %vm7318_vm4 = vmmov %vm7311_vm2 }
 0x361   : > { %v2846_v51 = vsel %vm7309_vm1, %v2814_v30, %v2726_v45 }
 0x362   : > { %4372 = vmatmul.mubr.msk.f32.gmra.mrb[6].mxu1 %vm7311_vm2, %v2846_v51 }
 0x363   : > { %4374 = vmatprep.mubr.msk.f32.mxu1 %vm7312_vm3, %v2847_v22  ;;  %vm7320_vm3 = vmmov %vm7314_vm0 }
 0x364   : > { %v2818_v1 = vsel %vm7320_vm3, %v5949_v60, %v7319_v57  ;;  %vm7329_vm3 = vmmov %vm7314_vm0 }
 0x365   : > { %v2821_v34 = vsel %vm7329_vm3, %v5955_v18, %v7328_v62 }
 0x367   : > { %v2732_v43 = vpop.permute.xlu0 %2731 }
 0x368   : > { %v2730_v2 = vpop.permute.xlu1 %2729  ;;  %v2849_v37 = vsel %vm7309_vm1, %v2817_v12, %v2732_v43 }
 0x369   : > { %v2848_v49 = vsel %vm7317_vm6, %v2816_v24, %v2730_v2  ;;  %vm7323_vm6 = vmmov %vm7309_vm1 }
 0x36a   : > { %4375 = vmatmul.mubr.msk.f32.gmra.mrb[8].mxu1 %vm7318_vm4, %v2848_v49  ;;  %vm7324_vm1 = vmmov %vm7311_vm2 }
 0x36b   : > { %4377 = vmatprep.mubr.msk.f32.mxu1 %vm7311_vm2, %v2849_v37  ;;  %vm7325_vm4 = vmmov %vm7324_vm1 }
 0x36c   : > { %vm7327_vm2 = vmmov %vm7314_vm0 }
 0x36d   : > { %v2820_v60 = vsel %vm7327_vm2, %v5957_v9, %v7326_v21  ;;  %vm7330_vm0 = vmmov %vm7322_vm5  ;;  %v2823_v18 = vsel %vm7327_vm2, %v5963_v61, %v7335_v56  ;;  %v7377_v21 = vld [vmem:[#allocation48_spill] sm:$0xff] }
 0x36e   : > { %vm7336_vm3 = vmmov %vm7330_vm0 }
 0x36f   : > { %v2736_v50 = vpop.permute.xlu0 %2735 }
 0x370   : > { %v2734_v20 = vpop.permute.xlu1 %2733  ;;  %v2851_v54 = vsel %vm7323_vm6, %v2819_v6, %v2736_v50  ;;  %vm7332_vm6 = vmmov %vm7324_vm1 }
 0x371   : > { %v2850_v5 = vsel %vm7322_vm5, %v2818_v1, %v2734_v20  ;;  %vm7331_vm5 = vmmov %vm7330_vm0 }
 0x372   : > { %4378 = vmatmul.mubr.msk.f32.gmra.mrb[10].mxu1 %vm7324_vm1, %v2850_v5 }
 0x373   : > { %4380 = vmatprep.mubr.msk.f32.mxu1 %vm7325_vm4, %v2851_v54  ;;  %vm7334_vm4 = vmmov %vm7327_vm2 }
 0x374   : > { %v2822_v9 = vsel %vm7334_vm4, %v5965_v44, %v7333_v16  ;;  %v7386_v16 = vld [vmem:[#allocation73_spill] sm:$0xff] }
 0x377   : > { %v2740_v15 = vpop.permute.xlu0 %2739 }
 0x378   : > { %v2738_v0 = vpop.permute.xlu1 %2737  ;;  %v2853_v31 = vsel %vm7331_vm5, %v2821_v34, %v2740_v15  ;;  %vm7337_vm5 = vmmov %vm7324_vm1  ;;  %v7375_v15 = vld [vmem:[#allocation46_spill] sm:$0xff]  ;;  %v7382_v34 = vld [vmem:[#allocation51_spill] sm:$0xff] }
 0x379   : > { %v2852_v3 = vsel %vm7330_vm0, %v2820_v60, %v2738_v0  ;;  %v7376_v48 = vmax.f32 %v7375_v15, 0.0  ;;  %v7383_v27 = vmax.f32 %v7382_v34, 0.0 }
 0x37a   : > { %4381 = vmatmul.mubr.msk.f32.gmra.mrb[12].mxu1 %vm7332_vm6, %v2852_v3  ;;  %vm7338_vm6 = vmmov %vm7324_vm1  ;;  %v7384_v3 = vld [vmem:[#allocation54_spill] sm:$0xff] }
 0x37b   : > { %4383 = vmatprep.mubr.msk.f32.mxu1 %vm7324_vm1, %v2853_v31  ;;  %vm7340_vm1 = vmmov %vm7327_vm2 }
 0x37c   : > { %v2824_v44 = vsel %vm7340_vm1, %v5973_v63, %v7339_v47  ;;  %vm7342_vm4 = vmmov %vm7340_vm1 }
 0x37d   : > { %v2825_v61 = vsel %vm7342_vm4, %v5971_v10, %v7341_v46  ;;  %vm7343_vm2 = vmmov %vm7330_vm0  ;;  %v2827_v10 = vsel %vm7340_vm1, %v5979_v59, %v7349_v7 }
 0x37e   : > { %vm7350_vm4 = vmmov %vm7343_vm2 }
 0x37f   : > { %v2744_v55 = vpop.permute.xlu0 %2743 }
 0x380   : > { %v2742_v41 = vpop.permute.xlu1 %2741  ;;  %v2855_v17 = vsel %vm7330_vm0, %v2823_v18, %v2744_v55 }
 0x381   : > { %v2854_v35 = vsel %vm7336_vm3, %v2822_v9, %v2742_v41  ;;  %vm7344_vm3 = vmmov %vm7330_vm0  ;;  %v7387_v9 = vmax.f32 %v7386_v16, 0.0  ;;  %v7388_v41 = vld [vmem:[#allocation75_spill] sm:$0xff]  ;;  %v7438_v16 = vld [vmem:[#allocation52_spill] sm:$0xff] }
 0x382   : > { %4384 = vmatmul.mubr.msk.f32.gmra.mrb[14].mxu1 %vm7337_vm5, %v2854_v35  ;;  %vm7345_vm0 = vmmov %vm7337_vm5 }
 0x383   : > { %4386 = vmatprep.mubr.msk.f32.mxu1 %vm7338_vm6, %v2855_v17  ;;  %vm7346_vm5 = vmmov %vm7345_vm0 }
 0x384   : > { %vm7348_vm6 = vmmov %vm7340_vm1 }
 0x385   : > { %v2826_v63 = vsel %vm7348_vm6, %v5981_v29, %v7347_v39  ;;  %vm7355_vm6 = vmmov %vm7340_vm1  ;;  %v7399_v39 = vld [vmem:[#allocation35_spill] sm:$0xff] }
 0x386   : > { %v2829_v59 = vsel %vm7355_vm6, %v5987_v40, %v7354_v28 }
 0x387   : > { %v2748_v30 = vpop.permute.xlu0 %2747 }
 0x388   : > { %v2746_v45 = vpop.permute.xlu1 %2745  ;;  %v2857_v14 = vsel %vm7344_vm3, %v2825_v61, %v2748_v30  ;;  %vm7351_vm3 = vmmov %vm7345_vm0  ;;  %v7393_v30 = vld [vmem:[#allocation76_spill] sm:$0xff] }
 0x389   : > { %v2856_v23 = vsel %vm7343_vm2, %v2824_v44, %v2746_v45  ;;  %v7394_v47 = vmax.f32 %v7393_v30, 0.0  ;;  %v7395_v44 = vld [vmem:[#allocation50_spill] sm:$0xff] }
 0x38a   : > { %4387 = vmatmul.mubr.msk.f32.gmra.mrb[16].mxu1 %vm7345_vm0, %v2856_v23 }
 0x38b   : > { %4389 = vmatprep.mubr.msk.f32.mxu1 %vm7346_vm5, %v2857_v14  ;;  %vm7353_vm5 = vmmov %vm7340_vm1 }
 0x38c   : > { %v2828_v29 = vsel %vm7353_vm5, %v5989_v33, %v7352_v38  ;;  %vm7356_vm1 = vmmov %vm7343_vm2 }
 0x38d   : > { %vm7364_vm6 = vmmov %vm7356_vm1 }
 0x38f   : > { %v2752_v51 = vpop.permute.xlu0 %2751 }
 0x390   : > { %v2750_v22 = vpop.permute.xlu1 %2749  ;;  %v2859_v8 = vsel %vm7343_vm2, %v2827_v10, %v2752_v51  ;;  %vm7358_vm2 = vmmov %vm7345_vm0 }
 0x391   : > { %v2858_v43 = vsel %vm7350_vm4, %v2826_v63, %v2750_v22  ;;  %vm7357_vm4 = vmmov %vm7356_vm1 }
 0x392   : > { %4390 = vmatmul.mubr.msk.f32.gmra.mrb[18].mxu1 %vm7351_vm3, %v2858_v43  ;;  %vm7359_vm3 = vmmov %vm7345_vm0 }
 0x393   : > { %4392 = vmatprep.mubr.msk.f32.mxu1 %vm7345_vm0, %v2859_v8  ;;  %vm7361_vm0 = vmmov %vm7353_vm5 }
 0x394   : > { %v2830_v33 = vsel %vm7361_vm0, %v5997_v19, %v7360_v53  ;;  %vm7363_vm5 = vmmov %vm7361_vm0  ;;  %v7427_v53 = vld [vmem:[#allocation45_spill] sm:$0xff] }
 0x395   : > { %v2831_v40 = vsel %vm7363_vm5, %v5995_v4, %v7362_v58  ;;  %v2833_v4 = vsel %vm7361_vm0, %v6003_v42, %v7368_v25  ;;  %vm7369_vm5 = vmmov %vm7356_vm1 }
 0x397   : > { %v2756_v24 = vpop.permute.xlu0 %2755 }
 0x398   : > { %v2754_v2 = vpop.permute.xlu1 %2753  ;;  %v2861_v12 = vsel %vm7357_vm4, %v2829_v59, %v2756_v24  ;;  %vm7365_vm4 = vmmov %vm7358_vm2 }
 0x399   : > { %v2860_v11 = vsel %vm7356_vm1, %v2828_v29, %v2754_v2 }
 0x39a   : > { %4393 = vmatmul.mubr.msk.f32.gmra.mrb[20].mxu1 %vm7358_vm2, %v2860_v11 }
 0x39b   : > { %4395 = vmatprep.mubr.msk.f32.mxu1 %vm7359_vm3, %v2861_v12  ;;  %vm7367_vm3 = vmmov %vm7361_vm0 }
 0x39c   : > { %v2832_v19 = vsel %vm7367_vm3, %v6005_v13, %v7366_v52  ;;  %vm7378_vm3 = vmmov %vm7361_vm0 }
 0x39d   : > { %v2835_v42 = vsel %vm7378_vm3, %v7377_v21, %v7376_v48 }
 0x39f   : > { %v2760_v49 = vpop.permute.xlu0 %2759 }
 0x3a0   : > { %v2758_v37 = vpop.permute.xlu1 %2757  ;;  %v2863_v57 = vsel %vm7356_vm1, %v2831_v40, %v2760_v49 }
 0x3a1   : > { %v2862_v50 = vsel %vm7364_vm6, %v2830_v33, %v2758_v37  ;;  %vm7370_vm6 = vmmov %vm7356_vm1 }
 0x3a2   : > { %4396 = vmatmul.mubr.msk.f32.gmra.mrb[22].mxu1 %vm7365_vm4, %v2862_v50  ;;  %vm7371_vm1 = vmmov %vm7358_vm2 }
 0x3a3   : > { %4398 = vmatprep.mubr.msk.f32.mxu1 %vm7358_vm2, %v2863_v57  ;;  %vm7372_vm4 = vmmov %vm7371_vm1 }
 0x3a4   : > { %vm7374_vm2 = vmmov %vm7361_vm0 }
 0x3a5   : > { %v2834_v13 = vsel %vm7374_vm2, %v6013_v36, %v7373_v26  ;;  %vm7379_vm0 = vmmov %vm7369_vm5  ;;  %v2837_v56 = vsel %vm7374_vm2, %v7388_v41, %v7387_v9 }
 0x3a6   : > { %vm7389_vm3 = vmmov %vm7379_vm0 }
 0x3a7   : > { %v2764_v1 = vpop.permute.xlu0 %2763 }
 0x3a8   : > { %v2762_v20 = vpop.permute.xlu1 %2761  ;;  %v2865_v6 = vsel %vm7370_vm6, %v2833_v4, %v2764_v1  ;;  %vm7381_vm6 = vmmov %vm7371_vm1 }
 0x3a9   : > { %v2864_v32 = vsel %vm7369_vm5, %v2832_v19, %v2762_v20  ;;  %vm7380_vm5 = vmmov %vm7379_vm0 }
 0x3aa   : > { %4399 = vmatmul.mubr.msk.f32.gmra.mrb[24].mxu1 %vm7371_vm1, %v2864_v32 }
 0x3ab   : > { %4401 = vmatprep.mubr.msk.f32.mxu1 %vm7372_vm4, %v2865_v6  ;;  %vm7385_vm4 = vmmov %vm7374_vm2 }
 0x3ac   : > { %v2836_v36 = vsel %vm7385_vm4, %v7384_v3, %v7383_v27  ;;  %vm7397_vm4 = vmmov %vm7389_vm3 }
 0x3b4   : > { %v2768_v5 = vpop.permute.xlu0 %2767 }
 0x3b5   : > { %v2766_v54 = vpop.permute.xlu1 %2765  ;;  %v2867_v0 = vsel %vm7380_vm5, %v2835_v42, %v2768_v5  ;;  %vm7391_vm5 = vmmov %vm7389_vm3 }
 0x3b6   : > { %v2866_v60 = vsel %vm7379_vm0, %v2834_v13, %v2766_v54  ;;  %vm7390_vm0 = vmmov %vm7371_vm1 }
 0x3b7   : > { %4402 = vmatmul.mubr.msk.f32.gmra.mrb[26].mxu1 %vm7381_vm6, %v2866_v60  ;;  %vm7392_vm6 = vmmov %vm7390_vm0 }
 0x3b8   : > { %4404 = vmatprep.mubr.msk.f32.mxu1 %vm7371_vm1, %v2867_v0  ;;  %v4443_v62 = vpop.permute.xlu0 %4442  ;;  %vm7396_vm1 = vmmov %vm7374_vm2  ;;  %vm7400_vm2 = vcmp.lt.s32.totalorder %v7399_v39, 1 }
 0x3b9   : > { %v4444_v31 = vunpack.i.l.bf16 %v4443_v62  ;;  %v2770_v55 = vpop.permute.xlu1 %2769  ;;  %v4445_v18 = vunpack.i.h.bf16 %v4443_v62  ;;  %v2838_v45 = vsel %vm7396_vm1, %v7395_v44, %v7394_v47  ;;  %vm7398_vm15 = vmmov %vm7390_vm0 }
 0x3ba   : > { %v2868_v35 = vsel %vm7389_vm3, %v2836_v36, %v2770_v55  ;;  %vm7402_vm3 = vmmov %vm7400_vm2 }
 0x3bb   : > { %4405 = vmatmul.mubr.msk.f32.gmra.mrb[28].mxu1 %vm7390_vm0, %v2868_v35  ;;  %v2869_v17 = vsel %vm7391_vm5, %v2837_v56, %v4444_v31  ;;  %v2870_v46 = vsel %vm7397_vm4, %v2838_v45, %v4445_v18  ;;  %vm7405_vm0 = vmmov %vm7400_vm2 }
 0x3bc   : > { %4407 = vmatprep.mubr.msk.f32.mxu1 %vm7392_vm6, %v2869_v17  ;;  %vm7408_vm5 = vmmov %vm7405_vm0 }
 0x3bd   : > { %vm7411_vm6 = vmmov %vm7405_vm0  ;;  %v6469_v47 = vpop.permute.xlu1 %3203 }
 0x3be   : > { %vm7414_vm1 = vmmov %vm7405_vm0 }
 0x3bf   : > { %4408 = vmatmul.mubr.msk.f32.gmra.mrb[30].mxu1 %vm7398_vm15, %v2870_v46  ;;  %vm7401_vm15 = vmmov %vm7400_vm2 }
 0x3c0   : > { %vm7417_vm4 = vmmov %vm7405_vm0 }
 0x41f   : > { %v6228_v61 = vpop.f32.mrb[0].mxu1 }
 0x420   : > { %v3239_v23 = vrot.slane %v6228_v61, 7  ;;  %3528 = vrot.lane.b32.xlu1 %v6228_v61, %s4458_s7  ;;  %v6233_v14 = vpop.f32.mrb[1].mxu1 }
 0x421   : > { %v3238_v51 = vrot.slane %v6233_v14, 7  ;;  %3526 = vrot.lane.b32.xlu0 %v6233_v14, %s4458_s7 }
 0x423   : > { %v3300_v63 = vsel %vm7400_vm2, %v3238_v51, %v3239_v23 }
 0x424   : > { %3368 = vrot.lane.b32.xlu1 %v3300_v63, %s4456_s29 }
 0x425   : > { %v6243_v22 = vpop.f32.mrb[2].mxu1 }
 0x426   : > { %v3241_v7 = vrot.slane %v6243_v22, 7  ;;  %v6246_v10 = vpop.f32.mrb[3].mxu1 }
 0x427   : > { %v3240_v43 = vrot.slane %v6246_v10, 7  ;;  %3530 = vrot.lane.b32.xlu0 %v6246_v10, %s4458_s7 }
 0x428   : > { %3532 = vrot.lane.b32.xlu1 %v6243_v22, %s4458_s7 }
 0x429   : > { %v3299_v8 = vsel %vm7401_vm15, %v3239_v23, %v3240_v43  ;;  %v3298_v24 = vsel %vm7402_vm3, %v3240_v43, %v3241_v7  ;;  %vm7423_vm15 = vmmov %vm7405_vm0 }
 0x42a   : > { %v3304_v29 = vsel %vm5006_vm7, %v3299_v8, 0.0  ;;  %vm7404_vm7 = vmmov %vm7400_vm2  ;;  %v7442_v8 = vld [vmem:[#allocation55_spill] sm:$0xff] }
 0x42b   : > { %3370 = vrot.lane.b32.xlu0 %v3304_v29, %s4456_s29  ;;  %vm7420_vm2 = vmmov %vm7405_vm0 }
 0x42c   : > { %3372 = vrot.lane.b32.xlu1 %v3298_v24, %s4456_s29  ;;  %vm7426_vm3 = vmmov %vm7405_vm0 }
 0x42d   : > { %v6261_v2 = vpop.f32.mrb[4].mxu1 }
 0x42e   : > { %v3243_v28 = vrot.slane %v6261_v2, 7  ;;  %v6264_v59 = vpop.f32.mrb[5].mxu1 }
 0x42f   : > { %v3242_v11 = vrot.slane %v6264_v59, 7  ;;  %3534 = vrot.lane.b32.xlu0 %v6264_v59, %s4458_s7 }
 0x430   : > { %3536 = vrot.lane.b32.xlu1 %v6261_v2, %s4458_s7 }
 0x431   : > { %v3297_v12 = vsel %vm7404_vm7, %v3241_v7, %v3242_v11  ;;  %v3296_v49 = vsel %vm7405_vm0, %v3242_v11, %v3243_v28  ;;  %vm7428_vm7 = vnez %v7427_v53 }
 0x432   : > { %v3306_v33 = vsel %vm5025_vm8, %v3297_v12, 0.0  ;;  %vm7407_vm8 = vmmov %vm7405_vm0 }
 0x433   : > { %3374 = vrot.lane.b32.xlu0 %v3306_v33, %s4456_s29 }
 0x434   : > { %3376 = vrot.lane.b32.xlu1 %v3296_v49, %s4456_s29 }
 0x435   : > { %v6279_v37 = vpop.f32.mrb[6].mxu1 }
 0x436   : > { %v3245_v58 = vrot.slane %v6279_v37, 7  ;;  %v6282_v40 = vpop.f32.mrb[7].mxu1 }
 0x437   : > { %v3244_v50 = vrot.slane %v6282_v40, 7  ;;  %3538 = vrot.lane.b32.xlu0 %v6282_v40, %s4458_s7 }
 0x438   : > { %3540 = vrot.lane.b32.xlu1 %v6279_v37, %s4458_s7 }
 0x439   : > { %v3295_v57 = vsel %vm7407_vm8, %v3243_v28, %v3244_v50  ;;  %v3294_v1 = vsel %vm7408_vm5, %v3244_v50, %v3245_v58  ;;  %vm7429_vm8 = vmmov %vm7405_vm0 }
 0x43a   : > { %v3308_v19 = vsel %vm5048_vm9, %v3295_v57, 0.0  ;;  %vm7410_vm9 = vmmov %vm7405_vm0 }
 0x43b   : > { %3378 = vrot.lane.b32.xlu0 %v3308_v19, %s4456_s29 }
 0x43c   : > { %3380 = vrot.lane.b32.xlu1 %v3294_v1, %s4456_s29 }
 0x43d   : > { %v6297_v20 = vpop.f32.mrb[8].mxu1 }
 0x43e   : > { %v3247_v25 = vrot.slane %v6297_v20, 7  ;;  %v6300_v4 = vpop.f32.mrb[9].mxu1 }
 0x43f   : > { %v3246_v32 = vrot.slane %v6300_v4, 7  ;;  %3542 = vrot.lane.b32.xlu0 %v6300_v4, %s4458_s7 }
 0x440   : > { %3544 = vrot.lane.b32.xlu1 %v6297_v20, %s4458_s7 }
 0x441   : > { %v3293_v6 = vsel %vm7410_vm9, %v3245_v58, %v3246_v32  ;;  %v3292_v5 = vsel %vm7411_vm6, %v3246_v32, %v3247_v25  ;;  %vm7432_vm9 = vmmov %vm7405_vm0 }
 0x442   : > { %v3310_v13 = vsel %vm5071_vm10, %v3293_v6, 0.0  ;;  %vm7413_vm10 = vmmov %vm7405_vm0 }
 0x443   : > { %3382 = vrot.lane.b32.xlu0 %v3310_v13, %s4456_s29  ;;  %vm7433_vm6 = vmmov %vm7405_vm0 }
 0x444   : > { %3384 = vrot.lane.b32.xlu1 %v3292_v5, %s4456_s29 }
 0x445   : > { %v6315_v54 = vpop.f32.mrb[10].mxu1 }
 0x446   : > { %v3249_v15 = vrot.slane %v6315_v54, 7  ;;  %v6318_v48 = vpop.f32.mrb[11].mxu1 }
 0x447   : > { %v3248_v21 = vrot.slane %v6318_v48, 7  ;;  %3546 = vrot.lane.b32.xlu0 %v6318_v48, %s4458_s7 }
 0x448   : > { %3548 = vrot.lane.b32.xlu1 %v6315_v54, %s4458_s7 }
 0x449   : > { %v3291_v42 = vsel %vm7413_vm10, %v3247_v25, %v3248_v21  ;;  %v3290_v60 = vsel %vm7414_vm1, %v3248_v21, %v3249_v15  ;;  %v7430_v25 = vld [vmem:[#allocation47_spill] sm:$0xff]  ;;  %vm7436_vm1 = vmmov %vm7405_vm0 }
 0x44a   : > { %v3312_v62 = vsel %vm5094_vm11, %v3291_v42, 0.0  ;;  %vm7416_vm11 = vmmov %vm7405_vm0  ;;  %vm7431_vm5 = vnez %v7430_v25  ;;  %v7434_v42 = vld [vmem:[#allocation49_spill] sm:$0xff] }
 0x44b   : > { %3386 = vrot.lane.b32.xlu0 %v3312_v62, %s4456_s29  ;;  %vm7435_vm10 = vnez %v7434_v42 }
 0x44c   : > { %3388 = vrot.lane.b32.xlu1 %v3290_v60, %s4456_s29 }
 0x44d   : > { %v6333_v34 = vpop.f32.mrb[12].mxu1 }
 0x44e   : > { %v3251_v27 = vrot.slane %v6333_v34, 7  ;;  %v6336_v3 = vpop.f32.mrb[13].mxu1 }
 0x44f   : > { %v3250_v36 = vrot.slane %v6336_v3, 7  ;;  %3550 = vrot.lane.b32.xlu0 %v6336_v3, %s4458_s7 }
 0x450   : > { %3552 = vrot.lane.b32.xlu1 %v6333_v34, %s4458_s7 }
 0x451   : > { %v3289_v31 = vsel %vm7416_vm11, %v3249_v15, %v3250_v36  ;;  %v3288_v55 = vsel %vm7417_vm4, %v3250_v36, %v3251_v27  ;;  %vm7437_vm11 = vmmov %vm7405_vm0  ;;  %vm7439_vm4 = vnez %v7438_v16 }
 0x452   : > { %v3314_v9 = vsel %vm5117_vm12, %v3289_v31, 0.0  ;;  %vm7419_vm12 = vmmov %vm7405_vm0 }
 0x453   : > { %3390 = vrot.lane.b32.xlu0 %v3314_v9, %s4456_s29 }
 0x454   : > { %3392 = vrot.lane.b32.xlu1 %v3288_v55, %s4456_s29 }
 0x455   : > { %v6351_v41 = vpop.f32.mrb[14].mxu1 }
 0x456   : > { %v3253_v56 = vrot.slane %v6351_v41, 7  ;;  %v6354_v18 = vpop.f32.mrb[15].mxu1 }
 0x457   : > { %v3252_v35 = vrot.slane %v6354_v18, 7  ;;  %3554 = vrot.lane.b32.xlu0 %v6354_v18, %s4458_s7 }
 0x458   : > { %3556 = vrot.lane.b32.xlu1 %v6351_v41, %s4458_s7 }
 0x459   : > { %v3287_v17 = vsel %vm7419_vm12, %v3251_v27, %v3252_v35  ;;  %v3286_v30 = vsel %vm7420_vm2, %v3252_v35, %v3253_v56  ;;  %vm7440_vm12 = vmmov %vm7405_vm0 }
 0x45a   : > { %v3316_v44 = vsel %vm5140_vm13, %v3287_v17, 0.0  ;;  %vm7422_vm13 = vmmov %vm7405_vm0 }
 0x45b   : > { %3394 = vrot.lane.b32.xlu0 %v3316_v44, %s4456_s29  ;;  %vm7441_vm2 = vmmov %vm7405_vm0 }
 0x45c   : > { %3396 = vrot.lane.b32.xlu1 %v3286_v30, %s4456_s29 }
 0x45d   : > { %v6369_v45 = vpop.f32.mrb[16].mxu1 }
 0x45e   : > { %v3255_v46 = vrot.slane %v6369_v45, 7  ;;  %v6372_v23 = vpop.f32.mrb[17].mxu1 }
 0x45f   : > { %v3254_v63 = vrot.slane %v6372_v23, 7  ;;  %3558 = vrot.lane.b32.xlu0 %v6372_v23, %s4458_s7 }
 0x460   : > { %3560 = vrot.lane.b32.xlu1 %v6369_v45, %s4458_s7 }
 0x461   : > { %v3285_v7 = vsel %vm7422_vm13, %v3253_v56, %v3254_v63  ;;  %v3284_v43 = vsel %vm7423_vm15, %v3254_v63, %v3255_v46  ;;  %vm7443_vm13 = vnez %v7442_v8  ;;  %vm7444_vm15 = vmmov %vm7405_vm0 }
 0x462   : > { %v3318_v24 = vsel %vm5163_vm14, %v3285_v7, 0.0  ;;  %vm7425_vm14 = vmmov %vm7405_vm0 }
 0x463   : > { %3398 = vrot.lane.b32.xlu0 %v3318_v24, %s4456_s29 }
 0x464   : > { %3400 = vrot.lane.b32.xlu1 %v3284_v43, %s4456_s29 }
 0x465   : > { %v6387_v38 = vpop.f32.mrb[18].mxu1 }
 0x466   : > { %v3257_v29 = vrot.slane %v6387_v38, 7  ;;  %v6390_v28 = vpop.f32.mrb[19].mxu1 }
 0x467   : > { %v3256_v11 = vrot.slane %v6390_v28, 7  ;;  %3562 = vrot.lane.b32.xlu0 %v6390_v28, %s4458_s7 }
 0x468   : > { %3564 = vrot.lane.b32.xlu1 %v6387_v38, %s4458_s7 }
 0x469   : > { %v3283_v12 = vsel %vm7425_vm14, %v3255_v46, %v3256_v11  ;;  %v3282_v49 = vsel %vm7426_vm3, %v3256_v11, %v3257_v29  ;;  %vm7445_vm14 = vmmov %vm7405_vm0 }
 0x46a   : > { %v3320_v33 = vsel %vm7428_vm7, %v3283_v12, 0.0  ;;  %vm7446_vm3 = vmmov %vm7405_vm0 }
 0x46b   : > { %3402 = vrot.lane.b32.xlu0 %v3320_v33, %s4456_s29  ;;  %vm7447_vm7 = vmmov %vm7405_vm0 }
 0x46c   : > { %3404 = vrot.lane.b32.xlu1 %v3282_v49, %s4456_s29 }
 0x46d   : > { %v6405_v58 = vpop.f32.mrb[20].mxu1 }
 0x46e   : > { %v3259_v50 = vrot.slane %v6405_v58, 7  ;;  %v6408_v57 = vpop.f32.mrb[21].mxu1 }
 0x46f   : > { %v3258_v1 = vrot.slane %v6408_v57, 7  ;;  %3566 = vrot.lane.b32.xlu0 %v6408_v57, %s4458_s7 }
 0x470   : > { %3568 = vrot.lane.b32.xlu1 %v6405_v58, %s4458_s7 }
 0x471   : > { %v3281_v52 = vsel %vm7405_vm0, %v3257_v29, %v3258_v1  ;;  %v3280_v19 = vsel %vm7429_vm8, %v3258_v1, %v3259_v50  ;;  %vm7450_vm8 = vmmov %vm7436_vm1 }
 0x472   : > { %v3322_v32 = vsel %vm7431_vm5, %v3281_v52, 0.0 }
 0x473   : > { %3406 = vrot.lane.b32.xlu0 %v3322_v32, %s4456_s29 }
 0x474   : > { %3408 = vrot.lane.b32.xlu1 %v3280_v19, %s4456_s29 }
 0x475   : > { %v6423_v6 = vpop.f32.mrb[22].mxu1 }
 0x476   : > { %v3261_v5 = vrot.slane %v6423_v6, 7  ;;  %v6426_v26 = vpop.f32.mrb[23].mxu1 }
 0x477   : > { %v3260_v13 = vrot.slane %v6426_v26, 7  ;;  %3570 = vrot.lane.b32.xlu0 %v6426_v26, %s4458_s7 }
 0x478   : > { %3572 = vrot.lane.b32.xlu1 %v6423_v6, %s4458_s7 }
 0x479   : > { %v3279_v15 = vsel %vm7432_vm9, %v3259_v50, %v3260_v13  ;;  %v3278_v21 = vsel %vm7433_vm6, %v3260_v13, %v3261_v5  ;;  %vm7453_vm9 = vcmp.lt.s32.totalorder %v7399_v39, 7  ;;  %v3206_v39 = vadd.f32 %v6469_v47, %v6233_v14 }
 0x47a   : > { %v3324_v60 = vsel %vm7435_vm10, %v3279_v15, 0.0  ;;  %v3211_v14 = vadd.f32 %v6261_v2, %v6469_v47 }
 0x47b   : > { %3410 = vrot.lane.b32.xlu0 %v3324_v60, %s4456_s29 }
 0x47c   : > { %3412 = vrot.lane.b32.xlu1 %v3278_v21, %s4456_s29 }
 0x47d   : > { %v6441_v0 = vpop.f32.mrb[24].mxu1 }
 0x47e   : > { %v3263_v62 = vrot.slane %v6441_v0, 7  ;;  %v6444_v27 = vpop.f32.mrb[25].mxu1 }
 0x47f   : > { %v3262_v36 = vrot.slane %v6444_v27, 7  ;;  %3574 = vrot.lane.b32.xlu0 %v6444_v27, %s4458_s7 }
 0x480   : > { %3576 = vrot.lane.b32.xlu1 %v6441_v0, %s4458_s7 }
 0x481   : > { %v3277_v31 = vsel %vm7436_vm1, %v3261_v5, %v3262_v36  ;;  %v3276_v55 = vsel %vm7437_vm11, %v3262_v36, %v3263_v62  ;;  %v7448_v5 = vld [vmem:[#allocation56_spill] sm:$0xff]  ;;  %vm7458_vm1 = vmmov %vm7453_vm9 }
 0x482   : > { %v3326_v9 = vsel %vm7439_vm4, %v3277_v31, 0.0  ;;  %vm7449_vm0 = vnez %v7448_v5  ;;  %vm7461_vm4 = vmmov %vm7458_vm1 }
 0x483   : > { %3414 = vrot.lane.b32.xlu0 %v3326_v9, %s4456_s29 }
 0x484   : > { %3416 = vrot.lane.b32.xlu1 %v3276_v55, %s4456_s29  ;;  %v7451_v55 = vld [vmem:[#allocation60_spill] sm:$0xff] }
 0x485   : > { %vm7452_vm5 = vnez %v7451_v55 }
 0x48a   : > { %v6459_v56 = vpop.f32.mrb[26].mxu1 }
 0x48b   : > { %v3265_v35 = vrot.slane %v6459_v56, 7  ;;  %3580 = vrot.lane.b32.xlu1 %v6459_v56, %s4458_s7  ;;  %v6464_v17 = vpop.f32.mrb[27].mxu1 }
 0x48c   : > { %v3264_v30 = vrot.slane %v6464_v17, 7  ;;  %3578 = vrot.lane.b32.xlu0 %v6464_v17, %s4458_s7 }
 0x48e   : > { %v6471_v44 = vpop.f32.mrb[28].mxu1  ;;  %v3274_v46 = vsel %vm7440_vm12, %v3264_v30, %v3265_v35  ;;  %v3275_v63 = vsel %vm7441_vm2, %v3263_v62, %v3264_v30  ;;  %vm7462_vm12 = vmmov %vm7458_vm1 }
 0x48f   : > { %v3267_v7 = vrot.slane %v6471_v44, 7  ;;  %3420 = vrot.lane.b32.xlu1 %v3274_v46, %s4456_s29  ;;  %v6479_v43 = vpop.f32.mrb[29].mxu1  ;;  %v3328_v24 = vsel %vm7443_vm13, %v3275_v63, 0.0  ;;  %vm7463_vm2 = vmmov %vm7458_vm1 }
 0x490   : > { %v3266_v29 = vrot.slane %v6479_v43, 7  ;;  %3418 = vrot.lane.b32.xlu0 %v3328_v24, %s4456_s29  ;;  %v7456_v24 = vld [vmem:[#allocation61_spill] sm:$0xff] }
 0x491   : > { %vm7457_vm10 = vnez %v7456_v24 }
 0x492   : > { %v3529_v11 = vpop.permute.xlu1 %3528  ;;  %v6485_v12 = vpop.f32.mrb[30].mxu1  ;;  %v3272_v49 = vsel %vm7444_vm15, %v3266_v29, %v3267_v7  ;;  %v3273_v53 = vsel %vm7445_vm14, %v3265_v35, %v3266_v29  ;;  %vm7466_vm15 = vmmov %vm7458_vm1 }
 0x493   : > { %v3269_v33 = vrot.slane %v6485_v12, 7  ;;  %3584 = vrot.lane.b32.xlu1 %v6471_v44, %s4458_s7  ;;  %v6494_v50 = vpop.f32.mrb[31].mxu1  ;;  %v6499_v52 = vpop.permute.xlu0 %3526  ;;  %v3330_v13 = vsel %vm7449_vm0, %v3273_v53, 0.0  ;;  %v3623_v62 = vrot.slane %v3529_v11, 1  ;;  %v7459_v53 = vld [vmem:[#allocation63_spill] sm:$0xff]  ;;  %vm7467_vm14 = vmmov %vm7458_vm1 }
 0x494   : > { %v3268_v1 = vrot.slane %v6494_v50, 7  ;;  %3582 = vrot.lane.b32.xlu0 %v6479_v43, %s4458_s7  ;;  %v7107_v8 = vrot.slane %v6499_v52, 1  ;;  %vm7460_vm11 = vnez %v7459_v53  ;;  %v7469_v53 = vld [vmem:[#allocation65_spill] sm:$0xff]  ;;  %vm7471_vm0 = vmmov %vm7458_vm1 }
 0x495   : > { %v3301_v60 = vsel %vm7450_vm8, %v3269_v33, %v3238_v51  ;;  %v7454_v51 = vld [vmem:[#allocation62_spill] sm:$0xff]  ;;  %vm7472_vm8 = vmmov %vm7471_vm0 }
 0x496   : > { %v6501_v19 = vpop.permute.xlu1 %3368  ;;  %v3270_v25 = vsel %vm7446_vm3, %v3268_v1, %v3269_v33  ;;  %v3271_v32 = vsel %vm7447_vm7, %v3267_v7, %v3268_v1  ;;  %v3302_v16 = vsel %vm7452_vm5, %v3301_v60, 0.0  ;;  %vm7455_vm6 = vnez %v7454_v51  ;;  %vm7468_vm3 = vmmov %vm7458_vm1 }
 0x497   : > { %3424 = vrot.lane.b32.xlu1 %v3272_v49, %s4456_s29  ;;  %v3332_v29 = vsel %vm7457_vm10, %v3271_v32, 0.0  ;;  %vm7470_vm7 = vnez %v7469_v53  ;;  %vm7473_vm5 = vmmov %vm7471_vm0 }
 0x498   : > { %3422 = vrot.lane.b32.xlu0 %v3330_v13, %s4456_s29  ;;  %vm7477_vm10 = vmmov %vm7471_vm0 }
 0x499   : > { %v3531_v15 = vpop.permute.xlu0 %3530 }
 0x49a   : > { %v3533_v21 = vpop.permute.xlu1 %3532  ;;  %v3624_v42 = vrot.slane %v3531_v15, 1 }
 0x49b   : > { %3588 = vrot.lane.b32.xlu1 %v6485_v12, %s4458_s7  ;;  %v3625_v30 = vrot.slane %v3533_v21, 1 }
 0x49c   : > { %3586 = vrot.lane.b32.xlu0 %v6494_v50, %s4458_s7  ;;  %v3683_v9 = vsel %vm7453_vm9, %v3623_v62, %v3624_v42 }
 0x49d   : > { %v6519_v36 = vpop.permute.xlu0 %3370  ;;  %v3687_v7 = vsel %vm7455_vm6, %v3683_v9, 0.0  ;;  %v3682_v21 = vsel %vm7462_vm12, %v3624_v42, %v3625_v30  ;;  %vm7476_vm6 = vmmov %vm7471_vm0 }
 0x49e   : > { %v6521_v31 = vpop.permute.xlu1 %3372 }
 0x49f   : > { %3428 = vrot.lane.b32.xlu1 %v3270_v25, %s4456_s29  ;;  %v3684_v25 = vsel %vm7461_vm4, %v7107_v8, %v3623_v62  ;;  %vm7481_vm4 = vmmov %vm7471_vm0 }
 0x4a0   : > { %3366 = vrot.lane.b32.xlu0 %v3302_v16, %s4456_s29  ;;  %v7464_v16 = vld [vmem:[#allocation64_spill] sm:$0xff] }
 0x4a1   : > { %v3535_v35 = vpop.permute.xlu0 %3534  ;;  %vm7465_vm13 = vnez %v7464_v16 }
 0x4a2   : > { %v3626_v46 = vrot.slane %v3535_v35, 1  ;;  %v3537_v63 = vpop.permute.xlu1 %3536 }
 0x4a3   : > { %3752 = vrot.lane.b32.xlu1 %v3687_v7, %s4456_s29  ;;  %v3627_v5 = vrot.slane %v3537_v63, 1 }
 0x4a4   : > { %3426 = vrot.lane.b32.xlu0 %v3332_v29, %s4456_s29  ;;  %v3681_v11 = vsel %vm7458_vm1, %v3625_v30, %v3626_v46 }
 0x4a5   : > { %v6538_v49 = vpop.permute.xlu0 %3374  ;;  %v3689_v33 = vsel %vm7460_vm11, %v3681_v11, 0.0  ;;  %v3680_v63 = vsel %vm7466_vm15, %v3626_v46, %v3627_v5  ;;  %vm7480_vm11 = vmmov %vm7471_vm0 }
 0x4a6   : > { %v6542_v1 = vpop.permute.xlu1 %3376 }
 0x4a7   : > { %3756 = vrot.lane.b32.xlu1 %v3689_v33, %s4456_s29 }
 0x4a8   : > { %3750 = vrot.lane.b32.xlu0 %v3684_v25, %s4456_s29 }
 0x4a9   : > { %v3539_v32 = vpop.permute.xlu0 %3538 }
 0x4aa   : > { %v3628_v13 = vrot.slane %v3539_v32, 1  ;;  %v3541_v15 = vpop.permute.xlu1 %3540 }
 0x4ab   : > { %v3629_v35 = vrot.slane %v3541_v15, 1 }
 0x4ac   : > { %3754 = vrot.lane.b32.xlu0 %v3682_v21, %s4456_s29  ;;  %v3679_v60 = vsel %vm7463_vm2, %v3627_v5, %v3628_v13  ;;  %vm7484_vm2 = vmmov %vm7471_vm0 }
 0x4ad   : > { %v6555_v55 = vpop.permute.xlu0 %3378  ;;  %v3691_v9 = vsel %vm7465_vm13, %v3679_v60, 0.0  ;;  %v3678_v24 = vsel %vm7467_vm14, %v3628_v13, %v3629_v35  ;;  %vm7485_vm13 = vmmov %vm7471_vm0 }
 0x4ae   : > { %v6559_v62 = vpop.permute.xlu1 %3380  ;;  %3760 = vrot.lane.b32.xlu1 %v3691_v9, %s4456_s29  ;;  %v7474_v9 = vld [vmem:[#allocation66_spill] sm:$0xff]  ;;  %vm7488_vm14 = vmmov %vm7471_vm0 }
 0x4af   : > { %vm7475_vm9 = vnez %v7474_v9 }
 0x4b0   : > { %3758 = vrot.lane.b32.xlu0 %v3680_v63, %s4456_s29 }
 0x4b1   : > { %v3543_v42 = vpop.permute.xlu0 %3542 }
 0x4b2   : > { %v3630_v30 = vrot.slane %v3543_v42, 1  ;;  %v3545_v51 = vpop.permute.xlu1 %3544 }
 0x4b3   : > { %v3631_v7 = vrot.slane %v3545_v51, 1 }
 0x4b4   : > { %3762 = vrot.lane.b32.xlu0 %v3678_v24, %s4456_s29  ;;  %v3677_v29 = vsel %vm7468_vm3, %v3629_v35, %v3630_v30  ;;  %vm7489_vm3 = vmmov %vm7471_vm0 }
 0x4b5   : > { %v6570_v11 = vpop.permute.xlu0 %3382  ;;  %v3693_v33 = vsel %vm7470_vm7, %v3677_v29, 0.0  ;;  %v3676_v25 = vsel %vm7471_vm0, %v3630_v30, %v3631_v7 }
 0x4b6   : > { %v6574_v46 = vpop.permute.xlu1 %3384  ;;  %3764 = vrot.lane.b32.xlu1 %v3693_v33, %s4456_s29  ;;  %v7478_v33 = vld [vmem:[#allocation67_spill] sm:$0xff] }
 0x4b7   : > { %vm7479_vm1 = vnez %v7478_v33 }
 0x4b8   : > { %3766 = vrot.lane.b32.xlu0 %v3676_v25, %s4456_s29 }
 0x4b9   : > { %v3547_v32 = vpop.permute.xlu0 %3546 }
 0x4ba   : > { %v3632_v5 = vrot.slane %v3547_v32, 1  ;;  %v3549_v13 = vpop.permute.xlu1 %3548 }
 0x4bb   : > { %v3633_v15 = vrot.slane %v3549_v13, 1 }
 0x4bc   : > { %v3675_v21 = vsel %vm7472_vm8, %v3631_v7, %v3632_v5  ;;  %vm7492_vm8 = vmmov %vm7471_vm0 }
 0x4bd   : > { %v6582_v60 = vpop.permute.xlu0 %3386  ;;  %v3674_v16 = vsel %vm7473_vm5, %v3632_v5, %v3633_v15  ;;  %v3695_v35 = vsel %vm7475_vm9, %v3675_v21, 0.0  ;;  %vm7495_vm9 = vmmov %vm7471_vm0 }
 0x4be   : > { %v6588_v63 = vpop.permute.xlu1 %3388  ;;  %3770 = vrot.lane.b32.xlu0 %v3674_v16, %s4456_s29  ;;  %3768 = vrot.lane.b32.xlu1 %v3695_v35, %s4456_s29  ;;  %v3221_v35 = vadd.f32 %v6351_v41, %v6469_v47  ;;  %v3222_v41 = vadd.f32 %v6469_v47, %v6372_v23 }
 0x4c1   : > { %v3551_v42 = vpop.permute.xlu0 %3550 }
 0x4c2   : > { %v3634_v30 = vrot.slane %v3551_v42, 1  ;;  %v3553_v51 = vpop.permute.xlu1 %3552 }
 0x4c3   : > { %v3635_v24 = vrot.slane %v3553_v51, 1 }
 0x4c4   : > { %v3673_v7 = vsel %vm7476_vm6, %v3633_v15, %v3634_v30  ;;  %vm7496_vm6 = vmmov %vm7471_vm0 }
 0x4c5   : > { %v6594_v29 = vpop.permute.xlu0 %3390  ;;  %v3672_v53 = vsel %vm7477_vm10, %v3634_v30, %v3635_v24  ;;  %v3697_v25 = vsel %vm7479_vm1, %v3673_v7, 0.0  ;;  %v7482_v30 = vld [vmem:[#allocation68_spill] sm:$0xff]  ;;  %vm7499_vm1 = vmmov %vm7471_vm0 }
 0x4c6   : > { %v6600_v32 = vpop.permute.xlu1 %3392  ;;  %3774 = vrot.lane.b32.xlu0 %v3672_v53, %s4456_s29  ;;  %3772 = vrot.lane.b32.xlu1 %v3697_v25, %s4456_s29  ;;  %vm7483_vm12 = vnez %v7482_v30  ;;  %v7486_v30 = vld [vmem:[#allocation69_spill] sm:$0xff] }
 0x4c7   : > { %vm7487_vm15 = vnez %v7486_v30 }
 0x4c9   : > { %v3555_v5 = vpop.permute.xlu0 %3554 }
 0x4ca   : > { %v3636_v13 = vrot.slane %v3555_v5, 1  ;;  %v3557_v21 = vpop.permute.xlu1 %3556 }
 0x4cb   : > { %v3637_v16 = vrot.slane %v3557_v21, 1 }
 0x4cc   : > { %v3671_v15 = vsel %vm7480_vm11, %v3635_v24, %v3636_v13  ;;  %vm7500_vm11 = vmmov %vm7471_vm0 }
 0x4cd   : > { %v6606_v9 = vpop.permute.xlu0 %3394  ;;  %v3670_v42 = vsel %vm7481_vm4, %v3636_v13, %v3637_v16  ;;  %v3699_v51 = vsel %vm7483_vm12, %v3671_v15, 0.0  ;;  %v3223_v15 = vadd.f32 %v6369_v45, %v6469_v47  ;;  %v3224_v45 = vadd.f32 %v6469_v47, %v6390_v28  ;;  %vm7504_vm12 = vmmov %vm7471_vm0 }
 0x4ce   : > { %v3397_v7 = vpop.permute.xlu1 %3396  ;;  %3778 = vrot.lane.b32.xlu0 %v3670_v42, %s4456_s29  ;;  %3776 = vrot.lane.b32.xlu1 %v3699_v51, %s4456_s29 }
 0x4cf   : > { %v6616_v53 = vadd.f32 %v3397_v7, %v3221_v35 }
 0x4d1   : > { %v3559_v33 = vpop.permute.xlu0 %3558 }
 0x4d2   : > { %v3638_v24 = vrot.slane %v3559_v33, 1  ;;  %v3561_v25 = vpop.permute.xlu1 %3560 }
 0x4d3   : > { %v3639_v5 = vrot.slane %v3561_v25, 1 }
 0x4d4   : > { %v3669_v13 = vsel %vm7484_vm2, %v3637_v16, %v3638_v24  ;;  %vm7505_vm2 = vmmov %vm7471_vm0 }
 0x4d5   : > { %v3399_v21 = vpop.permute.xlu0 %3398  ;;  %v3668_v42 = vsel %vm7485_vm13, %v3638_v24, %v3639_v5  ;;  %v3701_v35 = vsel %vm7487_vm15, %v3669_v13, 0.0  ;;  %vm7508_vm15 = vmmov %vm7471_vm0 }
 0x4d6   : > { %v6628_v51 = vadd.f32 %v3399_v21, %v3222_v41  ;;  %v3401_v7 = vpop.permute.xlu1 %3400  ;;  %3782 = vrot.lane.b32.xlu0 %v3668_v42, %s4456_s29  ;;  %3780 = vrot.lane.b32.xlu1 %v3701_v35, %s4456_s29  ;;  %v3225_v41 = vadd.f32 %v6387_v38, %v6469_v47  ;;  %v7490_v42 = vld [vmem:[#allocation70_spill] sm:$0xff]  ;;  %v3226_v38 = vadd.f32 %v6469_v47, %v6408_v57 }
 0x4d7   : > { %v6632_v23 = vadd.f32 %v3401_v7, %v3223_v15  ;;  %vm7491_vm7 = vnez %v7490_v42 }
 0x4d9   : > { %v3563_v16 = vpop.permute.xlu0 %3562 }
 0x4da   : > { %v3640_v33 = vrot.slane %v3563_v16, 1  ;;  %v3565_v25 = vpop.permute.xlu1 %3564 }
 0x4db   : > { %v3641_v8 = vrot.slane %v3565_v25, 1 }
 0x4dc   : > { %v3667_v24 = vsel %vm7488_vm14, %v3639_v5, %v3640_v33  ;;  %vm7509_vm14 = vmmov %vm7471_vm0 }
 0x4dd   : > { %v3403_v13 = vpop.permute.xlu0 %3402  ;;  %v3666_v21 = vsel %vm7489_vm3, %v3640_v33, %v3641_v8  ;;  %v3703_v15 = vsel %vm7491_vm7, %v3667_v24, 0.0  ;;  %vm7513_vm7 = vmmov %vm7471_vm0 }
 0x4de   : > { %v6644_v30 = vadd.f32 %v3403_v13, %v3224_v45  ;;  %v3405_v35 = vpop.permute.xlu1 %3404  ;;  %3786 = vrot.lane.b32.xlu0 %v3666_v21, %s4456_s29  ;;  %3784 = vrot.lane.b32.xlu1 %v3703_v15, %s4456_s29  ;;  %v3227_v45 = vadd.f32 %v6405_v58, %v6469_v47  ;;  %v7493_v21 = vld [vmem:[#allocation71_spill] sm:$0xff]  ;;  %v3228_v58 = vadd.f32 %v6469_v47, %v6426_v26 }
 0x4df   : > { %v6648_v28 = vadd.f32 %v3405_v35, %v3225_v41  ;;  %vm7494_vm5 = vnez %v7493_v21 }
 0x4e1   : > { %v3567_v5 = vpop.permute.xlu0 %3566 }
 0x4e2   : > { %v3642_v7 = vrot.slane %v3567_v5, 1  ;;  %v3569_v16 = vpop.permute.xlu1 %3568 }
 0x4e3   : > { %v3643_v25 = vrot.slane %v3569_v16, 1 }
 0x4e4   : > { %v3665_v33 = vsel %vm7471_vm0, %v3641_v8, %v3642_v7 }
 0x4e5   : > { %v3407_v24 = vpop.permute.xlu0 %3406  ;;  %v3664_v13 = vsel %vm7492_vm8, %v3642_v7, %v3643_v25  ;;  %v3705_v41 = vsel %vm7494_vm5, %v3665_v33, 0.0  ;;  %vm7516_vm5 = vmmov %vm7471_vm0 }
 0x4e6   : > { %v6660_v42 = vadd.f32 %v3407_v24, %v3226_v38  ;;  %v3409_v15 = vpop.permute.xlu1 %3408  ;;  %3790 = vrot.lane.b32.xlu0 %v3664_v13, %s4456_s29  ;;  %3788 = vrot.lane.b32.xlu1 %v3705_v41, %s4456_s29  ;;  %v3229_v38 = vadd.f32 %v6423_v6, %v6469_v47  ;;  %v7497_v13 = vld [vmem:[#allocation72_spill] sm:$0xff]  ;;  %v3230_v6 = vadd.f32 %v6469_v47, %v6444_v27 }
 0x4e7   : > { %v6664_v57 = vadd.f32 %v3409_v15, %v3227_v45  ;;  %vm7498_vm10 = vnez %v7497_v13 }
 0x4e9   : > { %v3571_v8 = vpop.permute.xlu0 %3570 }
 0x4ea   : > { %v3644_v35 = vrot.slane %v3571_v8, 1  ;;  %v3573_v5 = vpop.permute.xlu1 %3572 }
 0x4eb   : > { %v3645_v16 = vrot.slane %v3573_v5, 1 }
 0x4ec   : > { %v3663_v7 = vsel %vm7495_vm9, %v3643_v25, %v3644_v35 }
 0x4ed   : > { %v3411_v33 = vpop.permute.xlu0 %3410  ;;  %v3662_v24 = vsel %vm7496_vm6, %v3644_v35, %v3645_v16  ;;  %v3707_v45 = vsel %vm7498_vm10, %v3663_v7, 0.0  ;;  %vm7552_vm6 = vcmask 31744  }
 0x4ee   : > { %v6676_v21 = vadd.f32 %v3411_v33, %v3228_v58  ;;  %v3413_v41 = vpop.permute.xlu1 %3412  ;;  %3794 = vrot.lane.b32.xlu0 %v3662_v24, %s4456_s29  ;;  %3792 = vrot.lane.b32.xlu1 %v3707_v45, %s4456_s29  ;;  %v3231_v58 = vadd.f32 %v6441_v0, %v6469_v47  ;;  %v7501_v24 = vld [vmem:[#allocation74_spill] sm:$0xff]  ;;  %v3233_v0 = vadd.f32 %v6459_v56, %v6469_v47  ;;  %vm7553_vm10 = vmmov %vm7552_vm6 }
 0x4ef   : > { %v6680_v26 = vadd.f32 %v3413_v41, %v3229_v38  ;;  %vm7502_vm4 = vnez %v7501_v24  ;;  %v7506_v24 = vld [vmem:[#allocation77_spill] sm:$0xff] }
 0x4f0   : > { %vm7507_vm13 = vnez %v7506_v24 }
 0x4f1   : > { %v3575_v25 = vpop.permute.xlu0 %3574 }
 0x4f2   : > { %v3646_v15 = vrot.slane %v3575_v25, 1  ;;  %v3577_v8 = vpop.permute.xlu1 %3576 }
 0x4f3   : > { %v3647_v5 = vrot.slane %v3577_v8, 1 }
 0x4f4   : > { %v3661_v35 = vsel %vm7499_vm1, %v3645_v16, %v3646_v15  ;;  %vm7554_vm1 = vmmov %vm7552_vm6 }
 0x4f5   : > { %v3415_v7 = vpop.permute.xlu0 %3414  ;;  %v3660_v33 = vsel %vm7500_vm11, %v3646_v15, %v3647_v5  ;;  %v3709_v38 = vsel %vm7502_vm4, %v3661_v35, 0.0  ;;  %v3232_v35 = vadd.f32 %v6469_v47, %v6464_v17  ;;  %vm7555_vm11 = vmmov %vm7554_vm1 }
 0x4f6   : > { %v6692_v13 = vadd.f32 %v3415_v7, %v3230_v6  ;;  %v3417_v45 = vpop.permute.xlu1 %3416  ;;  %3798 = vrot.lane.b32.xlu0 %v3660_v33, %s4456_s29  ;;  %3796 = vrot.lane.b32.xlu1 %v3709_v38, %s4456_s29  ;;  %vm7556_vm4 = vmmov %vm7554_vm1 }
 0x4f7   : > { %v6696_v27 = vadd.f32 %v3417_v45, %v3231_v58 }
 0x4f9   : > { %7503 = vst [vmem:[#allocation58_spill] sm:$0xff] %v6696_v27  ;;  %v3235_v27 = vadd.f32 %v6471_v44, %v6469_v47 }
 0x4fd   : > { %v3581_v16 = vpop.permute.xlu1 %3580 }
 0x4fe   : > { %v3649_v41 = vrot.slane %v3581_v16, 1  ;;  %v3579_v25 = vpop.permute.xlu0 %3578 }
 0x4ff   : > { %v3648_v8 = vrot.slane %v3579_v25, 1 }
 0x501   : > { %v3421_v15 = vpop.permute.xlu1 %3420  ;;  %v3658_v6 = vsel %vm7504_vm12, %v3648_v8, %v3649_v41  ;;  %v3659_v7 = vsel %vm7505_vm2, %v3647_v5, %v3648_v8  ;;  %v3234_v8 = vadd.f32 %v6469_v47, %v6479_v43  ;;  %vm7557_vm12 = vmmov %vm7554_vm1 }
 0x502   : > { %v6706_v33 = vadd.f32 %v3421_v15, %v3233_v0  ;;  %v3419_v58 = vpop.permute.xlu0 %3418  ;;  %3802 = vrot.lane.b32.xlu0 %v3658_v6, %s4456_s29  ;;  %v3711_v38 = vsel %vm7507_vm13, %v3659_v7, 0.0  ;;  %v7510_v7 = vld [vmem:[#allocation78_spill] sm:$0xff]  ;;  %vm7558_vm2 = vmmov %vm7554_vm1 }
 0x503   : > { %v6711_v45 = vadd.f32 %v3419_v58, %v3232_v35  ;;  %3800 = vrot.lane.b32.xlu1 %v3711_v38, %s4456_s29  ;;  %vm7511_vm3 = vnez %v7510_v7  ;;  %vm7559_vm13 = vmmov %vm7554_vm1 }
 0x505   : > { %v3585_v56 = vpop.permute.xlu1 %3584 }
 0x506   : > { %v3651_v17 = vrot.slane %v3585_v56, 1  ;;  %v3583_v16 = vpop.permute.xlu0 %3582 }
 0x507   : > { %v3650_v25 = vrot.slane %v3583_v16, 1  ;;  %v3237_v16 = vadd.f32 %v6485_v12, %v6469_v47 }
 0x509   : > { %v3425_v5 = vpop.permute.xlu1 %3424  ;;  %v3656_v0 = vsel %vm7508_vm15, %v3650_v25, %v3651_v17  ;;  %v3657_v15 = vsel %vm7509_vm14, %v3649_v41, %v3650_v25  ;;  %vm7560_vm15 = vmmov %vm7554_vm1 }
 0x50a   : > { %v6722_v35 = vadd.f32 %v3425_v5, %v3235_v27  ;;  %v3423_v6 = vpop.permute.xlu0 %3422  ;;  %3806 = vrot.lane.b32.xlu0 %v3656_v0, %s4456_s29  ;;  %v3713_v58 = vsel %vm7511_vm3, %v3657_v15, 0.0  ;;  %v7512_v27 = vrot.slane %v6499_v52, 1  ;;  %v3207_v15 = vadd.f32 %v6228_v61, %v6469_v47  ;;  %vm7561_vm14 = vmmov %vm7554_vm1 }
 0x50b   : > { %v6727_v24 = vadd.f32 %v3423_v6, %v3234_v8  ;;  %3804 = vrot.lane.b32.xlu1 %v3713_v58, %s4456_s29  ;;  %v7514_v8 = vld [vmem:[#allocation79_spill] sm:$0xff]  ;;  %v3236_v58 = vadd.f32 %v6469_v47, %v6494_v50  ;;  %v3209_v61 = vadd.f32 %v6243_v22, %v6469_v47  ;;  %v3208_v22 = vadd.f32 %v6469_v47, %v6246_v10  ;;  %vm7562_vm3 = vmmov %vm7554_vm1 }
 0x50c   : > { %vm7515_vm8 = vnez %v7514_v8  ;;  %v3463_v52 = vadd.f32 %v6501_v19, %v3207_v15 }
 0x50d   : > { %v3589_v44 = vpop.permute.xlu1 %3588  ;;  %v3465_v19 = vadd.f32 %v6521_v31, %v3209_v61  ;;  %v3464_v31 = vadd.f32 %v6519_v36, %v3208_v22  ;;  %v3467_v61 = vadd.f32 %v6542_v1, %v3211_v14 }
 0x50e   : > { %v3653_v43 = vrot.slane %v3589_v44, 1  ;;  %v3587_v38 = vpop.permute.xlu0 %3586 }
 0x50f   : > { %v3652_v56 = vrot.slane %v3587_v38, 1 }
 0x510   : > { %v3685_v41 = vsel %vm7513_vm7, %v3653_v43, %v7512_v27  ;;  %vm7563_vm7 = vmmov %vm7554_vm1 }
 0x511   : > { %v3429_v25 = vpop.permute.xlu1 %3428  ;;  %v3654_v5 = vsel %vm7471_vm0, %v3652_v56, %v3653_v43  ;;  %v3717_v0 = vsel %vm7515_vm8, %v3685_v41, 0.0  ;;  %v3655_v12 = vsel %vm7516_vm5, %v3651_v17, %v3652_v56  ;;  %v7517_v43 = vld [vmem:[#allocation81_spill] sm:$0xff]  ;;  %v7519_v56 = vld [vmem:[#allocation4_spill] sm:$0xff]  ;;  %vm7564_vm0 = vmmov %vm7554_vm1 }
 0x512   : > { %v6742_v6 = vadd.f32 %v3429_v25, %v3237_v16  ;;  %v3367_v7 = vpop.permute.xlu0 %3366  ;;  %3810 = vrot.lane.b32.xlu0 %v3654_v5, %s4456_s29  ;;  %3812 = vrot.lane.b32.xlu1 %v3717_v0, %s4456_s29  ;;  %vm7518_vm9 = vnez %v7517_v43  ;;  %vm7565_vm8 = vmmov %vm7564_vm0 }
 0x513   : > { %v3715_v38 = vsel %vm7518_vm9, %v3655_v12, 0.0  ;;  %v3462_v41 = vadd.f32 %v3367_v7, %v3206_v39  ;;  %v7520_v12 = vld [vmem:[#allocation5_spill] sm:$0xff]  ;;  %vm7566_vm5 = vmmov %vm7564_vm0 }
 0x514   : > { %vm7567_vm9 = vmmov %vm7564_vm0 }
 0x515   : > { %v3753_v44 = vpop.permute.xlu1 %3752 }
 0x516   : > { %v3847_v16 = vadd.f32 %v3753_v44, %v3463_v52  ;;  %v3427_v27 = vpop.permute.xlu0 %3426  ;;  %3808 = vrot.lane.b32.xlu1 %v3715_v38, %s4456_s29  ;;  %v3210_v38 = vadd.f32 %v6469_v47, %v6264_v59  ;;  %v7523_v59 = vld [vmem:[#allocation7_spill] sm:$0xff] }
 0x517   : > { %v6758_v17 = vadd.f32 %v3427_v27, %v3236_v58  ;;  %v7521_v58 = vld [vmem:[#allocation3_spill] sm:$0xff] }
 0x518   : > { %v3879_v50 = vadd.f32 %v3847_v16, %v7519_v56  ;;  %v3466_v39 = vadd.f32 %v6538_v49, %v3210_v38  ;;  %v7524_v49 = vld [vmem:[#allocation8_spill] sm:$0xff]  ;;  %v7526_v38 = vld [vmem:[#allocation10_spill] sm:$0xff] }
 0x519   : > { %v3757_v25 = vpop.permute.xlu1 %3756 }
 0x51a   : > { %v3911_v5 = vmax.f32 %v3879_v50, 0.0  ;;  %v3849_v8 = vadd.f32 %v3757_v25, %v3465_v19  ;;  %v3751_v0 = vpop.permute.xlu0 %3750  ;;  %v7522_v19 = vld [vmem:[#allocation6_spill] sm:$0xff]  ;;  %v3212_v50 = vadd.f32 %v6469_v47, %v6282_v40 }
 0x51b   : > { %v3846_v15 = vadd.f32 %v3751_v0, %v3462_v41 }
 0x51c   : > { %v3881_v52 = vadd.f32 %v3849_v8, %v7520_v12  ;;  %3976 = vrot.lane.b32.xlu1 %v3911_v5, %s4459_s8  ;;  %v3213_v5 = vadd.f32 %v6279_v37, %v6469_v47  ;;  %v3468_v8 = vadd.f32 %v6555_v55, %v3212_v50  ;;  %v3214_v12 = vadd.f32 %v6469_v47, %v6300_v4 }
 0x51d   : > { %v3878_v44 = vadd.f32 %v3846_v15, %v7521_v58  ;;  %v7525_v58 = vld [vmem:[#allocation9_spill] sm:$0xff]  ;;  %v3215_v4 = vadd.f32 %v6297_v20, %v6469_v47 }
 0x51e   : > { %v3913_v7 = vmax.f32 %v3881_v52, 0.0  ;;  %v3755_v43 = vpop.permute.xlu0 %3754  ;;  %v3469_v40 = vadd.f32 %v6559_v62, %v3213_v5  ;;  %v3470_v37 = vadd.f32 %v6570_v11, %v3214_v12  ;;  %v3216_v62 = vadd.f32 %v6469_v47, %v6318_v48  ;;  %v7528_v20 = vld [vmem:[#allocation13_spill] sm:$0xff] }
 0x51f   : > { %v3910_v10 = vmax.f32 %v3878_v44, 0.0  ;;  %v3848_v16 = vadd.f32 %v3755_v43, %v3464_v31  ;;  %v3471_v11 = vadd.f32 %v6574_v46, %v3215_v4  ;;  %v3218_v46 = vadd.f32 %v6469_v47, %v6336_v3 }
 0x520   : > { %3980 = vrot.lane.b32.xlu1 %v3913_v7, %s4459_s8  ;;  %v3761_v27 = vpop.permute.xlu1 %3760  ;;  %v3219_v3 = vadd.f32 %v6333_v34, %v6469_v47  ;;  %v7533_v34 = vld [vmem:[#allocation16_spill] sm:$0xff] }
 0x521   : > { %v3880_v2 = vadd.f32 %v3848_v16, %v7522_v19  ;;  %v3851_v56 = vadd.f32 %v3761_v27, %v3467_v61  ;;  %3974 = vrot.lane.b32.xlu0 %v3910_v10, %s4459_s8  ;;  %v7527_v27 = vld [vmem:[#allocation11_spill] sm:$0xff]  ;;  %v3472_v19 = vadd.f32 %v6582_v60, %v3216_v62 }
 0x522   : > { %v3759_v36 = vpop.permute.xlu0 %3758 }
 0x523   : > { %v3912_v41 = vmax.f32 %v3880_v2, 0.0  ;;  %v3883_v25 = vadd.f32 %v3851_v56, %v7523_v59  ;;  %v3850_v1 = vadd.f32 %v3759_v36, %v3466_v39  ;;  %v7529_v59 = vld [vmem:[#allocation12_spill] sm:$0xff] }
 0x525   : > { %v3915_v0 = vmax.f32 %v3883_v25, 0.0  ;;  %v3882_v22 = vadd.f32 %v3850_v1, %v7524_v49  ;;  %3978 = vrot.lane.b32.xlu0 %v3912_v41, %s4459_s8  ;;  %v3217_v1 = vadd.f32 %v6315_v54, %v6469_v47  ;;  %v7531_v54 = vld [vmem:[#allocation14_spill] sm:$0xff] }
 0x526   : > { %v3763_v15 = vpop.permute.xlu0 %3762 }
 0x527   : > { %v3914_v52 = vmax.f32 %v3882_v22, 0.0  ;;  %v3852_v14 = vadd.f32 %v3763_v15, %v3468_v8  ;;  %3984 = vrot.lane.b32.xlu1 %v3915_v0, %s4459_s8  ;;  %v3473_v8 = vadd.f32 %v6588_v63, %v3217_v1  ;;  %v3474_v0 = vadd.f32 %v6594_v29, %v3218_v46 }
 0x528   : > { %v3765_v31 = vpop.permute.xlu1 %3764  ;;  %v3220_v63 = vadd.f32 %v6469_v47, %v6354_v18 }
 0x529   : > { %v3884_v55 = vadd.f32 %v3852_v14, %v7525_v58  ;;  %v3853_v44 = vadd.f32 %v3765_v31, %v3469_v40  ;;  %3982 = vrot.lane.b32.xlu0 %v3914_v52, %s4459_s8  ;;  %v7530_v40 = vld [vmem:[#allocation15_spill] sm:$0xff] }
 0x52a   : > { %v3767_v7 = vpop.permute.xlu0 %3766  ;;  %v3476_v58 = vadd.f32 %v6606_v9, %v3220_v63 }
 0x52b   : > { %v3916_v43 = vmax.f32 %v3884_v55, 0.0  ;;  %v3885_v61 = vadd.f32 %v3853_v44, %v7526_v38  ;;  %v3854_v10 = vadd.f32 %v3767_v7, %v3470_v37  ;;  %v3475_v37 = vadd.f32 %v6600_v32, %v3219_v3  ;;  %v7532_v38 = vld [vmem:[#allocation17_spill] sm:$0xff] }
 0x52d   : > { %v3917_v16 = vmax.f32 %v3885_v61, 0.0  ;;  %v3886_v39 = vadd.f32 %v3854_v10, %v7527_v27  ;;  %3986 = vrot.lane.b32.xlu0 %v3916_v43, %s4459_s8 }
 0x52f   : > { %v3918_v2 = vmax.f32 %v3886_v39, 0.0  ;;  %3988 = vrot.lane.b32.xlu1 %v3917_v16, %s4459_s8  ;;  %v7534_v16 = vld [vmem:[#allocation19_spill] sm:$0xff]  ;;  %v7535_v39 = vld [vmem:[#allocation18_spill] sm:$0xff] }
 0x530   : > { %v3771_v56 = vpop.permute.xlu0 %3770  ;;  %v3769_v36 = vpop.permute.xlu1 %3768 }
 0x531   : > { %v3856_v50 = vadd.f32 %v3771_v56, %v3472_v19  ;;  %v3855_v41 = vadd.f32 %v3769_v36, %v3471_v11  ;;  %3990 = vrot.lane.b32.xlu0 %v3918_v2, %s4459_s8 }
 0x533   : > { %v3888_v48 = vadd.f32 %v3856_v50, %v7528_v20  ;;  %v3887_v25 = vadd.f32 %v3855_v41, %v7529_v59  ;;  %v7536_v20 = vld [vmem:[#allocation21_spill] sm:$0xff] }
 0x535   : > { %v3920_v60 = vmax.f32 %v3888_v48, 0.0  ;;  %v3919_v5 = vmax.f32 %v3887_v25, 0.0  ;;  %v7537_v48 = vld [vmem:[#allocation20_spill] sm:$0xff] }
 0x537   : > { %3994 = vrot.lane.b32.xlu0 %v3920_v60, %s4459_s8  ;;  %3992 = vrot.lane.b32.xlu1 %v3919_v5, %s4459_s8 }
 0x538   : > { %v3775_v49 = vpop.permute.xlu0 %3774  ;;  %v3773_v22 = vpop.permute.xlu1 %3772 }
 0x539   : > { %v3858_v15 = vadd.f32 %v3775_v49, %v3474_v0  ;;  %v3857_v12 = vadd.f32 %v3773_v22, %v3473_v8  ;;  %v7538_v8 = vld [vmem:[#allocation23_spill] sm:$0xff]  ;;  %v7539_v0 = vld [vmem:[#allocation22_spill] sm:$0xff] }
 0x53b   : > { %v3890_v52 = vadd.f32 %v3858_v15, %v7530_v40  ;;  %v3889_v14 = vadd.f32 %v3857_v12, %v7531_v54  ;;  %v7540_v54 = vld [vmem:[#allocation25_spill] sm:$0xff] }
 0x53d   : > { %v3922_v31 = vmax.f32 %v3890_v52, 0.0  ;;  %v3921_v29 = vmax.f32 %v3889_v14, 0.0  ;;  %v7541_v14 = vld [vmem:[#allocation24_spill] sm:$0xff] }
 0x53f   : > { %3998 = vrot.lane.b32.xlu0 %v3922_v31, %s4459_s8  ;;  %3996 = vrot.lane.b32.xlu1 %v3921_v29, %s4459_s8 }
 0x540   : > { %v3779_v55 = vpop.permute.xlu0 %3778  ;;  %v3777_v44 = vpop.permute.xlu1 %3776 }
 0x541   : > { %v3860_v7 = vadd.f32 %v3779_v55, %v3476_v58  ;;  %v3859_v43 = vadd.f32 %v3777_v44, %v3475_v37  ;;  %v7542_v55 = vld [vmem:[#allocation27_spill] sm:$0xff]  ;;  %v7543_v44 = vld [vmem:[#allocation26_spill] sm:$0xff] }
 0x543   : > { %v3892_v61 = vadd.f32 %v3860_v7, %v7532_v38  ;;  %v3891_v10 = vadd.f32 %v3859_v43, %v7533_v34 }
 0x545   : > { %v3924_v4 = vmax.f32 %v3892_v61, 0.0  ;;  %v3923_v18 = vmax.f32 %v3891_v10, 0.0  ;;  %v7544_v10 = vld [vmem:[#allocation58_spill] sm:$0xff] }
 0x547   : > { %4002 = vrot.lane.b32.xlu0 %v3924_v4, %s4459_s8  ;;  %4000 = vrot.lane.b32.xlu1 %v3923_v18, %s4459_s8  ;;  %v7545_v18 = vld [vmem:[#allocation29_spill] sm:$0xff] }
 0x548   : > { %v3783_v47 = vpop.permute.xlu0 %3782  ;;  %v3781_v32 = vpop.permute.xlu1 %3780 }
 0x549   : > { %v3862_v9 = vadd.f32 %v3783_v47, %v6628_v51  ;;  %v3861_v62 = vadd.f32 %v3781_v32, %v6616_v53  ;;  %v7546_v47 = vld [vmem:[#allocation28_spill] sm:$0xff] }
 0x54b   : > { %v3894_v27 = vadd.f32 %v3862_v9, %v7534_v16  ;;  %v3893_v11 = vadd.f32 %v3861_v62, %v7535_v39 }
 0x54d   : > { %v3926_v19 = vmax.f32 %v3894_v27, 0.0  ;;  %v3925_v2 = vmax.f32 %v3893_v11, 0.0 }
 0x54f   : > { %4006 = vrot.lane.b32.xlu0 %v3926_v19, %s4459_s8  ;;  %4004 = vrot.lane.b32.xlu1 %v3925_v2, %s4459_s8  ;;  %v7548_v19 = vld [vmem:[#allocation30_spill] sm:$0xff] }
 0x550   : > { %v3787_v56 = vpop.permute.xlu0 %3786  ;;  %v3785_v36 = vpop.permute.xlu1 %3784 }
 0x551   : > { %v3864_v50 = vadd.f32 %v3787_v56, %v6644_v30  ;;  %v3863_v41 = vadd.f32 %v3785_v36, %v6632_v23 }
 0x553   : > { %v3896_v51 = vadd.f32 %v3864_v50, %v7536_v20  ;;  %v3895_v53 = vadd.f32 %v3863_v41, %v7537_v48 }
 0x555   : > { %v3928_v59 = vmax.f32 %v3896_v51, 0.0  ;;  %v3927_v25 = vmax.f32 %v3895_v53, 0.0  ;;  %v7549_v51 = vld [vmem:[#allocation33_spill] sm:$0xff] }
 0x557   : > { %4010 = vrot.lane.b32.xlu0 %v3928_v59, %s4459_s8  ;;  %4008 = vrot.lane.b32.xlu1 %v3927_v25, %s4459_s8  ;;  %v7550_v25 = vld [vmem:[#allocation32_spill] sm:$0xff] }
 0x558   : > { %v3791_v1 = vpop.permute.xlu0 %3790  ;;  %v3789_v46 = vpop.permute.xlu1 %3788 }
 0x559   : > { %v3866_v60 = vadd.f32 %v3791_v1, %v6660_v42  ;;  %v3865_v5 = vadd.f32 %v3789_v46, %v6648_v28  ;;  %v7551_v46 = vld [vmem:[#allocation34_spill] sm:$0xff] }
 0x55b   : > { %v3898_v30 = vadd.f32 %v3866_v60, %v7538_v8  ;;  %v3897_v23 = vadd.f32 %v3865_v5, %v7539_v0 }
 0x55d   : > { %v3930_v49 = vmax.f32 %v3898_v30, 0.0  ;;  %v3929_v22 = vmax.f32 %v3897_v23, 0.0 }
 0x55f   : > { %4014 = vrot.lane.b32.xlu0 %v3930_v49, %s4459_s8  ;;  %4012 = vrot.lane.b32.xlu1 %v3929_v22, %s4459_s8 }
 0x560   : > { %v3795_v15 = vpop.permute.xlu0 %3794  ;;  %v3793_v12 = vpop.permute.xlu1 %3792 }
 0x561   : > { %v3868_v40 = vadd.f32 %v3795_v15, %v6676_v21  ;;  %v3867_v52 = vadd.f32 %v3793_v12, %v6664_v57 }
 0x563   : > { %v3900_v42 = vadd.f32 %v3868_v40, %v7540_v54  ;;  %v3899_v28 = vadd.f32 %v3867_v52, %v7541_v14 }
 0x565   : > { %v3932_v3 = vmax.f32 %v3900_v42, 0.0  ;;  %v3931_v63 = vmax.f32 %v3899_v28, 0.0 }
 0x567   : > { %4018 = vrot.lane.b32.xlu0 %v3932_v3, %s4459_s8  ;;  %4016 = vrot.lane.b32.xlu1 %v3931_v63, %s4459_s8 }
 0x568   : > { %v3799_v31 = vpop.permute.xlu0 %3798  ;;  %v3797_v29 = vpop.permute.xlu1 %3796 }
 0x569   : > { %v3870_v37 = vadd.f32 %v3799_v31, %v6692_v13  ;;  %v3869_v58 = vadd.f32 %v3797_v29, %v6680_v26 }
 0x56b   : > { %v3902_v21 = vadd.f32 %v3870_v37, %v7542_v55  ;;  %v3901_v57 = vadd.f32 %v3869_v58, %v7543_v44 }
 0x56d   : > { %v3934_v7 = vmax.f32 %v3902_v21, 0.0  ;;  %v3933_v43 = vmax.f32 %v3901_v57, 0.0 }
 0x56f   : > { %4022 = vrot.lane.b32.xlu0 %v3934_v7, %s4459_s8  ;;  %4020 = vrot.lane.b32.xlu1 %v3933_v43, %s4459_s8 }
 0x574   : > { %v3803_v38 = vpop.permute.xlu0 %3802 }
 0x575   : > { %v3872_v61 = vadd.f32 %v3803_v38, %v6711_v45  ;;  %v3801_v34 = vpop.permute.xlu1 %3800  ;;  %v7547_v45 = vld [vmem:[#allocation31_spill] sm:$0xff] }
 0x576   : > { %v3871_v4 = vadd.f32 %v3801_v34, %v7544_v10 }
 0x577   : > { %v3904_v13 = vadd.f32 %v3872_v61, %v7545_v18 }
 0x578   : > { %v3903_v26 = vadd.f32 %v3871_v4, %v7546_v47 }
 0x579   : > { %v3936_v32 = vmax.f32 %v3904_v13, 0.0 }
 0x57a   : > { %v3935_v9 = vmax.f32 %v3903_v26, 0.0 }
 0x57b   : > { %4026 = vrot.lane.b32.xlu0 %v3936_v32, %s4459_s8 }
 0x57c   : > { %v3807_v62 = vpop.permute.xlu0 %3806  ;;  %4024 = vrot.lane.b32.xlu1 %v3935_v9, %s4459_s8 }
 0x57d   : > { %v3874_v16 = vadd.f32 %v3807_v62, %v6727_v24  ;;  %v3805_v27 = vpop.permute.xlu1 %3804 }
 0x57e   : > { %v3873_v39 = vadd.f32 %v3805_v27, %v6706_v33 }
 0x57f   : > { %v3906_v11 = vadd.f32 %v3874_v16, %v7547_v45 }
 0x580   : > { %v3905_v2 = vadd.f32 %v3873_v39, %v7548_v19 }
 0x581   : > { %v3938_v56 = vmax.f32 %v3906_v11, 0.0 }
 0x582   : > { %v3937_v36 = vmax.f32 %v3905_v2, 0.0 }
 0x583   : > { %4030 = vrot.lane.b32.xlu0 %v3938_v56, %s4459_s8 }
 0x584   : > { %v3811_v50 = vpop.permute.xlu0 %3810  ;;  %4028 = vrot.lane.b32.xlu1 %v3937_v36, %s4459_s8  ;;  %v3813_v41 = vpop.permute.xlu1 %3812 }
 0x585   : > { %v3876_v20 = vadd.f32 %v3811_v50, %v6758_v17  ;;  %v3877_v33 = vadd.f32 %v3813_v41, %v6742_v6 }
 0x587   : > { %v3908_v24 = vadd.f32 %v3876_v20, %v7549_v51  ;;  %v3909_v17 = vadd.f32 %v3877_v33, %v7551_v46 }
 0x588   : > { %v3809_v48 = vpop.permute.xlu1 %3808 }
 0x589   : > { %v3940_v53 = vmax.f32 %v3908_v24, 0.0  ;;  %v3875_v59 = vadd.f32 %v3809_v48, %v6722_v35  ;;  %v3941_v60 = vmax.f32 %v3909_v17, 0.0 }
 0x58b   : > { %v3907_v1 = vadd.f32 %v3875_v59, %v7550_v25  ;;  %4034 = vrot.lane.b32.xlu0 %v3940_v53, %s4459_s8 }
 0x58d   : > { %v3939_v6 = vmax.f32 %v3907_v1, 0.0 }
 0x58e   : > { %v3977_v35 = vpop.permute.xlu1 %3976 }
 0x58f   : > { %4071 = vst.msk [vmem:[%s6880_s17 + $0x8] sm:$0xff] %vm7552_vm6, %v3977_v35  ;;  %4032 = vrot.lane.b32.xlu1 %v3939_v6, %s4459_s8  ;;  %vm7568_vm6 = vmmov %vm7564_vm0 }
 0x592   : > { %v3981_v5 = vpop.permute.xlu1 %3980 }
 0x593   : > { %4073 = vst.msk [vmem:[%s6880_s17 + $0x18] sm:$0xff] %vm7553_vm10, %v3981_v5  ;;  %v3975_v8 = vpop.permute.xlu0 %3974  ;;  %4036 = vrot.lane.b32.xlu1 %v3941_v60, %s4459_s8  ;;  %vm7569_vm10 = vmmov %vm7564_vm0 }
 0x594   : > { %4070 = vst.msk [vmem:[%s6880_s17] sm:$0xff] %vm7554_vm1, %v3975_v8  ;;  %vm7570_vm1 = vmmov %vm7564_vm0 }
 0x597   : > { %v3979_v30 = vpop.permute.xlu0 %3978 }
 0x598   : > { %4072 = vst.msk [vmem:[%s6880_s17 + $0x10] sm:$0xff] %vm7555_vm11, %v3979_v30  ;;  %vm7571_vm11 = vmmov %vm7564_vm0 }
 0x599   : > { %v3985_v0 = vpop.permute.xlu1 %3984 }
 0x59a   : > { %4075 = vst.msk [vmem:[%s6880_s17 + $0x28] sm:$0xff] %vm7556_vm4, %v3985_v0  ;;  %vm7572_vm4 = vmmov %vm7564_vm0 }
 0x59b   : > { %v3983_v23 = vpop.permute.xlu0 %3982 }
 0x59c   : > { %4074 = vst.msk [vmem:[%s6880_s17 + $0x20] sm:$0xff] %vm7557_vm12, %v3983_v23  ;;  %vm7573_vm12 = vmmov %vm7564_vm0 }
 0x59f   : > { %v3987_v49 = vpop.permute.xlu0 %3986 }
 0x5a0   : > { %4076 = vst.msk [vmem:[%s6880_s17 + $0x30] sm:$0xff] %vm7558_vm2, %v3987_v49  ;;  %vm7574_vm2 = vmmov %vm7564_vm0 }
 0x5a1   : > { %v3989_v22 = vpop.permute.xlu1 %3988 }
 0x5a2   : > { %4077 = vst.msk [vmem:[%s6880_s17 + $0x38] sm:$0xff] %vm7559_vm13, %v3989_v22  ;;  %vm7575_vm13 = vmmov %vm7564_vm0 }
 0x5a3   : > { %v3991_v15 = vpop.permute.xlu0 %3990 }
 0x5a4   : > { %4078 = vst.msk [vmem:[%s6880_s17 + $0x40] sm:$0xff] %vm7560_vm15, %v3991_v15  ;;  %vm7576_vm15 = vmmov %vm7564_vm0 }
 0x5a9   : > { %v3995_v12 = vpop.permute.xlu0 %3994  ;;  %v3993_v40 = vpop.permute.xlu1 %3992 }
 0x5aa   : > { %4080 = vst.msk [vmem:[%s6880_s17 + $0x50] sm:$0xff] %vm7561_vm14, %v3995_v12  ;;  %vm7577_vm14 = vmmov %vm7564_vm0 }
 0x5ab   : > { %4079 = vst.msk [vmem:[%s6880_s17 + $0x48] sm:$0xff] %vm7562_vm3, %v3993_v40  ;;  %vm7578_vm3 = vmmov %vm7564_vm0 }
 0x5b1   : > { %v3999_v52 = vpop.permute.xlu0 %3998  ;;  %v3997_v54 = vpop.permute.xlu1 %3996 }
 0x5b2   : > { %4082 = vst.msk [vmem:[%s6880_s17 + $0x60] sm:$0xff] %vm7563_vm7, %v3999_v52  ;;  %vm7579_vm7 = vmmov %vm7564_vm0 }
 0x5b3   : > { %4081 = vst.msk [vmem:[%s6880_s17 + $0x58] sm:$0xff] %vm7564_vm0, %v3997_v54 }
 0x5b9   : > { %v4003_v42 = vpop.permute.xlu0 %4002  ;;  %v4001_v14 = vpop.permute.xlu1 %4000 }
 0x5ba   : > { %4084 = vst.msk [vmem:[%s6880_s17 + $0x70] sm:$0xff] %vm7565_vm8, %v4003_v42  ;;  %vm7580_vm8 = vmmov %vm7564_vm0 }
 0x5bb   : > { %4083 = vst.msk [vmem:[%s6880_s17 + $0x68] sm:$0xff] %vm7566_vm5, %v4001_v14  ;;  %vm7581_vm5 = vmmov %vm7564_vm0 }
 0x5c1   : > { %v4007_v28 = vpop.permute.xlu0 %4006  ;;  %v4005_v3 = vpop.permute.xlu1 %4004 }
 0x5c2   : > { %4086 = vst.msk [vmem:[%s6880_s17 + $0x80] sm:$0xff] %vm7567_vm9, %v4007_v28  ;;  %vm7582_vm9 = vmmov %vm7564_vm0 }
 0x5c3   : > { %4085 = vst.msk [vmem:[%s6880_s17 + $0x78] sm:$0xff] %vm7568_vm6, %v4005_v3 }
 0x5c9   : > { %v4011_v63 = vpop.permute.xlu0 %4010  ;;  %v4009_v31 = vpop.permute.xlu1 %4008 }
 0x5ca   : > { %4088 = vst.msk [vmem:[%s6880_s17 + $0x90] sm:$0xff] %vm7569_vm10, %v4011_v63 }
 0x5cb   : > { %4087 = vst.msk [vmem:[%s6880_s17 + $0x88] sm:$0xff] %vm7570_vm1, %v4009_v31 }
 0x5d1   : > { %v4015_v29 = vpop.permute.xlu0 %4014  ;;  %v4013_v37 = vpop.permute.xlu1 %4012 }
 0x5d2   : > { %4090 = vst.msk [vmem:[%s6880_s17 + $0xa0] sm:$0xff] %vm7571_vm11, %v4015_v29 }
 0x5d3   : > { %4089 = vst.msk [vmem:[%s6880_s17 + $0x98] sm:$0xff] %vm7572_vm4, %v4013_v37 }
 0x5d9   : > { %v4019_v58 = vpop.permute.xlu0 %4018  ;;  %v4017_v55 = vpop.permute.xlu1 %4016 }
 0x5da   : > { %4092 = vst.msk [vmem:[%s6880_s17 + $0xb0] sm:$0xff] %vm7573_vm12, %v4019_v58 }
 0x5db   : > { %4091 = vst.msk [vmem:[%s6880_s17 + $0xa8] sm:$0xff] %vm7574_vm2, %v4017_v55 }
 0x5e1   : > { %v4023_v21 = vpop.permute.xlu0 %4022  ;;  %v4021_v44 = vpop.permute.xlu1 %4020 }
 0x5e2   : > { %4094 = vst.msk [vmem:[%s6880_s17 + $0xc0] sm:$0xff] %vm7575_vm13, %v4023_v21 }
 0x5e3   : > { %4093 = vst.msk [vmem:[%s6880_s17 + $0xb8] sm:$0xff] %vm7576_vm15, %v4021_v44 }
 0x5ed   : > { %v4027_v57 = vpop.permute.xlu0 %4026 }
 0x5ee   : > { %4096 = vst.msk [vmem:[%s6880_s17 + $0xd0] sm:$0xff] %vm7577_vm14, %v4027_v57  ;;  %v4025_v7 = vpop.permute.xlu1 %4024 }
 0x5ef   : > { %4095 = vst.msk [vmem:[%s6880_s17 + $0xc8] sm:$0xff] %vm7578_vm3, %v4025_v7 }
 0x5f5   : > { %v4031_v43 = vpop.permute.xlu0 %4030 }
 0x5f6   : > { %4098 = vst.msk [vmem:[%s6880_s17 + $0xe0] sm:$0xff] %vm7579_vm7, %v4031_v43  ;;  %v4029_v38 = vpop.permute.xlu1 %4028 }
 0x5f7   : > { %4097 = vst.msk [vmem:[%s6880_s17 + $0xd8] sm:$0xff] %vm7564_vm0, %v4029_v38 }
 0x5fd   : > { %v4035_v61 = vpop.permute.xlu0 %4034 }
 0x5fe   : > { %4100 = vst.msk [vmem:[%s6880_s17 + $0xf0] sm:$0xff] %vm7580_vm8, %v4035_v61 }
 0x601   : > { %v4033_v34 = vpop.permute.xlu1 %4032 }
 0x602   : > { %4099 = vst.msk [vmem:[%s6880_s17 + $0xe8] sm:$0xff] %vm7581_vm5, %v4033_v34 }
 0x605   : > { %v4037_v10 = vpop.permute.xlu1 %4036 }
 0x606   : > { %4101 = vst.msk [vmem:[%s6880_s17 + $0xf8] sm:$0xff] %vm7582_vm9, %v4037_v10 }
 0x607 PF: > { %s15_s18 = sadd.s32 1, %s4452_s18  }
 0x608   : > { %p12_p4 = scmp.ge.s32.totalorder %s15_s18, 4  }
 0x60a   :  { %14 = sbr.rel (!%p12_p4) target bundleno = 1 (0x1), region = 70 }

</bundles_post_ra>
